<compile_context>
chip_gen: v7x
topology: tpu7x:2x2x1
jax: 0.10.0
libtpu: 0.0.40
codegen_flags: <defaults>
</compile_context>

<pallas_src>
import math
import functools

import jax
import jax.numpy as jnp
from jax.experimental import pallas as pl
from jax.experimental.pallas import tpu as pltpu


_NEG_BIG = -1e30  # finite "-inf": masked scores underflow to 0 after softmax


# ----------------------------- in-kernel helpers -----------------------------

def _layer_norm(x, g, b, eps=1e-6):
    # torch semantics: unbiased std (/(D-1)) and eps added to std (not var)
    d_feat = x.shape[-1]
    mu = jnp.mean(x, axis=-1, keepdims=True)
    d = x - mu
    var = jnp.sum(d * d, axis=-1, keepdims=True) * (1.0 / (d_feat - 1))
    sigma = jnp.sqrt(var)
    inv = pl.reciprocal(sigma + eps, approx=True)  # EUP slot, essentially free
    return g * d * inv + b


def _mh_attention(qT, kT, vT, mask01, num_heads):
    # qT: (D, Sq), kT/vT: (D, Sk)  -- feature-major, so per-head splits are
    # aligned sublane-tile slices (cheap), not lane-dim reshuffles.
    # mask01: (Sq, Sk) float, 1.0 where masked.
    D, Sq = qT.shape
    Sk = kT.shape[1]
    dh = D // num_heads
    scale = 1.0 / math.sqrt(dh)

    qh = jnp.swapaxes(qT.reshape(num_heads, dh, Sq), 1, 2)  # (H, Sq, dh)
    kh = kT.reshape(num_heads, dh, Sk)                      # (H, dh, Sk)
    vh = vT.reshape(num_heads, dh, Sk)                      # (H, dh, Sk)

    # One batched matmul for all heads: canonical (q,d)@(d,k), no explicit kh.T
    s = jnp.einsum('hqd,hdk->hqk', qh, kh,
                   preferred_element_type=jnp.float32) * scale       # (H, Sq, Sk)
    s = s + mask01[None] * _NEG_BIG                                  # additive mask
    m = jnp.max(s, axis=-1, keepdims=True)
    p = jnp.exp(s - m)
    p = p * pl.reciprocal(jnp.sum(p, axis=-1, keepdims=True), approx=True)
    # Context kept feature-major: ctxT[h,d,q] = sum_k v[h,d,k] * p[h,q,k]
    ctxT = jnp.einsum('hdk,hqk->hdq', vh, p,
                      preferred_element_type=jnp.float32)            # (H, dh, Sq)
    return ctxT.reshape(D, Sq).T                                     # (Sq, D)


# ------------------------------ fused kernel ----------------------------------

def fused_decoder_kernel(
    x_ref, mask_ref, srcx_ref, srcmask_ref,
    ln1_g, ln1_b, ln2_g, ln2_b, ln3_g, ln3_b,
    sa_qkv_w, sa_qkv_b, sa_ow, sa_ob,
    ca_q_w, ca_q_b, ca_kv_w, ca_kv_b, ca_ow, ca_ob,
    ff_w1, ff_b1, ff_w2, ff_b2,
    norm_g, norm_b, proj_w, proj_b,
    out_ref,
    *, num_heads, num_layers,
):
    x = x_ref[0]               # (S, D)
    mask = mask_ref[0]         # (S, S)   1.0 == masked
    src_x = srcx_ref[0]        # (Ssrc, D)
    src_mask = srcmask_ref[0]  # (S, Ssrc)

    D = x.shape[-1]

    # Hoisted out of the layer loop: src_x is layer-invariant, so every layer's
    # cross-attention K/V projection is produced by ONE fused matmul
    # (Ssrc, D) @ (D, L*2D) and ONE transpose, instead of L smaller ones.
    kv_all = jnp.dot(src_x, ca_kv_w[...],
                     preferred_element_type=jnp.float32) + ca_kv_b[...]   # (Ssrc, L*2D)
    kv_allT = kv_all.T                                                    # (L*2D, Ssrc)

    # Static unroll: num_layers is small; all stacked weights live in VMEM.
    # TODO(synk): for many layers use lax.fori_loop with dynamic ref[l] indexing.
    for l in range(num_layers):
        # ---- pre-LN masked self-attention (fused QKV projection) ----
        ln1_out = _layer_norm(x, ln1_g[l], ln1_b[l])
        qkv = jnp.dot(ln1_out, sa_qkv_w[l],
                      preferred_element_type=jnp.float32) + sa_qkv_b[l]   # (S, 3D)
        qkvT = qkv.T                                                      # (3D, S)
        sa_ctx = _mh_attention(qkvT[:D], qkvT[D:2 * D], qkvT[2 * D:],
                               mask, num_heads)                           # (S, D)
        sa_out = jnp.dot(sa_ctx, sa_ow[l],
                         preferred_element_type=jnp.float32) + sa_ob[l]

        # ---- pre-LN cross-attention (K/V already computed above) ----
        ln2_out = _layer_norm(sa_out, ln2_g[l], ln2_b[l])
        q = jnp.dot(ln2_out, ca_q_w[l],
                    preferred_element_type=jnp.float32) + ca_q_b[l]       # (S, D)
        off = l * 2 * D                       # static slice of the sublane axis
        ca_ctx = _mh_attention(q.T, kv_allT[off:off + D],
                               kv_allT[off + D:off + 2 * D],
                               src_mask, num_heads)
        ca_out = jnp.dot(ca_ctx, ca_ow[l],
                         preferred_element_type=jnp.float32) + ca_ob[l]

        # ---- FFN + residuals exactly as in pre_layer_norm_forward ----
        ln3_out = _layer_norm(ca_out + sa_out, ln3_g[l], ln3_b[l])
        h = jnp.maximum(
            jnp.dot(ln3_out, ff_w1[l], preferred_element_type=jnp.float32)
            + ff_b1[l], 0.0)
        ff_out = jnp.dot(h, ff_w2[l],
                         preferred_element_type=jnp.float32) + ff_b2[l]

        x = ca_out + ff_out    # dropouts are identities in eval mode

    # ---- final LayerNorm + vocab projection (vocab padded to lane-dense 128x) ----
    y = _layer_norm(x, norm_g[...], norm_b[...])
    logits = jnp.dot(y, proj_w[...],
                     preferred_element_type=jnp.float32) + proj_b[...]    # (S, Vp)
    out_ref[0] = logits


# ------------------------------ host wrapper -----------------------------------

STACKED_PARAMS = [
    "ln1_g", "ln1_b", "ln2_g", "ln2_b", "ln3_g", "ln3_b",
    "sa_qkv_w", "sa_qkv_b", "sa_ow", "sa_ob",
    "ca_q_w", "ca_q_b", "ca_kv_w", "ca_kv_b", "ca_ow", "ca_ob",
    "ff_w1", "ff_b1", "ff_w2", "ff_b2",
]


def _full_spec(arr):
    nd = arr.ndim
    return pl.BlockSpec(arr.shape, lambda b, _nd=nd: (0,) * _nd)


def transformer_decoder_forward(x, mask, src_x, src_mask, params, num_heads,
                                normalize_logits=False):
    B, S, D = x.shape
    Ssrc = src_x.shape[1]

    mask = mask.astype(jnp.float32)
    src_mask = src_mask.astype(jnp.float32)

    lp = params["layers"]
    num_layers = lp["ln1_g"].shape[0]

    # Pad vocab dim to a multiple of 128 so the only HBM output store is lane-dense.
    proj_w, proj_b = params["proj_w"], params["proj_b"]
    V = proj_w.shape[1]
    Vp = ((V + 127) // 128) * 128
    if Vp != V:
        proj_w = jnp.pad(proj_w, ((0, 0), (0, Vp - V)))
        proj_b = jnp.pad(proj_b, ((0, 0), (0, Vp - V)))

    # Fuse all layers' cross-attn K/V projection weights into one (D, L*2D)
    # matrix so the kernel computes every layer's K/V with a single matmul.
    ca_kv_w_f = jnp.transpose(lp["ca_kv_w"], (1, 0, 2)).reshape(D, num_layers * 2 * D)
    ca_kv_b_f = jnp.transpose(lp["ca_kv_b"], (1, 0, 2)).reshape(1, num_layers * 2 * D)

    weights = [
        lp["ln1_g"], lp["ln1_b"], lp["ln2_g"], lp["ln2_b"], lp["ln3_g"], lp["ln3_b"],
        lp["sa_qkv_w"], lp["sa_qkv_b"], lp["sa_ow"], lp["sa_ob"],
        lp["ca_q_w"], lp["ca_q_b"], ca_kv_w_f, ca_kv_b_f, lp["ca_ow"], lp["ca_ob"],
        lp["ff_w1"], lp["ff_b1"], lp["ff_w2"], lp["ff_b2"],
        params["norm_g"], params["norm_b"], proj_w, proj_b,
    ]

    in_specs = [
        pl.BlockSpec((1, S, D), lambda b: (b, 0, 0)),       # x
        pl.BlockSpec((1, S, S), lambda b: (b, 0, 0)),       # self-attn mask
        pl.BlockSpec((1, Ssrc, D), lambda b: (b, 0, 0)),    # encoder output
        pl.BlockSpec((1, S, Ssrc), lambda b: (b, 0, 0)),    # cross-attn mask
    ] + [_full_spec(a) for a in weights]

    kernel = functools.partial(fused_decoder_kernel,
                               num_heads=num_heads, num_layers=num_layers)

    logits = pl.pallas_call(
        kernel,
        out_shape=jax.ShapeDtypeStruct((B, S, Vp), jnp.float32),
        grid=(B,),
        in_specs=in_specs,
        out_specs=pl.BlockSpec((1, S, Vp), lambda b: (b, 0, 0)),
        compiler_params=pltpu.CompilerParams(
            dimension_semantics=("parallel",)),
    )(x, mask, src_x, src_mask, *weights)

    logits = logits[:, :, :V]
    if normalize_logits:
        logits = jax.nn.log_softmax(logits, axis=-1)
    return logits


# ------------------------------ param init ------------------------------------

def init_params(key, num_layers, d_model, d_ff, vocab_size):
    def dense(k, fan_in, fan_out):
        kw, kb = jax.random.split(k)
        w = jax.random.normal(kw, (fan_in, fan_out), jnp.float32) * (1.0 / math.sqrt(fan_in))
        b = jax.random.normal(kb, (1, fan_out), jnp.float32) * 0.01
        return w, b

    per_layer = []
    for _ in range(num_layers):
        key, *ks = jax.random.split(key, 11)
        qw, qb = dense(ks[0], d_model, d_model)
        kw_, kb_ = dense(ks[1], d_model, d_model)
        vw, vb = dense(ks[2], d_model, d_model)
        ow, ob = dense(ks[3], d_model, d_model)
        cqw, cqb = dense(ks[4], d_model, d_model)
        ckw, ckb = dense(ks[5], d_model, d_model)
        cvw, cvb = dense(ks[6], d_model, d_model)
        cow, cob = dense(ks[7], d_model, d_model)
        w1, b1 = dense(ks[8], d_model, d_ff)
        w2, b2 = dense(ks[9], d_ff, d_model)
        per_layer.append({
            "ln1_g": jnp.ones((1, d_model), jnp.float32),
            "ln1_b": jnp.zeros((1, d_model), jnp.float32),
            "ln2_g": jnp.ones((1, d_model), jnp.float32),
            "ln2_b": jnp.zeros((1, d_model), jnp.float32),
            "ln3_g": jnp.ones((1, d_model), jnp.float32),
            "ln3_b": jnp.zeros((1, d_model), jnp.float32),
            "sa_qkv_w": jnp.concatenate([qw, kw_, vw], axis=1),   # (D, 3D) fused QKV
            "sa_qkv_b": jnp.concatenate([qb, kb_, vb], axis=1),   # (1, 3D)
            "sa_ow": ow, "sa_ob": ob,
            "ca_q_w": cqw, "ca_q_b": cqb,
            "ca_kv_w": jnp.concatenate([ckw, cvw], axis=1),       # (D, 2D) fused KV
            "ca_kv_b": jnp.concatenate([ckb, cvb], axis=1),       # (1, 2D)
            "ca_ow": cow, "ca_ob": cob,
            "ff_w1": w1, "ff_b1": b1, "ff_w2": w2, "ff_b2": b2,
        })

    layers = {name: jnp.stack([p[name] for p in per_layer], axis=0)
              for name in STACKED_PARAMS}

    key, k1 = jax.random.split(key)
    proj_w, proj_b = dense(k1, d_model, vocab_size)
    return {
        "layers": layers,
        "norm_g": jnp.ones((1, d_model), jnp.float32),
        "norm_b": jnp.zeros((1, d_model), jnp.float32),
        "proj_w": proj_w,
        "proj_b": proj_b,
    }


# ---------------------------------- main ---------------------------------------

if __name__ == "__main__":
    B, S, Ssrc = 2, 8, 8
    D, D_FF, H = 32, 64, 4
    VOCAB = 64
    NUM_LAYERS = 2

    key = jax.random.PRNGKey(0)
    key, kx, ks = jax.random.split(key, 3)

    x = jax.random.normal(kx, (B, S, D), jnp.float32)
    src_x = jax.random.normal(ks, (B, Ssrc, D), jnp.float32)

    # causal self-attention mask: 1.0 (=True) where masked (j > i)
    causal = (jnp.arange(S)[None, :] > jnp.arange(S)[:, None]).astype(jnp.float32)
    mask = jnp.broadcast_to(causal, (B, S, S))
    # cross-attention mask: nothing masked
    src_mask = jnp.zeros((B, S, Ssrc), jnp.float32)

    params = init_params(key, NUM_LAYERS, D, D_FF, VOCAB)

    logits = transformer_decoder_forward(x, mask, src_x, src_mask, params,
                                         num_heads=H, normalize_logits=False)
    logits = jax.block_until_ready(logits)
    assert logits.shape == (B, S, VOCAB)
    assert bool(jnp.all(jnp.isfinite(logits)))
    print("KERNEL_OK")
</pallas_src>

<mosaic_0001>
module attributes {stable_mosaic.version = 11 : i64} {
  func.func @fused_decoder_kernel(%arg0: i32, %arg1: memref<1x8x32xf32, #tpu.memory_space<vmem>>, %arg2: memref<1x8x8xf32, #tpu.memory_space<vmem>>, %arg3: memref<1x8x32xf32, #tpu.memory_space<vmem>>, %arg4: memref<1x8x8xf32, #tpu.memory_space<vmem>>, %arg5: memref<2x1x32xf32, #tpu.memory_space<vmem>>, %arg6: memref<2x1x32xf32, #tpu.memory_space<vmem>>, %arg7: memref<2x1x32xf32, #tpu.memory_space<vmem>>, %arg8: memref<2x1x32xf32, #tpu.memory_space<vmem>>, %arg9: memref<2x1x32xf32, #tpu.memory_space<vmem>>, %arg10: memref<2x1x32xf32, #tpu.memory_space<vmem>>, %arg11: memref<2x32x96xf32, #tpu.memory_space<vmem>>, %arg12: memref<2x1x96xf32, #tpu.memory_space<vmem>>, %arg13: memref<2x32x32xf32, #tpu.memory_space<vmem>>, %arg14: memref<2x1x32xf32, #tpu.memory_space<vmem>>, %arg15: memref<2x32x32xf32, #tpu.memory_space<vmem>>, %arg16: memref<2x1x32xf32, #tpu.memory_space<vmem>>, %arg17: memref<32x128xf32, #tpu.memory_space<vmem>>, %arg18: memref<1x128xf32, #tpu.memory_space<vmem>>, %arg19: memref<2x32x32xf32, #tpu.memory_space<vmem>>, %arg20: memref<2x1x32xf32, #tpu.memory_space<vmem>>, %arg21: memref<2x32x64xf32, #tpu.memory_space<vmem>>, %arg22: memref<2x1x64xf32, #tpu.memory_space<vmem>>, %arg23: memref<2x64x32xf32, #tpu.memory_space<vmem>>, %arg24: memref<2x1x32xf32, #tpu.memory_space<vmem>>, %arg25: memref<1x32xf32, #tpu.memory_space<vmem>>, %arg26: memref<1x32xf32, #tpu.memory_space<vmem>>, %arg27: memref<32x128xf32, #tpu.memory_space<vmem>>, %arg28: memref<1x128xf32, #tpu.memory_space<vmem>>, %arg29: memref<1x8x128xf32, #tpu.memory_space<vmem>>) attributes {dimension_semantics = [#tpu.dimension_semantics<parallel>], iteration_bounds = array<i64: 2>, scalar_prefetch = 0 : i64, scratch_operands = 0 : i64, tpu.core_type = #tpu.core_type<tc>, window_params = [{transform_indices = @transform_0, window_bounds = array<i64: 1, 8, 32>}, {transform_indices = @transform_1, window_bounds = array<i64: 1, 8, 8>}, {transform_indices = @transform_2, window_bounds = array<i64: 1, 8, 32>}, {transform_indices = @transform_3, window_bounds = array<i64: 1, 8, 8>}, {pipeline_mode = #tpu.pipeline_mode<synchronous>, transform_indices = @transform_4, window_bounds = array<i64: 2, 1, 32>}, {pipeline_mode = #tpu.pipeline_mode<synchronous>, transform_indices = @transform_5, window_bounds = array<i64: 2, 1, 32>}, {pipeline_mode = #tpu.pipeline_mode<synchronous>, transform_indices = @transform_6, window_bounds = array<i64: 2, 1, 32>}, {pipeline_mode = #tpu.pipeline_mode<synchronous>, transform_indices = @transform_7, window_bounds = array<i64: 2, 1, 32>}, {pipeline_mode = #tpu.pipeline_mode<synchronous>, transform_indices = @transform_8, window_bounds = array<i64: 2, 1, 32>}, {pipeline_mode = #tpu.pipeline_mode<synchronous>, transform_indices = @transform_9, window_bounds = array<i64: 2, 1, 32>}, {pipeline_mode = #tpu.pipeline_mode<synchronous>, transform_indices = @transform_10, window_bounds = array<i64: 2, 32, 96>}, {pipeline_mode = #tpu.pipeline_mode<synchronous>, transform_indices = @transform_11, window_bounds = array<i64: 2, 1, 96>}, {pipeline_mode = #tpu.pipeline_mode<synchronous>, transform_indices = @transform_12, window_bounds = array<i64: 2, 32, 32>}, {pipeline_mode = #tpu.pipeline_mode<synchronous>, transform_indices = @transform_13, window_bounds = array<i64: 2, 1, 32>}, {pipeline_mode = #tpu.pipeline_mode<synchronous>, transform_indices = @transform_14, window_bounds = array<i64: 2, 32, 32>}, {pipeline_mode = #tpu.pipeline_mode<synchronous>, transform_indices = @transform_15, window_bounds = array<i64: 2, 1, 32>}, {pipeline_mode = #tpu.pipeline_mode<synchronous>, transform_indices = @transform_16, window_bounds = array<i64: 32, 128>}, {pipeline_mode = #tpu.pipeline_mode<synchronous>, transform_indices = @transform_17, window_bounds = array<i64: 1, 128>}, {pipeline_mode = #tpu.pipeline_mode<synchronous>, transform_indices = @transform_18, window_bounds = array<i64: 2, 32, 32>}, {pipeline_mode = #tpu.pipeline_mode<synchronous>, transform_indices = @transform_19, window_bounds = array<i64: 2, 1, 32>}, {pipeline_mode = #tpu.pipeline_mode<synchronous>, transform_indices = @transform_20, window_bounds = array<i64: 2, 32, 64>}, {pipeline_mode = #tpu.pipeline_mode<synchronous>, transform_indices = @transform_21, window_bounds = array<i64: 2, 1, 64>}, {pipeline_mode = #tpu.pipeline_mode<synchronous>, transform_indices = @transform_22, window_bounds = array<i64: 2, 64, 32>}, {pipeline_mode = #tpu.pipeline_mode<synchronous>, transform_indices = @transform_23, window_bounds = array<i64: 2, 1, 32>}, {pipeline_mode = #tpu.pipeline_mode<synchronous>, transform_indices = @transform_24, window_bounds = array<i64: 1, 32>}, {pipeline_mode = #tpu.pipeline_mode<synchronous>, transform_indices = @transform_25, window_bounds = array<i64: 1, 32>}, {pipeline_mode = #tpu.pipeline_mode<synchronous>, transform_indices = @transform_26, window_bounds = array<i64: 32, 128>}, {pipeline_mode = #tpu.pipeline_mode<synchronous>, transform_indices = @transform_27, window_bounds = array<i64: 1, 128>}, {transform_indices = @transform_28, window_bounds = array<i64: 1, 8, 128>}]} {
    %c0 = arith.constant 0 : index
    %c0_0 = arith.constant 0 : index
    %c0_1 = arith.constant 0 : index
    %0 = vector.load %arg1[%c0, %c0_0, %c0_1] : memref<1x8x32xf32, #tpu.memory_space<vmem>>, vector<1x8x32xf32>
    %1 = vector.shape_cast %0 : vector<1x8x32xf32> to vector<8x32xf32>
    %c0_2 = arith.constant 0 : index
    %c0_3 = arith.constant 0 : index
    %c0_4 = arith.constant 0 : index
    %2 = vector.load %arg2[%c0_2, %c0_3, %c0_4] : memref<1x8x8xf32, #tpu.memory_space<vmem>>, vector<1x8x8xf32>
    %3 = vector.shape_cast %2 : vector<1x8x8xf32> to vector<8x8xf32>
    %c0_5 = arith.constant 0 : index
    %c0_6 = arith.constant 0 : index
    %c0_7 = arith.constant 0 : index
    %4 = vector.load %arg3[%c0_5, %c0_6, %c0_7] : memref<1x8x32xf32, #tpu.memory_space<vmem>>, vector<1x8x32xf32>
    %5 = vector.shape_cast %4 : vector<1x8x32xf32> to vector<8x32xf32>
    %c0_8 = arith.constant 0 : index
    %c0_9 = arith.constant 0 : index
    %c0_10 = arith.constant 0 : index
    %6 = vector.load %arg4[%c0_8, %c0_9, %c0_10] : memref<1x8x8xf32, #tpu.memory_space<vmem>>, vector<1x8x8xf32>
    %7 = vector.shape_cast %6 : vector<1x8x8xf32> to vector<8x8xf32>
    %c0_11 = arith.constant 0 : index
    %c0_12 = arith.constant 0 : index
    %8 = vector.load %arg17[%c0_11, %c0_12] : memref<32x128xf32, #tpu.memory_space<vmem>>, vector<32x128xf32>
    %cst = arith.constant dense<0.000000e+00> : vector<8x128xf32>
    %9 = tpu.matmul %5, %8, %cst {dimension_numbers = #tpu.dot_dimension_numbers<[1], [0], [0], [1], [0, 0, 1, 1], [], []>} : vector<8x32xf32>, vector<32x128xf32>, vector<8x128xf32> -> vector<8x128xf32>
    %c0_13 = arith.constant 0 : index
    %c0_14 = arith.constant 0 : index
    %10 = vector.load %arg18[%c0_13, %c0_14] : memref<1x128xf32, #tpu.memory_space<vmem>>, vector<1x128xf32>
    %11 = vector.broadcast %10 : vector<1x128xf32> to vector<8x128xf32>
    %12 = arith.addf %9, %11 : vector<8x128xf32>
    %13 = tpu.transpose %12, [1, 0] : vector<8x128xf32> -> vector<128x8xf32>
    %c0_15 = arith.constant 0 : index
    %c0_16 = arith.constant 0 : index
    %c0_17 = arith.constant 0 : index
    %14 = vector.load %arg5[%c0_15, %c0_16, %c0_17] : memref<2x1x32xf32, #tpu.memory_space<vmem>>, vector<1x1x32xf32>
    %15 = vector.shape_cast %14 : vector<1x1x32xf32> to vector<1x32xf32>
    %c0_18 = arith.constant 0 : index
    %c0_19 = arith.constant 0 : index
    %c0_20 = arith.constant 0 : index
    %16 = vector.load %arg6[%c0_18, %c0_19, %c0_20] : memref<2x1x32xf32, #tpu.memory_space<vmem>>, vector<1x1x32xf32>
    %17 = vector.shape_cast %16 : vector<1x1x32xf32> to vector<1x32xf32>
    %cst_21 = arith.constant dense<0.000000e+00> : vector<8xf32>
    %18 = vector.multi_reduction <add>, %1, %cst_21 [1] : vector<8x32xf32> to vector<8xf32>
    %19 = vector.shape_cast %18 : vector<8xf32> to vector<8x1xf32>
    %cst_22 = arith.constant 3.200000e+01 : f32
    %20 = vector.broadcast %cst_22 : f32 to vector<8x1xf32>
    %21 = arith.divf %19, %20 : vector<8x1xf32>
    %22 = vector.broadcast %21 : vector<8x1xf32> to vector<8x32xf32>
    %23 = arith.subf %1, %22 : vector<8x32xf32>
    %24 = arith.mulf %23, %23 : vector<8x32xf32>
    %cst_23 = arith.constant dense<0.000000e+00> : vector<8xf32>
    %25 = vector.multi_reduction <add>, %24, %cst_23 [1] : vector<8x32xf32> to vector<8xf32>
    %26 = vector.shape_cast %25 : vector<8xf32> to vector<8x1xf32>
    %cst_24 = arith.constant 0.0322580636 : f32
    %27 = vector.broadcast %cst_24 : f32 to vector<8x1xf32>
    %28 = arith.mulf %26, %27 : vector<8x1xf32>
    %29 = math.sqrt %28 : vector<8x1xf32>
    %cst_25 = arith.constant 9.99999997E-7 : f32
    %30 = vector.broadcast %cst_25 : f32 to vector<8x1xf32>
    %31 = arith.addf %29, %30 : vector<8x1xf32>
    %32 = tpu.reciprocal %31 {approx = true} : vector<8x1xf32> -> vector<8x1xf32>
    %33 = vector.broadcast %15 : vector<1x32xf32> to vector<8x32xf32>
    %34 = arith.mulf %33, %23 : vector<8x32xf32>
    %35 = vector.broadcast %32 : vector<8x1xf32> to vector<8x32xf32>
    %36 = arith.mulf %34, %35 : vector<8x32xf32>
    %37 = vector.broadcast %17 : vector<1x32xf32> to vector<8x32xf32>
    %38 = arith.addf %36, %37 : vector<8x32xf32>
    %c0_26 = arith.constant 0 : index
    %c0_27 = arith.constant 0 : index
    %c0_28 = arith.constant 0 : index
    %39 = vector.load %arg11[%c0_26, %c0_27, %c0_28] : memref<2x32x96xf32, #tpu.memory_space<vmem>>, vector<1x32x96xf32>
    %40 = vector.shape_cast %39 : vector<1x32x96xf32> to vector<32x96xf32>
    %cst_29 = arith.constant dense<0.000000e+00> : vector<8x96xf32>
    %41 = tpu.matmul %38, %40, %cst_29 {dimension_numbers = #tpu.dot_dimension_numbers<[1], [0], [0], [1], [0, 0, 1, 1], [], []>} : vector<8x32xf32>, vector<32x96xf32>, vector<8x96xf32> -> vector<8x96xf32>
    %c0_30 = arith.constant 0 : index
    %c0_31 = arith.constant 0 : index
    %c0_32 = arith.constant 0 : index
    %42 = vector.load %arg12[%c0_30, %c0_31, %c0_32] : memref<2x1x96xf32, #tpu.memory_space<vmem>>, vector<1x1x96xf32>
    %43 = vector.shape_cast %42 : vector<1x1x96xf32> to vector<1x96xf32>
    %44 = vector.broadcast %43 : vector<1x96xf32> to vector<8x96xf32>
    %45 = arith.addf %41, %44 : vector<8x96xf32>
    %46 = tpu.transpose %45, [1, 0] : vector<8x96xf32> -> vector<96x8xf32>
    %47 = vector.extract_strided_slice %46 {offsets = [0, 0], sizes = [32, 8], strides = [1, 1]} : vector<96x8xf32> to vector<32x8xf32>
    %48 = vector.extract_strided_slice %46 {offsets = [32, 0], sizes = [32, 8], strides = [1, 1]} : vector<96x8xf32> to vector<32x8xf32>
    %49 = vector.extract_strided_slice %46 {offsets = [64, 0], sizes = [32, 8], strides = [1, 1]} : vector<96x8xf32> to vector<32x8xf32>
    %50 = vector.shape_cast %47 : vector<32x8xf32> to vector<4x8x8xf32>
    %51 = tpu.transpose %50, [0, 2, 1] : vector<4x8x8xf32> -> vector<4x8x8xf32>
    %52 = vector.shape_cast %48 : vector<32x8xf32> to vector<4x8x8xf32>
    %53 = vector.shape_cast %49 : vector<32x8xf32> to vector<4x8x8xf32>
    "tpu.trace_start"() <{level = 10 : i32, message = "hqd,hdk->hqk"}> : () -> ()
    %cst_33 = arith.constant dense<0.000000e+00> : vector<4x8x8xf32>
    %54 = tpu.matmul %51, %52, %cst_33 {dimension_numbers = #tpu.dot_dimension_numbers<[2], [1], [1], [2], [0, 0, 0, 1, 1, 2], [0], [0]>} : vector<4x8x8xf32>, vector<4x8x8xf32>, vector<4x8x8xf32> -> vector<4x8x8xf32>
    "tpu.trace_stop"() : () -> ()
    %cst_34 = arith.constant 0.353553385 : f32
    %55 = vector.broadcast %cst_34 : f32 to vector<4x8x8xf32>
    %56 = arith.mulf %54, %55 : vector<4x8x8xf32>
    %57 = vector.shape_cast %3 : vector<8x8xf32> to vector<1x8x8xf32>
    %cst_35 = arith.constant -1.000000e+30 : f32
    %58 = vector.broadcast %cst_35 : f32 to vector<1x8x8xf32>
    %59 = arith.mulf %57, %58 : vector<1x8x8xf32>
    %60 = vector.broadcast %59 : vector<1x8x8xf32> to vector<4x8x8xf32>
    %61 = arith.addf %56, %60 : vector<4x8x8xf32>
    %cst_36 = arith.constant dense<0xFF800000> : vector<4x8xf32>
    %62 = vector.multi_reduction <maximumf>, %61, %cst_36 [2] : vector<4x8x8xf32> to vector<4x8xf32>
    %63 = vector.shape_cast %62 : vector<4x8xf32> to vector<4x8x1xf32>
    %64 = vector.broadcast %63 : vector<4x8x1xf32> to vector<4x8x8xf32>
    %65 = arith.subf %61, %64 : vector<4x8x8xf32>
    %66 = math.exp %65 : vector<4x8x8xf32>
    %cst_37 = arith.constant dense<0.000000e+00> : vector<4x8xf32>
    %67 = vector.multi_reduction <add>, %66, %cst_37 [2] : vector<4x8x8xf32> to vector<4x8xf32>
    %68 = vector.shape_cast %67 : vector<4x8xf32> to vector<4x8x1xf32>
    %69 = tpu.reciprocal %68 {approx = true} : vector<4x8x1xf32> -> vector<4x8x1xf32>
    %70 = vector.broadcast %69 : vector<4x8x1xf32> to vector<4x8x8xf32>
    %71 = arith.mulf %66, %70 : vector<4x8x8xf32>
    "tpu.trace_start"() <{level = 10 : i32, message = "hdk,hqk->hdq"}> : () -> ()
    %cst_38 = arith.constant dense<0.000000e+00> : vector<4x8x8xf32>
    %72 = tpu.matmul %53, %71, %cst_38 {dimension_numbers = #tpu.dot_dimension_numbers<[2], [2], [1], [1], [0, 0, 0, 1, 1, 1], [0], [0]>} : vector<4x8x8xf32>, vector<4x8x8xf32>, vector<4x8x8xf32> -> vector<4x8x8xf32>
    "tpu.trace_stop"() : () -> ()
    %73 = vector.shape_cast %72 : vector<4x8x8xf32> to vector<32x8xf32>
    %74 = tpu.transpose %73, [1, 0] : vector<32x8xf32> -> vector<8x32xf32>
    %c0_39 = arith.constant 0 : index
    %c0_40 = arith.constant 0 : index
    %c0_41 = arith.constant 0 : index
    %75 = vector.load %arg13[%c0_39, %c0_40, %c0_41] : memref<2x32x32xf32, #tpu.memory_space<vmem>>, vector<1x32x32xf32>
    %76 = vector.shape_cast %75 : vector<1x32x32xf32> to vector<32x32xf32>
    %cst_42 = arith.constant dense<0.000000e+00> : vector<8x32xf32>
    %77 = tpu.matmul %74, %76, %cst_42 {dimension_numbers = #tpu.dot_dimension_numbers<[1], [0], [0], [1], [0, 0, 1, 1], [], []>} : vector<8x32xf32>, vector<32x32xf32>, vector<8x32xf32> -> vector<8x32xf32>
    %c0_43 = arith.constant 0 : index
    %c0_44 = arith.constant 0 : index
    %c0_45 = arith.constant 0 : index
    %78 = vector.load %arg14[%c0_43, %c0_44, %c0_45] : memref<2x1x32xf32, #tpu.memory_space<vmem>>, vector<1x1x32xf32>
    %79 = vector.shape_cast %78 : vector<1x1x32xf32> to vector<1x32xf32>
    %80 = vector.broadcast %79 : vector<1x32xf32> to vector<8x32xf32>
    %81 = arith.addf %77, %80 : vector<8x32xf32>
    %c0_46 = arith.constant 0 : index
    %c0_47 = arith.constant 0 : index
    %c0_48 = arith.constant 0 : index
    %82 = vector.load %arg7[%c0_46, %c0_47, %c0_48] : memref<2x1x32xf32, #tpu.memory_space<vmem>>, vector<1x1x32xf32>
    %83 = vector.shape_cast %82 : vector<1x1x32xf32> to vector<1x32xf32>
    %c0_49 = arith.constant 0 : index
    %c0_50 = arith.constant 0 : index
    %c0_51 = arith.constant 0 : index
    %84 = vector.load %arg8[%c0_49, %c0_50, %c0_51] : memref<2x1x32xf32, #tpu.memory_space<vmem>>, vector<1x1x32xf32>
    %85 = vector.shape_cast %84 : vector<1x1x32xf32> to vector<1x32xf32>
    %cst_52 = arith.constant dense<0.000000e+00> : vector<8xf32>
    %86 = vector.multi_reduction <add>, %81, %cst_52 [1] : vector<8x32xf32> to vector<8xf32>
    %87 = vector.shape_cast %86 : vector<8xf32> to vector<8x1xf32>
    %cst_53 = arith.constant 3.200000e+01 : f32
    %88 = vector.broadcast %cst_53 : f32 to vector<8x1xf32>
    %89 = arith.divf %87, %88 : vector<8x1xf32>
    %90 = vector.broadcast %89 : vector<8x1xf32> to vector<8x32xf32>
    %91 = arith.subf %81, %90 : vector<8x32xf32>
    %92 = arith.mulf %91, %91 : vector<8x32xf32>
    %cst_54 = arith.constant dense<0.000000e+00> : vector<8xf32>
    %93 = vector.multi_reduction <add>, %92, %cst_54 [1] : vector<8x32xf32> to vector<8xf32>
    %94 = vector.shape_cast %93 : vector<8xf32> to vector<8x1xf32>
    %cst_55 = arith.constant 0.0322580636 : f32
    %95 = vector.broadcast %cst_55 : f32 to vector<8x1xf32>
    %96 = arith.mulf %94, %95 : vector<8x1xf32>
    %97 = math.sqrt %96 : vector<8x1xf32>
    %cst_56 = arith.constant 9.99999997E-7 : f32
    %98 = vector.broadcast %cst_56 : f32 to vector<8x1xf32>
    %99 = arith.addf %97, %98 : vector<8x1xf32>
    %100 = tpu.reciprocal %99 {approx = true} : vector<8x1xf32> -> vector<8x1xf32>
    %101 = vector.broadcast %83 : vector<1x32xf32> to vector<8x32xf32>
    %102 = arith.mulf %101, %91 : vector<8x32xf32>
    %103 = vector.broadcast %100 : vector<8x1xf32> to vector<8x32xf32>
    %104 = arith.mulf %102, %103 : vector<8x32xf32>
    %105 = vector.broadcast %85 : vector<1x32xf32> to vector<8x32xf32>
    %106 = arith.addf %104, %105 : vector<8x32xf32>
    %c0_57 = arith.constant 0 : index
    %c0_58 = arith.constant 0 : index
    %c0_59 = arith.constant 0 : index
    %107 = vector.load %arg15[%c0_57, %c0_58, %c0_59] : memref<2x32x32xf32, #tpu.memory_space<vmem>>, vector<1x32x32xf32>
    %108 = vector.shape_cast %107 : vector<1x32x32xf32> to vector<32x32xf32>
    %cst_60 = arith.constant dense<0.000000e+00> : vector<8x32xf32>
    %109 = tpu.matmul %106, %108, %cst_60 {dimension_numbers = #tpu.dot_dimension_numbers<[1], [0], [0], [1], [0, 0, 1, 1], [], []>} : vector<8x32xf32>, vector<32x32xf32>, vector<8x32xf32> -> vector<8x32xf32>
    %c0_61 = arith.constant 0 : index
    %c0_62 = arith.constant 0 : index
    %c0_63 = arith.constant 0 : index
    %110 = vector.load %arg16[%c0_61, %c0_62, %c0_63] : memref<2x1x32xf32, #tpu.memory_space<vmem>>, vector<1x1x32xf32>
    %111 = vector.shape_cast %110 : vector<1x1x32xf32> to vector<1x32xf32>
    %112 = vector.broadcast %111 : vector<1x32xf32> to vector<8x32xf32>
    %113 = arith.addf %109, %112 : vector<8x32xf32>
    %114 = tpu.transpose %113, [1, 0] : vector<8x32xf32> -> vector<32x8xf32>
    %115 = vector.extract_strided_slice %13 {offsets = [0, 0], sizes = [32, 8], strides = [1, 1]} : vector<128x8xf32> to vector<32x8xf32>
    %116 = vector.extract_strided_slice %13 {offsets = [32, 0], sizes = [32, 8], strides = [1, 1]} : vector<128x8xf32> to vector<32x8xf32>
    %117 = vector.shape_cast %114 : vector<32x8xf32> to vector<4x8x8xf32>
    %118 = tpu.transpose %117, [0, 2, 1] : vector<4x8x8xf32> -> vector<4x8x8xf32>
    %119 = vector.shape_cast %115 : vector<32x8xf32> to vector<4x8x8xf32>
    %120 = vector.shape_cast %116 : vector<32x8xf32> to vector<4x8x8xf32>
    "tpu.trace_start"() <{level = 10 : i32, message = "hqd,hdk->hqk"}> : () -> ()
    %cst_64 = arith.constant dense<0.000000e+00> : vector<4x8x8xf32>
    %121 = tpu.matmul %118, %119, %cst_64 {dimension_numbers = #tpu.dot_dimension_numbers<[2], [1], [1], [2], [0, 0, 0, 1, 1, 2], [0], [0]>} : vector<4x8x8xf32>, vector<4x8x8xf32>, vector<4x8x8xf32> -> vector<4x8x8xf32>
    "tpu.trace_stop"() : () -> ()
    %cst_65 = arith.constant 0.353553385 : f32
    %122 = vector.broadcast %cst_65 : f32 to vector<4x8x8xf32>
    %123 = arith.mulf %121, %122 : vector<4x8x8xf32>
    %124 = vector.shape_cast %7 : vector<8x8xf32> to vector<1x8x8xf32>
    %cst_66 = arith.constant -1.000000e+30 : f32
    %125 = vector.broadcast %cst_66 : f32 to vector<1x8x8xf32>
    %126 = arith.mulf %124, %125 : vector<1x8x8xf32>
    %127 = vector.broadcast %126 : vector<1x8x8xf32> to vector<4x8x8xf32>
    %128 = arith.addf %123, %127 : vector<4x8x8xf32>
    %cst_67 = arith.constant dense<0xFF800000> : vector<4x8xf32>
    %129 = vector.multi_reduction <maximumf>, %128, %cst_67 [2] : vector<4x8x8xf32> to vector<4x8xf32>
    %130 = vector.shape_cast %129 : vector<4x8xf32> to vector<4x8x1xf32>
    %131 = vector.broadcast %130 : vector<4x8x1xf32> to vector<4x8x8xf32>
    %132 = arith.subf %128, %131 : vector<4x8x8xf32>
    %133 = math.exp %132 : vector<4x8x8xf32>
    %cst_68 = arith.constant dense<0.000000e+00> : vector<4x8xf32>
    %134 = vector.multi_reduction <add>, %133, %cst_68 [2] : vector<4x8x8xf32> to vector<4x8xf32>
    %135 = vector.shape_cast %134 : vector<4x8xf32> to vector<4x8x1xf32>
    %136 = tpu.reciprocal %135 {approx = true} : vector<4x8x1xf32> -> vector<4x8x1xf32>
    %137 = vector.broadcast %136 : vector<4x8x1xf32> to vector<4x8x8xf32>
    %138 = arith.mulf %133, %137 : vector<4x8x8xf32>
    "tpu.trace_start"() <{level = 10 : i32, message = "hdk,hqk->hdq"}> : () -> ()
    %cst_69 = arith.constant dense<0.000000e+00> : vector<4x8x8xf32>
    %139 = tpu.matmul %120, %138, %cst_69 {dimension_numbers = #tpu.dot_dimension_numbers<[2], [2], [1], [1], [0, 0, 0, 1, 1, 1], [0], [0]>} : vector<4x8x8xf32>, vector<4x8x8xf32>, vector<4x8x8xf32> -> vector<4x8x8xf32>
    "tpu.trace_stop"() : () -> ()
    %140 = vector.shape_cast %139 : vector<4x8x8xf32> to vector<32x8xf32>
    %141 = tpu.transpose %140, [1, 0] : vector<32x8xf32> -> vector<8x32xf32>
    %c0_70 = arith.constant 0 : index
    %c0_71 = arith.constant 0 : index
    %c0_72 = arith.constant 0 : index
    %142 = vector.load %arg19[%c0_70, %c0_71, %c0_72] : memref<2x32x32xf32, #tpu.memory_space<vmem>>, vector<1x32x32xf32>
    %143 = vector.shape_cast %142 : vector<1x32x32xf32> to vector<32x32xf32>
    %cst_73 = arith.constant dense<0.000000e+00> : vector<8x32xf32>
    %144 = tpu.matmul %141, %143, %cst_73 {dimension_numbers = #tpu.dot_dimension_numbers<[1], [0], [0], [1], [0, 0, 1, 1], [], []>} : vector<8x32xf32>, vector<32x32xf32>, vector<8x32xf32> -> vector<8x32xf32>
    %c0_74 = arith.constant 0 : index
    %c0_75 = arith.constant 0 : index
    %c0_76 = arith.constant 0 : index
    %145 = vector.load %arg20[%c0_74, %c0_75, %c0_76] : memref<2x1x32xf32, #tpu.memory_space<vmem>>, vector<1x1x32xf32>
    %146 = vector.shape_cast %145 : vector<1x1x32xf32> to vector<1x32xf32>
    %147 = vector.broadcast %146 : vector<1x32xf32> to vector<8x32xf32>
    %148 = arith.addf %144, %147 : vector<8x32xf32>
    %149 = arith.addf %148, %81 : vector<8x32xf32>
    %c0_77 = arith.constant 0 : index
    %c0_78 = arith.constant 0 : index
    %c0_79 = arith.constant 0 : index
    %150 = vector.load %arg9[%c0_77, %c0_78, %c0_79] : memref<2x1x32xf32, #tpu.memory_space<vmem>>, vector<1x1x32xf32>
    %151 = vector.shape_cast %150 : vector<1x1x32xf32> to vector<1x32xf32>
    %c0_80 = arith.constant 0 : index
    %c0_81 = arith.constant 0 : index
    %c0_82 = arith.constant 0 : index
    %152 = vector.load %arg10[%c0_80, %c0_81, %c0_82] : memref<2x1x32xf32, #tpu.memory_space<vmem>>, vector<1x1x32xf32>
    %153 = vector.shape_cast %152 : vector<1x1x32xf32> to vector<1x32xf32>
    %cst_83 = arith.constant dense<0.000000e+00> : vector<8xf32>
    %154 = vector.multi_reduction <add>, %149, %cst_83 [1] : vector<8x32xf32> to vector<8xf32>
    %155 = vector.shape_cast %154 : vector<8xf32> to vector<8x1xf32>
    %cst_84 = arith.constant 3.200000e+01 : f32
    %156 = vector.broadcast %cst_84 : f32 to vector<8x1xf32>
    %157 = arith.divf %155, %156 : vector<8x1xf32>
    %158 = vector.broadcast %157 : vector<8x1xf32> to vector<8x32xf32>
    %159 = arith.subf %149, %158 : vector<8x32xf32>
    %160 = arith.mulf %159, %159 : vector<8x32xf32>
    %cst_85 = arith.constant dense<0.000000e+00> : vector<8xf32>
    %161 = vector.multi_reduction <add>, %160, %cst_85 [1] : vector<8x32xf32> to vector<8xf32>
    %162 = vector.shape_cast %161 : vector<8xf32> to vector<8x1xf32>
    %cst_86 = arith.constant 0.0322580636 : f32
    %163 = vector.broadcast %cst_86 : f32 to vector<8x1xf32>
    %164 = arith.mulf %162, %163 : vector<8x1xf32>
    %165 = math.sqrt %164 : vector<8x1xf32>
    %cst_87 = arith.constant 9.99999997E-7 : f32
    %166 = vector.broadcast %cst_87 : f32 to vector<8x1xf32>
    %167 = arith.addf %165, %166 : vector<8x1xf32>
    %168 = tpu.reciprocal %167 {approx = true} : vector<8x1xf32> -> vector<8x1xf32>
    %169 = vector.broadcast %151 : vector<1x32xf32> to vector<8x32xf32>
    %170 = arith.mulf %169, %159 : vector<8x32xf32>
    %171 = vector.broadcast %168 : vector<8x1xf32> to vector<8x32xf32>
    %172 = arith.mulf %170, %171 : vector<8x32xf32>
    %173 = vector.broadcast %153 : vector<1x32xf32> to vector<8x32xf32>
    %174 = arith.addf %172, %173 : vector<8x32xf32>
    %c0_88 = arith.constant 0 : index
    %c0_89 = arith.constant 0 : index
    %c0_90 = arith.constant 0 : index
    %175 = vector.load %arg21[%c0_88, %c0_89, %c0_90] : memref<2x32x64xf32, #tpu.memory_space<vmem>>, vector<1x32x64xf32>
    %176 = vector.shape_cast %175 : vector<1x32x64xf32> to vector<32x64xf32>
    %cst_91 = arith.constant dense<0.000000e+00> : vector<8x64xf32>
    %177 = tpu.matmul %174, %176, %cst_91 {dimension_numbers = #tpu.dot_dimension_numbers<[1], [0], [0], [1], [0, 0, 1, 1], [], []>} : vector<8x32xf32>, vector<32x64xf32>, vector<8x64xf32> -> vector<8x64xf32>
    %c0_92 = arith.constant 0 : index
    %c0_93 = arith.constant 0 : index
    %c0_94 = arith.constant 0 : index
    %178 = vector.load %arg22[%c0_92, %c0_93, %c0_94] : memref<2x1x64xf32, #tpu.memory_space<vmem>>, vector<1x1x64xf32>
    %179 = vector.shape_cast %178 : vector<1x1x64xf32> to vector<1x64xf32>
    %180 = vector.broadcast %179 : vector<1x64xf32> to vector<8x64xf32>
    %181 = arith.addf %177, %180 : vector<8x64xf32>
    %cst_95 = arith.constant 0.000000e+00 : f32
    %182 = vector.broadcast %cst_95 : f32 to vector<8x64xf32>
    %183 = arith.maximumf %181, %182 : vector<8x64xf32>
    %c0_96 = arith.constant 0 : index
    %c0_97 = arith.constant 0 : index
    %c0_98 = arith.constant 0 : index
    %184 = vector.load %arg23[%c0_96, %c0_97, %c0_98] : memref<2x64x32xf32, #tpu.memory_space<vmem>>, vector<1x64x32xf32>
    %185 = vector.shape_cast %184 : vector<1x64x32xf32> to vector<64x32xf32>
    %cst_99 = arith.constant dense<0.000000e+00> : vector<8x32xf32>
    %186 = tpu.matmul %183, %185, %cst_99 {dimension_numbers = #tpu.dot_dimension_numbers<[1], [0], [0], [1], [0, 0, 1, 1], [], []>} : vector<8x64xf32>, vector<64x32xf32>, vector<8x32xf32> -> vector<8x32xf32>
    %c0_100 = arith.constant 0 : index
    %c0_101 = arith.constant 0 : index
    %c0_102 = arith.constant 0 : index
    %187 = vector.load %arg24[%c0_100, %c0_101, %c0_102] : memref<2x1x32xf32, #tpu.memory_space<vmem>>, vector<1x1x32xf32>
    %188 = vector.shape_cast %187 : vector<1x1x32xf32> to vector<1x32xf32>
    %189 = vector.broadcast %188 : vector<1x32xf32> to vector<8x32xf32>
    %190 = arith.addf %186, %189 : vector<8x32xf32>
    %191 = arith.addf %148, %190 : vector<8x32xf32>
    %c1 = arith.constant 1 : index
    %c0_103 = arith.constant 0 : index
    %c0_104 = arith.constant 0 : index
    %192 = vector.load %arg5[%c1, %c0_103, %c0_104] : memref<2x1x32xf32, #tpu.memory_space<vmem>>, vector<1x1x32xf32>
    %193 = vector.shape_cast %192 : vector<1x1x32xf32> to vector<1x32xf32>
    %c1_105 = arith.constant 1 : index
    %c0_106 = arith.constant 0 : index
    %c0_107 = arith.constant 0 : index
    %194 = vector.load %arg6[%c1_105, %c0_106, %c0_107] : memref<2x1x32xf32, #tpu.memory_space<vmem>>, vector<1x1x32xf32>
    %195 = vector.shape_cast %194 : vector<1x1x32xf32> to vector<1x32xf32>
    %cst_108 = arith.constant dense<0.000000e+00> : vector<8xf32>
    %196 = vector.multi_reduction <add>, %191, %cst_108 [1] : vector<8x32xf32> to vector<8xf32>
    %197 = vector.shape_cast %196 : vector<8xf32> to vector<8x1xf32>
    %cst_109 = arith.constant 3.200000e+01 : f32
    %198 = vector.broadcast %cst_109 : f32 to vector<8x1xf32>
    %199 = arith.divf %197, %198 : vector<8x1xf32>
    %200 = vector.broadcast %199 : vector<8x1xf32> to vector<8x32xf32>
    %201 = arith.subf %191, %200 : vector<8x32xf32>
    %202 = arith.mulf %201, %201 : vector<8x32xf32>
    %cst_110 = arith.constant dense<0.000000e+00> : vector<8xf32>
    %203 = vector.multi_reduction <add>, %202, %cst_110 [1] : vector<8x32xf32> to vector<8xf32>
    %204 = vector.shape_cast %203 : vector<8xf32> to vector<8x1xf32>
    %cst_111 = arith.constant 0.0322580636 : f32
    %205 = vector.broadcast %cst_111 : f32 to vector<8x1xf32>
    %206 = arith.mulf %204, %205 : vector<8x1xf32>
    %207 = math.sqrt %206 : vector<8x1xf32>
    %cst_112 = arith.constant 9.99999997E-7 : f32
    %208 = vector.broadcast %cst_112 : f32 to vector<8x1xf32>
    %209 = arith.addf %207, %208 : vector<8x1xf32>
    %210 = tpu.reciprocal %209 {approx = true} : vector<8x1xf32> -> vector<8x1xf32>
    %211 = vector.broadcast %193 : vector<1x32xf32> to vector<8x32xf32>
    %212 = arith.mulf %211, %201 : vector<8x32xf32>
    %213 = vector.broadcast %210 : vector<8x1xf32> to vector<8x32xf32>
    %214 = arith.mulf %212, %213 : vector<8x32xf32>
    %215 = vector.broadcast %195 : vector<1x32xf32> to vector<8x32xf32>
    %216 = arith.addf %214, %215 : vector<8x32xf32>
    %c1_113 = arith.constant 1 : index
    %c0_114 = arith.constant 0 : index
    %c0_115 = arith.constant 0 : index
    %217 = vector.load %arg11[%c1_113, %c0_114, %c0_115] : memref<2x32x96xf32, #tpu.memory_space<vmem>>, vector<1x32x96xf32>
    %218 = vector.shape_cast %217 : vector<1x32x96xf32> to vector<32x96xf32>
    %cst_116 = arith.constant dense<0.000000e+00> : vector<8x96xf32>
    %219 = tpu.matmul %216, %218, %cst_116 {dimension_numbers = #tpu.dot_dimension_numbers<[1], [0], [0], [1], [0, 0, 1, 1], [], []>} : vector<8x32xf32>, vector<32x96xf32>, vector<8x96xf32> -> vector<8x96xf32>
    %c1_117 = arith.constant 1 : index
    %c0_118 = arith.constant 0 : index
    %c0_119 = arith.constant 0 : index
    %220 = vector.load %arg12[%c1_117, %c0_118, %c0_119] : memref<2x1x96xf32, #tpu.memory_space<vmem>>, vector<1x1x96xf32>
    %221 = vector.shape_cast %220 : vector<1x1x96xf32> to vector<1x96xf32>
    %222 = vector.broadcast %221 : vector<1x96xf32> to vector<8x96xf32>
    %223 = arith.addf %219, %222 : vector<8x96xf32>
    %224 = tpu.transpose %223, [1, 0] : vector<8x96xf32> -> vector<96x8xf32>
    %225 = vector.extract_strided_slice %224 {offsets = [0, 0], sizes = [32, 8], strides = [1, 1]} : vector<96x8xf32> to vector<32x8xf32>
    %226 = vector.extract_strided_slice %224 {offsets = [32, 0], sizes = [32, 8], strides = [1, 1]} : vector<96x8xf32> to vector<32x8xf32>
    %227 = vector.extract_strided_slice %224 {offsets = [64, 0], sizes = [32, 8], strides = [1, 1]} : vector<96x8xf32> to vector<32x8xf32>
    %228 = vector.shape_cast %225 : vector<32x8xf32> to vector<4x8x8xf32>
    %229 = tpu.transpose %228, [0, 2, 1] : vector<4x8x8xf32> -> vector<4x8x8xf32>
    %230 = vector.shape_cast %226 : vector<32x8xf32> to vector<4x8x8xf32>
    %231 = vector.shape_cast %227 : vector<32x8xf32> to vector<4x8x8xf32>
    "tpu.trace_start"() <{level = 10 : i32, message = "hqd,hdk->hqk"}> : () -> ()
    %cst_120 = arith.constant dense<0.000000e+00> : vector<4x8x8xf32>
    %232 = tpu.matmul %229, %230, %cst_120 {dimension_numbers = #tpu.dot_dimension_numbers<[2], [1], [1], [2], [0, 0, 0, 1, 1, 2], [0], [0]>} : vector<4x8x8xf32>, vector<4x8x8xf32>, vector<4x8x8xf32> -> vector<4x8x8xf32>
    "tpu.trace_stop"() : () -> ()
    %cst_121 = arith.constant 0.353553385 : f32
    %233 = vector.broadcast %cst_121 : f32 to vector<4x8x8xf32>
    %234 = arith.mulf %232, %233 : vector<4x8x8xf32>
    %235 = vector.shape_cast %3 : vector<8x8xf32> to vector<1x8x8xf32>
    %cst_122 = arith.constant -1.000000e+30 : f32
    %236 = vector.broadcast %cst_122 : f32 to vector<1x8x8xf32>
    %237 = arith.mulf %235, %236 : vector<1x8x8xf32>
    %238 = vector.broadcast %237 : vector<1x8x8xf32> to vector<4x8x8xf32>
    %239 = arith.addf %234, %238 : vector<4x8x8xf32>
    %cst_123 = arith.constant dense<0xFF800000> : vector<4x8xf32>
    %240 = vector.multi_reduction <maximumf>, %239, %cst_123 [2] : vector<4x8x8xf32> to vector<4x8xf32>
    %241 = vector.shape_cast %240 : vector<4x8xf32> to vector<4x8x1xf32>
    %242 = vector.broadcast %241 : vector<4x8x1xf32> to vector<4x8x8xf32>
    %243 = arith.subf %239, %242 : vector<4x8x8xf32>
    %244 = math.exp %243 : vector<4x8x8xf32>
    %cst_124 = arith.constant dense<0.000000e+00> : vector<4x8xf32>
    %245 = vector.multi_reduction <add>, %244, %cst_124 [2] : vector<4x8x8xf32> to vector<4x8xf32>
    %246 = vector.shape_cast %245 : vector<4x8xf32> to vector<4x8x1xf32>
    %247 = tpu.reciprocal %246 {approx = true} : vector<4x8x1xf32> -> vector<4x8x1xf32>
    %248 = vector.broadcast %247 : vector<4x8x1xf32> to vector<4x8x8xf32>
    %249 = arith.mulf %244, %248 : vector<4x8x8xf32>
    "tpu.trace_start"() <{level = 10 : i32, message = "hdk,hqk->hdq"}> : () -> ()
    %cst_125 = arith.constant dense<0.000000e+00> : vector<4x8x8xf32>
    %250 = tpu.matmul %231, %249, %cst_125 {dimension_numbers = #tpu.dot_dimension_numbers<[2], [2], [1], [1], [0, 0, 0, 1, 1, 1], [0], [0]>} : vector<4x8x8xf32>, vector<4x8x8xf32>, vector<4x8x8xf32> -> vector<4x8x8xf32>
    "tpu.trace_stop"() : () -> ()
    %251 = vector.shape_cast %250 : vector<4x8x8xf32> to vector<32x8xf32>
    %252 = tpu.transpose %251, [1, 0] : vector<32x8xf32> -> vector<8x32xf32>
    %c1_126 = arith.constant 1 : index
    %c0_127 = arith.constant 0 : index
    %c0_128 = arith.constant 0 : index
    %253 = vector.load %arg13[%c1_126, %c0_127, %c0_128] : memref<2x32x32xf32, #tpu.memory_space<vmem>>, vector<1x32x32xf32>
    %254 = vector.shape_cast %253 : vector<1x32x32xf32> to vector<32x32xf32>
    %cst_129 = arith.constant dense<0.000000e+00> : vector<8x32xf32>
    %255 = tpu.matmul %252, %254, %cst_129 {dimension_numbers = #tpu.dot_dimension_numbers<[1], [0], [0], [1], [0, 0, 1, 1], [], []>} : vector<8x32xf32>, vector<32x32xf32>, vector<8x32xf32> -> vector<8x32xf32>
    %c1_130 = arith.constant 1 : index
    %c0_131 = arith.constant 0 : index
    %c0_132 = arith.constant 0 : index
    %256 = vector.load %arg14[%c1_130, %c0_131, %c0_132] : memref<2x1x32xf32, #tpu.memory_space<vmem>>, vector<1x1x32xf32>
    %257 = vector.shape_cast %256 : vector<1x1x32xf32> to vector<1x32xf32>
    %258 = vector.broadcast %257 : vector<1x32xf32> to vector<8x32xf32>
    %259 = arith.addf %255, %258 : vector<8x32xf32>
    %c1_133 = arith.constant 1 : index
    %c0_134 = arith.constant 0 : index
    %c0_135 = arith.constant 0 : index
    %260 = vector.load %arg7[%c1_133, %c0_134, %c0_135] : memref<2x1x32xf32, #tpu.memory_space<vmem>>, vector<1x1x32xf32>
    %261 = vector.shape_cast %260 : vector<1x1x32xf32> to vector<1x32xf32>
    %c1_136 = arith.constant 1 : index
    %c0_137 = arith.constant 0 : index
    %c0_138 = arith.constant 0 : index
    %262 = vector.load %arg8[%c1_136, %c0_137, %c0_138] : memref<2x1x32xf32, #tpu.memory_space<vmem>>, vector<1x1x32xf32>
    %263 = vector.shape_cast %262 : vector<1x1x32xf32> to vector<1x32xf32>
    %cst_139 = arith.constant dense<0.000000e+00> : vector<8xf32>
    %264 = vector.multi_reduction <add>, %259, %cst_139 [1] : vector<8x32xf32> to vector<8xf32>
    %265 = vector.shape_cast %264 : vector<8xf32> to vector<8x1xf32>
    %cst_140 = arith.constant 3.200000e+01 : f32
    %266 = vector.broadcast %cst_140 : f32 to vector<8x1xf32>
    %267 = arith.divf %265, %266 : vector<8x1xf32>
    %268 = vector.broadcast %267 : vector<8x1xf32> to vector<8x32xf32>
    %269 = arith.subf %259, %268 : vector<8x32xf32>
    %270 = arith.mulf %269, %269 : vector<8x32xf32>
    %cst_141 = arith.constant dense<0.000000e+00> : vector<8xf32>
    %271 = vector.multi_reduction <add>, %270, %cst_141 [1] : vector<8x32xf32> to vector<8xf32>
    %272 = vector.shape_cast %271 : vector<8xf32> to vector<8x1xf32>
    %cst_142 = arith.constant 0.0322580636 : f32
    %273 = vector.broadcast %cst_142 : f32 to vector<8x1xf32>
    %274 = arith.mulf %272, %273 : vector<8x1xf32>
    %275 = math.sqrt %274 : vector<8x1xf32>
    %cst_143 = arith.constant 9.99999997E-7 : f32
    %276 = vector.broadcast %cst_143 : f32 to vector<8x1xf32>
    %277 = arith.addf %275, %276 : vector<8x1xf32>
    %278 = tpu.reciprocal %277 {approx = true} : vector<8x1xf32> -> vector<8x1xf32>
    %279 = vector.broadcast %261 : vector<1x32xf32> to vector<8x32xf32>
    %280 = arith.mulf %279, %269 : vector<8x32xf32>
    %281 = vector.broadcast %278 : vector<8x1xf32> to vector<8x32xf32>
    %282 = arith.mulf %280, %281 : vector<8x32xf32>
    %283 = vector.broadcast %263 : vector<1x32xf32> to vector<8x32xf32>
    %284 = arith.addf %282, %283 : vector<8x32xf32>
    %c1_144 = arith.constant 1 : index
    %c0_145 = arith.constant 0 : index
    %c0_146 = arith.constant 0 : index
    %285 = vector.load %arg15[%c1_144, %c0_145, %c0_146] : memref<2x32x32xf32, #tpu.memory_space<vmem>>, vector<1x32x32xf32>
    %286 = vector.shape_cast %285 : vector<1x32x32xf32> to vector<32x32xf32>
    %cst_147 = arith.constant dense<0.000000e+00> : vector<8x32xf32>
    %287 = tpu.matmul %284, %286, %cst_147 {dimension_numbers = #tpu.dot_dimension_numbers<[1], [0], [0], [1], [0, 0, 1, 1], [], []>} : vector<8x32xf32>, vector<32x32xf32>, vector<8x32xf32> -> vector<8x32xf32>
    %c1_148 = arith.constant 1 : index
    %c0_149 = arith.constant 0 : index
    %c0_150 = arith.constant 0 : index
    %288 = vector.load %arg16[%c1_148, %c0_149, %c0_150] : memref<2x1x32xf32, #tpu.memory_space<vmem>>, vector<1x1x32xf32>
    %289 = vector.shape_cast %288 : vector<1x1x32xf32> to vector<1x32xf32>
    %290 = vector.broadcast %289 : vector<1x32xf32> to vector<8x32xf32>
    %291 = arith.addf %287, %290 : vector<8x32xf32>
    %292 = tpu.transpose %291, [1, 0] : vector<8x32xf32> -> vector<32x8xf32>
    %293 = vector.extract_strided_slice %13 {offsets = [64, 0], sizes = [32, 8], strides = [1, 1]} : vector<128x8xf32> to vector<32x8xf32>
    %294 = vector.extract_strided_slice %13 {offsets = [96, 0], sizes = [32, 8], strides = [1, 1]} : vector<128x8xf32> to vector<32x8xf32>
    %295 = vector.shape_cast %292 : vector<32x8xf32> to vector<4x8x8xf32>
    %296 = tpu.transpose %295, [0, 2, 1] : vector<4x8x8xf32> -> vector<4x8x8xf32>
    %297 = vector.shape_cast %293 : vector<32x8xf32> to vector<4x8x8xf32>
    %298 = vector.shape_cast %294 : vector<32x8xf32> to vector<4x8x8xf32>
    "tpu.trace_start"() <{level = 10 : i32, message = "hqd,hdk->hqk"}> : () -> ()
    %cst_151 = arith.constant dense<0.000000e+00> : vector<4x8x8xf32>
    %299 = tpu.matmul %296, %297, %cst_151 {dimension_numbers = #tpu.dot_dimension_numbers<[2], [1], [1], [2], [0, 0, 0, 1, 1, 2], [0], [0]>} : vector<4x8x8xf32>, vector<4x8x8xf32>, vector<4x8x8xf32> -> vector<4x8x8xf32>
    "tpu.trace_stop"() : () -> ()
    %cst_152 = arith.constant 0.353553385 : f32
    %300 = vector.broadcast %cst_152 : f32 to vector<4x8x8xf32>
    %301 = arith.mulf %299, %300 : vector<4x8x8xf32>
    %302 = vector.shape_cast %7 : vector<8x8xf32> to vector<1x8x8xf32>
    %cst_153 = arith.constant -1.000000e+30 : f32
    %303 = vector.broadcast %cst_153 : f32 to vector<1x8x8xf32>
    %304 = arith.mulf %302, %303 : vector<1x8x8xf32>
    %305 = vector.broadcast %304 : vector<1x8x8xf32> to vector<4x8x8xf32>
    %306 = arith.addf %301, %305 : vector<4x8x8xf32>
    %cst_154 = arith.constant dense<0xFF800000> : vector<4x8xf32>
    %307 = vector.multi_reduction <maximumf>, %306, %cst_154 [2] : vector<4x8x8xf32> to vector<4x8xf32>
    %308 = vector.shape_cast %307 : vector<4x8xf32> to vector<4x8x1xf32>
    %309 = vector.broadcast %308 : vector<4x8x1xf32> to vector<4x8x8xf32>
    %310 = arith.subf %306, %309 : vector<4x8x8xf32>
    %311 = math.exp %310 : vector<4x8x8xf32>
    %cst_155 = arith.constant dense<0.000000e+00> : vector<4x8xf32>
    %312 = vector.multi_reduction <add>, %311, %cst_155 [2] : vector<4x8x8xf32> to vector<4x8xf32>
    %313 = vector.shape_cast %312 : vector<4x8xf32> to vector<4x8x1xf32>
    %314 = tpu.reciprocal %313 {approx = true} : vector<4x8x1xf32> -> vector<4x8x1xf32>
    %315 = vector.broadcast %314 : vector<4x8x1xf32> to vector<4x8x8xf32>
    %316 = arith.mulf %311, %315 : vector<4x8x8xf32>
    "tpu.trace_start"() <{level = 10 : i32, message = "hdk,hqk->hdq"}> : () -> ()
    %cst_156 = arith.constant dense<0.000000e+00> : vector<4x8x8xf32>
    %317 = tpu.matmul %298, %316, %cst_156 {dimension_numbers = #tpu.dot_dimension_numbers<[2], [2], [1], [1], [0, 0, 0, 1, 1, 1], [0], [0]>} : vector<4x8x8xf32>, vector<4x8x8xf32>, vector<4x8x8xf32> -> vector<4x8x8xf32>
    "tpu.trace_stop"() : () -> ()
    %318 = vector.shape_cast %317 : vector<4x8x8xf32> to vector<32x8xf32>
    %319 = tpu.transpose %318, [1, 0] : vector<32x8xf32> -> vector<8x32xf32>
    %c1_157 = arith.constant 1 : index
    %c0_158 = arith.constant 0 : index
    %c0_159 = arith.constant 0 : index
    %320 = vector.load %arg19[%c1_157, %c0_158, %c0_159] : memref<2x32x32xf32, #tpu.memory_space<vmem>>, vector<1x32x32xf32>
    %321 = vector.shape_cast %320 : vector<1x32x32xf32> to vector<32x32xf32>
    %cst_160 = arith.constant dense<0.000000e+00> : vector<8x32xf32>
    %322 = tpu.matmul %319, %321, %cst_160 {dimension_numbers = #tpu.dot_dimension_numbers<[1], [0], [0], [1], [0, 0, 1, 1], [], []>} : vector<8x32xf32>, vector<32x32xf32>, vector<8x32xf32> -> vector<8x32xf32>
    %c1_161 = arith.constant 1 : index
    %c0_162 = arith.constant 0 : index
    %c0_163 = arith.constant 0 : index
    %323 = vector.load %arg20[%c1_161, %c0_162, %c0_163] : memref<2x1x32xf32, #tpu.memory_space<vmem>>, vector<1x1x32xf32>
    %324 = vector.shape_cast %323 : vector<1x1x32xf32> to vector<1x32xf32>
    %325 = vector.broadcast %324 : vector<1x32xf32> to vector<8x32xf32>
    %326 = arith.addf %322, %325 : vector<8x32xf32>
    %327 = arith.addf %326, %259 : vector<8x32xf32>
    %c1_164 = arith.constant 1 : index
    %c0_165 = arith.constant 0 : index
    %c0_166 = arith.constant 0 : index
    %328 = vector.load %arg9[%c1_164, %c0_165, %c0_166] : memref<2x1x32xf32, #tpu.memory_space<vmem>>, vector<1x1x32xf32>
    %329 = vector.shape_cast %328 : vector<1x1x32xf32> to vector<1x32xf32>
    %c1_167 = arith.constant 1 : index
    %c0_168 = arith.constant 0 : index
    %c0_169 = arith.constant 0 : index
    %330 = vector.load %arg10[%c1_167, %c0_168, %c0_169] : memref<2x1x32xf32, #tpu.memory_space<vmem>>, vector<1x1x32xf32>
    %331 = vector.shape_cast %330 : vector<1x1x32xf32> to vector<1x32xf32>
    %cst_170 = arith.constant dense<0.000000e+00> : vector<8xf32>
    %332 = vector.multi_reduction <add>, %327, %cst_170 [1] : vector<8x32xf32> to vector<8xf32>
    %333 = vector.shape_cast %332 : vector<8xf32> to vector<8x1xf32>
    %cst_171 = arith.constant 3.200000e+01 : f32
    %334 = vector.broadcast %cst_171 : f32 to vector<8x1xf32>
    %335 = arith.divf %333, %334 : vector<8x1xf32>
    %336 = vector.broadcast %335 : vector<8x1xf32> to vector<8x32xf32>
    %337 = arith.subf %327, %336 : vector<8x32xf32>
    %338 = arith.mulf %337, %337 : vector<8x32xf32>
    %cst_172 = arith.constant dense<0.000000e+00> : vector<8xf32>
    %339 = vector.multi_reduction <add>, %338, %cst_172 [1] : vector<8x32xf32> to vector<8xf32>
    %340 = vector.shape_cast %339 : vector<8xf32> to vector<8x1xf32>
    %cst_173 = arith.constant 0.0322580636 : f32
    %341 = vector.broadcast %cst_173 : f32 to vector<8x1xf32>
    %342 = arith.mulf %340, %341 : vector<8x1xf32>
    %343 = math.sqrt %342 : vector<8x1xf32>
    %cst_174 = arith.constant 9.99999997E-7 : f32
    %344 = vector.broadcast %cst_174 : f32 to vector<8x1xf32>
    %345 = arith.addf %343, %344 : vector<8x1xf32>
    %346 = tpu.reciprocal %345 {approx = true} : vector<8x1xf32> -> vector<8x1xf32>
    %347 = vector.broadcast %329 : vector<1x32xf32> to vector<8x32xf32>
    %348 = arith.mulf %347, %337 : vector<8x32xf32>
    %349 = vector.broadcast %346 : vector<8x1xf32> to vector<8x32xf32>
    %350 = arith.mulf %348, %349 : vector<8x32xf32>
    %351 = vector.broadcast %331 : vector<1x32xf32> to vector<8x32xf32>
    %352 = arith.addf %350, %351 : vector<8x32xf32>
    %c1_175 = arith.constant 1 : index
    %c0_176 = arith.constant 0 : index
    %c0_177 = arith.constant 0 : index
    %353 = vector.load %arg21[%c1_175, %c0_176, %c0_177] : memref<2x32x64xf32, #tpu.memory_space<vmem>>, vector<1x32x64xf32>
    %354 = vector.shape_cast %353 : vector<1x32x64xf32> to vector<32x64xf32>
    %cst_178 = arith.constant dense<0.000000e+00> : vector<8x64xf32>
    %355 = tpu.matmul %352, %354, %cst_178 {dimension_numbers = #tpu.dot_dimension_numbers<[1], [0], [0], [1], [0, 0, 1, 1], [], []>} : vector<8x32xf32>, vector<32x64xf32>, vector<8x64xf32> -> vector<8x64xf32>
    %c1_179 = arith.constant 1 : index
    %c0_180 = arith.constant 0 : index
    %c0_181 = arith.constant 0 : index
    %356 = vector.load %arg22[%c1_179, %c0_180, %c0_181] : memref<2x1x64xf32, #tpu.memory_space<vmem>>, vector<1x1x64xf32>
    %357 = vector.shape_cast %356 : vector<1x1x64xf32> to vector<1x64xf32>
    %358 = vector.broadcast %357 : vector<1x64xf32> to vector<8x64xf32>
    %359 = arith.addf %355, %358 : vector<8x64xf32>
    %cst_182 = arith.constant 0.000000e+00 : f32
    %360 = vector.broadcast %cst_182 : f32 to vector<8x64xf32>
    %361 = arith.maximumf %359, %360 : vector<8x64xf32>
    %c1_183 = arith.constant 1 : index
    %c0_184 = arith.constant 0 : index
    %c0_185 = arith.constant 0 : index
    %362 = vector.load %arg23[%c1_183, %c0_184, %c0_185] : memref<2x64x32xf32, #tpu.memory_space<vmem>>, vector<1x64x32xf32>
    %363 = vector.shape_cast %362 : vector<1x64x32xf32> to vector<64x32xf32>
    %cst_186 = arith.constant dense<0.000000e+00> : vector<8x32xf32>
    %364 = tpu.matmul %361, %363, %cst_186 {dimension_numbers = #tpu.dot_dimension_numbers<[1], [0], [0], [1], [0, 0, 1, 1], [], []>} : vector<8x64xf32>, vector<64x32xf32>, vector<8x32xf32> -> vector<8x32xf32>
    %c1_187 = arith.constant 1 : index
    %c0_188 = arith.constant 0 : index
    %c0_189 = arith.constant 0 : index
    %365 = vector.load %arg24[%c1_187, %c0_188, %c0_189] : memref<2x1x32xf32, #tpu.memory_space<vmem>>, vector<1x1x32xf32>
    %366 = vector.shape_cast %365 : vector<1x1x32xf32> to vector<1x32xf32>
    %367 = vector.broadcast %366 : vector<1x32xf32> to vector<8x32xf32>
    %368 = arith.addf %364, %367 : vector<8x32xf32>
    %369 = arith.addf %326, %368 : vector<8x32xf32>
    %c0_190 = arith.constant 0 : index
    %c0_191 = arith.constant 0 : index
    %370 = vector.load %arg25[%c0_190, %c0_191] : memref<1x32xf32, #tpu.memory_space<vmem>>, vector<1x32xf32>
    %c0_192 = arith.constant 0 : index
    %c0_193 = arith.constant 0 : index
    %371 = vector.load %arg26[%c0_192, %c0_193] : memref<1x32xf32, #tpu.memory_space<vmem>>, vector<1x32xf32>
    %cst_194 = arith.constant dense<0.000000e+00> : vector<8xf32>
    %372 = vector.multi_reduction <add>, %369, %cst_194 [1] : vector<8x32xf32> to vector<8xf32>
    %373 = vector.shape_cast %372 : vector<8xf32> to vector<8x1xf32>
    %cst_195 = arith.constant 3.200000e+01 : f32
    %374 = vector.broadcast %cst_195 : f32 to vector<8x1xf32>
    %375 = arith.divf %373, %374 : vector<8x1xf32>
    %376 = vector.broadcast %375 : vector<8x1xf32> to vector<8x32xf32>
    %377 = arith.subf %369, %376 : vector<8x32xf32>
    %378 = arith.mulf %377, %377 : vector<8x32xf32>
    %cst_196 = arith.constant dense<0.000000e+00> : vector<8xf32>
    %379 = vector.multi_reduction <add>, %378, %cst_196 [1] : vector<8x32xf32> to vector<8xf32>
    %380 = vector.shape_cast %379 : vector<8xf32> to vector<8x1xf32>
    %cst_197 = arith.constant 0.0322580636 : f32
    %381 = vector.broadcast %cst_197 : f32 to vector<8x1xf32>
    %382 = arith.mulf %380, %381 : vector<8x1xf32>
    %383 = math.sqrt %382 : vector<8x1xf32>
    %cst_198 = arith.constant 9.99999997E-7 : f32
    %384 = vector.broadcast %cst_198 : f32 to vector<8x1xf32>
    %385 = arith.addf %383, %384 : vector<8x1xf32>
    %386 = tpu.reciprocal %385 {approx = true} : vector<8x1xf32> -> vector<8x1xf32>
    %387 = vector.broadcast %370 : vector<1x32xf32> to vector<8x32xf32>
    %388 = arith.mulf %387, %377 : vector<8x32xf32>
    %389 = vector.broadcast %386 : vector<8x1xf32> to vector<8x32xf32>
    %390 = arith.mulf %388, %389 : vector<8x32xf32>
    %391 = vector.broadcast %371 : vector<1x32xf32> to vector<8x32xf32>
    %392 = arith.addf %390, %391 : vector<8x32xf32>
    %c0_199 = arith.constant 0 : index
    %c0_200 = arith.constant 0 : index
    %393 = vector.load %arg27[%c0_199, %c0_200] : memref<32x128xf32, #tpu.memory_space<vmem>>, vector<32x128xf32>
    %cst_201 = arith.constant dense<0.000000e+00> : vector<8x128xf32>
    %394 = tpu.matmul %392, %393, %cst_201 {dimension_numbers = #tpu.dot_dimension_numbers<[1], [0], [0], [1], [0, 0, 1, 1], [], []>} : vector<8x32xf32>, vector<32x128xf32>, vector<8x128xf32> -> vector<8x128xf32>
    %c0_202 = arith.constant 0 : index
    %c0_203 = arith.constant 0 : index
    %395 = vector.load %arg28[%c0_202, %c0_203] : memref<1x128xf32, #tpu.memory_space<vmem>>, vector<1x128xf32>
    %396 = vector.broadcast %395 : vector<1x128xf32> to vector<8x128xf32>
    %397 = arith.addf %394, %396 : vector<8x128xf32>
    %c0_204 = arith.constant 0 : index
    %c0_205 = arith.constant 0 : index
    %c0_206 = arith.constant 0 : index
    %398 = vector.load %arg29[%c0_204, %c0_205, %c0_206] : memref<1x8x128xf32, #tpu.memory_space<vmem>>, vector<1x8x128xf32>
    %399 = vector.shape_cast %398 : vector<1x8x128xf32> to vector<8x128xf32>
    %400 = vector.shape_cast %397 : vector<8x128xf32> to vector<1x8x128xf32>
    tpu.vector_store %arg29[%c0_204, %c0_205, %c0_206], %400 {strides = array<i32>} : memref<1x8x128xf32, #tpu.memory_space<vmem>>, vector<1x8x128xf32>,
    return
  }
  func.func @transform_0(%arg0: i32) -> (i32, i32, i32) {
    %c0_i32 = arith.constant 0 : i32
    %c0_i32_0 = arith.constant 0 : i32
    %c0_i32_1 = arith.constant 0 : i32
    return %arg0, %c0_i32, %c0_i32_0 : i32, i32, i32
  }
  func.func @transform_1(%arg0: i32) -> (i32, i32, i32) {
    %c0_i32 = arith.constant 0 : i32
    %c0_i32_0 = arith.constant 0 : i32
    %c0_i32_1 = arith.constant 0 : i32
    return %arg0, %c0_i32, %c0_i32_0 : i32, i32, i32
  }
  func.func @transform_2(%arg0: i32) -> (i32, i32, i32) {
    %c0_i32 = arith.constant 0 : i32
    %c0_i32_0 = arith.constant 0 : i32
    %c0_i32_1 = arith.constant 0 : i32
    return %arg0, %c0_i32, %c0_i32_0 : i32, i32, i32
  }
  func.func @transform_3(%arg0: i32) -> (i32, i32, i32) {
    %c0_i32 = arith.constant 0 : i32
    %c0_i32_0 = arith.constant 0 : i32
    %c0_i32_1 = arith.constant 0 : i32
    return %arg0, %c0_i32, %c0_i32_0 : i32, i32, i32
  }
  func.func @transform_4(%arg0: i32) -> (i32, i32, i32) {
    %c0_i32 = arith.constant 0 : i32
    %c0_i32_0 = arith.constant 0 : i32
    %c0_i32_1 = arith.constant 0 : i32
    %c0_i32_2 = arith.constant 0 : i32
    return %c0_i32, %c0_i32_0, %c0_i32_1 : i32, i32, i32
  }
  func.func @transform_5(%arg0: i32) -> (i32, i32, i32) {
    %c0_i32 = arith.constant 0 : i32
    %c0_i32_0 = arith.constant 0 : i32
    %c0_i32_1 = arith.constant 0 : i32
    %c0_i32_2 = arith.constant 0 : i32
    return %c0_i32, %c0_i32_0, %c0_i32_1 : i32, i32, i32
  }
  func.func @transform_6(%arg0: i32) -> (i32, i32, i32) {
    %c0_i32 = arith.constant 0 : i32
    %c0_i32_0 = arith.constant 0 : i32
    %c0_i32_1 = arith.constant 0 : i32
    %c0_i32_2 = arith.constant 0 : i32
    return %c0_i32, %c0_i32_0, %c0_i32_1 : i32, i32, i32
  }
  func.func @transform_7(%arg0: i32) -> (i32, i32, i32) {
    %c0_i32 = arith.constant 0 : i32
    %c0_i32_0 = arith.constant 0 : i32
    %c0_i32_1 = arith.constant 0 : i32
    %c0_i32_2 = arith.constant 0 : i32
    return %c0_i32, %c0_i32_0, %c0_i32_1 : i32, i32, i32
  }
  func.func @transform_8(%arg0: i32) -> (i32, i32, i32) {
    %c0_i32 = arith.constant 0 : i32
    %c0_i32_0 = arith.constant 0 : i32
    %c0_i32_1 = arith.constant 0 : i32
    %c0_i32_2 = arith.constant 0 : i32
    return %c0_i32, %c0_i32_0, %c0_i32_1 : i32, i32, i32
  }
  func.func @transform_9(%arg0: i32) -> (i32, i32, i32) {
    %c0_i32 = arith.constant 0 : i32
    %c0_i32_0 = arith.constant 0 : i32
    %c0_i32_1 = arith.constant 0 : i32
    %c0_i32_2 = arith.constant 0 : i32
    return %c0_i32, %c0_i32_0, %c0_i32_1 : i32, i32, i32
  }
  func.func @transform_10(%arg0: i32) -> (i32, i32, i32) {
    %c0_i32 = arith.constant 0 : i32
    %c0_i32_0 = arith.constant 0 : i32
    %c0_i32_1 = arith.constant 0 : i32
    %c0_i32_2 = arith.constant 0 : i32
    return %c0_i32, %c0_i32_0, %c0_i32_1 : i32, i32, i32
  }
  func.func @transform_11(%arg0: i32) -> (i32, i32, i32) {
    %c0_i32 = arith.constant 0 : i32
    %c0_i32_0 = arith.constant 0 : i32
    %c0_i32_1 = arith.constant 0 : i32
    %c0_i32_2 = arith.constant 0 : i32
    return %c0_i32, %c0_i32_0, %c0_i32_1 : i32, i32, i32
  }
  func.func @transform_12(%arg0: i32) -> (i32, i32, i32) {
    %c0_i32 = arith.constant 0 : i32
    %c0_i32_0 = arith.constant 0 : i32
    %c0_i32_1 = arith.constant 0 : i32
    %c0_i32_2 = arith.constant 0 : i32
    return %c0_i32, %c0_i32_0, %c0_i32_1 : i32, i32, i32
  }
  func.func @transform_13(%arg0: i32) -> (i32, i32, i32) {
    %c0_i32 = arith.constant 0 : i32
    %c0_i32_0 = arith.constant 0 : i32
    %c0_i32_1 = arith.constant 0 : i32
    %c0_i32_2 = arith.constant 0 : i32
    return %c0_i32, %c0_i32_0, %c0_i32_1 : i32, i32, i32
  }
  func.func @transform_14(%arg0: i32) -> (i32, i32, i32) {
    %c0_i32 = arith.constant 0 : i32
    %c0_i32_0 = arith.constant 0 : i32
    %c0_i32_1 = arith.constant 0 : i32
    %c0_i32_2 = arith.constant 0 : i32
    return %c0_i32, %c0_i32_0, %c0_i32_1 : i32, i32, i32
  }
  func.func @transform_15(%arg0: i32) -> (i32, i32, i32) {
    %c0_i32 = arith.constant 0 : i32
    %c0_i32_0 = arith.constant 0 : i32
    %c0_i32_1 = arith.constant 0 : i32
    %c0_i32_2 = arith.constant 0 : i32
    return %c0_i32, %c0_i32_0, %c0_i32_1 : i32, i32, i32
  }
  func.func @transform_16(%arg0: i32) -> (i32, i32) {
    %c0_i32 = arith.constant 0 : i32
    %c0_i32_0 = arith.constant 0 : i32
    %c0_i32_1 = arith.constant 0 : i32
    return %c0_i32, %c0_i32_0 : i32, i32
  }
  func.func @transform_17(%arg0: i32) -> (i32, i32) {
    %c0_i32 = arith.constant 0 : i32
    %c0_i32_0 = arith.constant 0 : i32
    %c0_i32_1 = arith.constant 0 : i32
    return %c0_i32, %c0_i32_0 : i32, i32
  }
  func.func @transform_18(%arg0: i32) -> (i32, i32, i32) {
    %c0_i32 = arith.constant 0 : i32
    %c0_i32_0 = arith.constant 0 : i32
    %c0_i32_1 = arith.constant 0 : i32
    %c0_i32_2 = arith.constant 0 : i32
    return %c0_i32, %c0_i32_0, %c0_i32_1 : i32, i32, i32
  }
  func.func @transform_19(%arg0: i32) -> (i32, i32, i32) {
    %c0_i32 = arith.constant 0 : i32
    %c0_i32_0 = arith.constant 0 : i32
    %c0_i32_1 = arith.constant 0 : i32
    %c0_i32_2 = arith.constant 0 : i32
    return %c0_i32, %c0_i32_0, %c0_i32_1 : i32, i32, i32
  }
  func.func @transform_20(%arg0: i32) -> (i32, i32, i32) {
    %c0_i32 = arith.constant 0 : i32
    %c0_i32_0 = arith.constant 0 : i32
    %c0_i32_1 = arith.constant 0 : i32
    %c0_i32_2 = arith.constant 0 : i32
    return %c0_i32, %c0_i32_0, %c0_i32_1 : i32, i32, i32
  }
  func.func @transform_21(%arg0: i32) -> (i32, i32, i32) {
    %c0_i32 = arith.constant 0 : i32
    %c0_i32_0 = arith.constant 0 : i32
    %c0_i32_1 = arith.constant 0 : i32
    %c0_i32_2 = arith.constant 0 : i32
    return %c0_i32, %c0_i32_0, %c0_i32_1 : i32, i32, i32
  }
  func.func @transform_22(%arg0: i32) -> (i32, i32, i32) {
    %c0_i32 = arith.constant 0 : i32
    %c0_i32_0 = arith.constant 0 : i32
    %c0_i32_1 = arith.constant 0 : i32
    %c0_i32_2 = arith.constant 0 : i32
    return %c0_i32, %c0_i32_0, %c0_i32_1 : i32, i32, i32
  }
  func.func @transform_23(%arg0: i32) -> (i32, i32, i32) {
    %c0_i32 = arith.constant 0 : i32
    %c0_i32_0 = arith.constant 0 : i32
    %c0_i32_1 = arith.constant 0 : i32
    %c0_i32_2 = arith.constant 0 : i32
    return %c0_i32, %c0_i32_0, %c0_i32_1 : i32, i32, i32
  }
  func.func @transform_24(%arg0: i32) -> (i32, i32) {
    %c0_i32 = arith.constant 0 : i32
    %c0_i32_0 = arith.constant 0 : i32
    %c0_i32_1 = arith.constant 0 : i32
    return %c0_i32, %c0_i32_0 : i32, i32
  }
  func.func @transform_25(%arg0: i32) -> (i32, i32) {
    %c0_i32 = arith.constant 0 : i32
    %c0_i32_0 = arith.constant 0 : i32
    %c0_i32_1 = arith.constant 0 : i32
    return %c0_i32, %c0_i32_0 : i32, i32
  }
  func.func @transform_26(%arg0: i32) -> (i32, i32) {
    %c0_i32 = arith.constant 0 : i32
    %c0_i32_0 = arith.constant 0 : i32
    %c0_i32_1 = arith.constant 0 : i32
    return %c0_i32, %c0_i32_0 : i32, i32
  }
  func.func @transform_27(%arg0: i32) -> (i32, i32) {
    %c0_i32 = arith.constant 0 : i32
    %c0_i32_0 = arith.constant 0 : i32
    %c0_i32_1 = arith.constant 0 : i32
    return %c0_i32, %c0_i32_0 : i32, i32
  }
  func.func @transform_28(%arg0: i32) -> (i32, i32, i32) {
    %c0_i32 = arith.constant 0 : i32
    %c0_i32_0 = arith.constant 0 : i32
    %c0_i32_1 = arith.constant 0 : i32
    return %arg0, %c0_i32, %c0_i32_0 : i32, i32, i32
  }
}

</mosaic_0001>

<bundles_post_ra>
// kernel: tpu_custom_call.1
= control target key start
LH: loop header
LB: loop body
LE: loop exit
PB: predicated region body
PF: predicated region fallthrough
CT: control target
= control target key end

     0   :  { %s9548_s0 = inlined_call_operand.hbm [shape: f32[2,8,32], index: 0, kind: input, shape index: {}]   ;;  %s9549_s1 = inlined_call_operand.hbm [shape: f32[2,8,8], index: 1, kind: input, shape index: {}]   ;;  %s9550_s2 = inlined_call_operand.hbm [shape: f32[2,8,32], index: 2, kind: input, shape index: {}]   ;;  %s9551_s3 = inlined_call_operand.hbm [shape: f32[2,8,8], index: 3, kind: input, shape index: {}]   ;;  %s9552_s4 = inlined_call_operand.vmem [shape: f32[2,1,32], index: 4, kind: input, shape index: {}]   ;;  %s9553_s5 = inlined_call_operand.hbm [shape: f32[2,1,32], index: 5, kind: input, shape index: {}]   ;;  %s9554_s6 = inlined_call_operand.hbm [shape: f32[2,1,32], index: 6, kind: input, shape index: {}]   ;;  %s9555_s7 = inlined_call_operand.hbm [shape: f32[2,1,32], index: 7, kind: input, shape index: {}]   ;;  %s9556_s8 = inlined_call_operand.hbm [shape: f32[2,1,32], index: 8, kind: input, shape index: {}]   ;;  %s9557_s9 = inlined_call_operand.hbm [shape: f32[2,1,32], index: 9, kind: input, shape index: {}]   ;;  %s9558_s10 = inlined_call_operand.vmem [shape: f32[2,32,96], index: 10, kind: input, shape index: {}]   ;;  %s9559_s11 = inlined_call_operand.hbm [shape: f32[2,1,96], index: 11, kind: input, shape index: {}]   ;;  %s9560_s12 = inlined_call_operand.vmem [shape: f32[2,32,32], index: 12, kind: input, shape index: {}]   ;;  %s9561_s13 = inlined_call_operand.hbm [shape: f32[2,1,32], index: 13, kind: input, shape index: {}]   ;;  %s9562_s14 = inlined_call_operand.vmem [shape: f32[2,32,32], index: 14, kind: input, shape index: {}]   ;;  %s9563_s15 = inlined_call_operand.hbm [shape: f32[2,1,32], index: 15, kind: input, shape index: {}]   ;;  %s9564_s16 = inlined_call_operand.hbm [shape: f32[32,128], index: 16, kind: input, shape index: {}]   ;;  %s9565_s17 = inlined_call_operand.hbm [shape: f32[1,128], index: 17, kind: input, shape index: {}]   ;;  %s9566_s18 = inlined_call_operand.hbm [shape: f32[2,32,32], index: 18, kind: input, shape index: {}]   ;;  %s9567_s19 = inlined_call_operand.hbm [shape: f32[2,1,32], index: 19, kind: input, shape index: {}]   ;;  %s9568_s20 = inlined_call_operand.hbm [shape: f32[2,32,64], index: 20, kind: input, shape index: {}]   ;;  %s9569_s21 = inlined_call_operand.hbm [shape: f32[2,1,64], index: 21, kind: input, shape index: {}]   ;;  %s9570_s22 = inlined_call_operand.vmem [shape: f32[2,64,32], index: 22, kind: input, shape index: {}]   ;;  %s9571_s23 = inlined_call_operand.hbm [shape: f32[2,1,32], index: 23, kind: input, shape index: {}]   ;;  %s9572_s24 = inlined_call_operand.hbm [shape: f32[1,32], index: 24, kind: input, shape index: {}]   ;;  %s9573_s25 = inlined_call_operand.hbm [shape: f32[1,32], index: 25, kind: input, shape index: {}]   ;;  %s9574_s26 = inlined_call_operand.vmem [shape: f32[32,128], index: 26, kind: input, shape index: {}]   ;;  %s9575_s27 = inlined_call_operand.vmem [shape: f32[1,128], index: 27, kind: input, shape index: {}]   ;;  %s9576_s28 = inlined_call_operand.hbm [shape: f32[2,8,128], index: 28, kind: output, shape index: {}]  }
   0x1   :  { %9629 = sst [smem:[#allocation54_spill]] %s9548_s0 }
   0x2   :  { %9630 = sst [smem:[#allocation55_spill]] %s9549_s1 }
   0x3   :  { %9631 = sst [smem:[#allocation56_spill]] %s9550_s2 }
   0x4   :  { %9632 = sst [smem:[#allocation57_spill]] %s9551_s3 }
   0x5   :  { %9633 = sst [smem:[#allocation58_spill]] %s9552_s4 }
   0x6   :  { %9634 = sst [smem:[#allocation59_spill]] %s9553_s5 }
   0x7   :  { %9635 = sst [smem:[#allocation60_spill]] %s9554_s6 }
   0x8   :  { %9636 = sst [smem:[#allocation61_spill]] %s9555_s7 }
   0x9   :  { %9637 = sst [smem:[#allocation62_spill]] %s9556_s8 }
   0xa   :  { %9638 = sst [smem:[#allocation63_spill]] %s9557_s9 }
   0xb   :  { %9639 = sst [smem:[#allocation64_spill]] %s9558_s10 }
   0xc   :  { %9640 = sst [smem:[#allocation65_spill]] %s9559_s11 }
   0xd   :  { %9641 = sst [smem:[#allocation66_spill]] %s9560_s12 }
   0xe   :  { %9642 = sst [smem:[#allocation67_spill]] %s9561_s13 }
   0xf   :  { %9643 = sst [smem:[#allocation68_spill]] %s9562_s14 }
  0x10   :  { %9644 = sst [smem:[#allocation69_spill]] %s9563_s15 }
  0x11   :  { %9645 = sst [smem:[#allocation70_spill]] %s9564_s16 }
  0x12   :  { %9646 = sst [smem:[#allocation71_spill]] %s9565_s17 }
  0x13   :  { %9647 = sst [smem:[#allocation72_spill]] %s9566_s18 }
  0x14   :  { %9648 = sst [smem:[#allocation73_spill]] %s9567_s19 }
  0x15   :  { %9649 = sst [smem:[#allocation74_spill]] %s9568_s20 }
  0x16   :  { %9650 = sst [smem:[#allocation75_spill]] %s9569_s21 }
  0x17   :  { %9651 = sst [smem:[#allocation76_spill]] %s9570_s22 }
  0x18   :  { %9652 = sst [smem:[#allocation77_spill]] %s9571_s23 }
  0x19   :  { %9653 = sst [smem:[#allocation78_spill]] %s9572_s24 }
  0x1a   :  { %9654 = sst [smem:[#allocation79_spill]] %s9573_s25 }
  0x1b   :  { %9655 = sst [smem:[#allocation80_spill]] %s9574_s26 }
  0x1c   :  { %9656 = sst [smem:[#allocation81_spill]] %s9575_s27 }
  0x1d   :  { %9657 = sst [smem:[#allocation82_spill]] %s9576_s28 }
  0x1e   :  { %33 = vsyncpa [#allocation3], 0 }
  0x1f   :  { %35 = vsyncpa [#allocation3 + $0x1], 0 }
  0x20   :  { %36 = vsyncpa [#allocation6], 0 }
  0x21   :  { %38 = vsyncpa [#allocation6 + $0x1], 0 }
  0x22   :  { %39 = vsyncpa [#allocation9], 0 }
  0x23   :  { %41 = vsyncpa [#allocation9 + $0x1], 0 }
  0x24   :  { %42 = vsyncpa [#allocation12], 0 }
  0x25   :  { %43 = vsyncpa [#allocation15], 0 }
  0x26   :  { %44 = vsyncpa [#allocation18], 0 }
  0x27   :  { %45 = vsyncpa [#allocation21], 0 }
  0x28   :  { %46 = vsyncpa [#allocation24], 0 }
  0x29   :  { %47 = vsyncpa [#allocation27], 0 }
  0x2a   :  { %48 = vsyncpa [#allocation30], 0 }
  0x2b   :  { %49 = vsyncpa [#allocation33], 0 }
  0x2c   :  { %50 = vsyncpa [#allocation4], 0 }
  0x2d   :  { %52 = vsyncpa [#allocation4 + $0x1], 0  ;;  %s8330_s8 = smov 0   ;;  %s8332_s5 = smov 0  }
  0x2e   :  { %s8334_s9 = smov 0   ;;  %s8336_s30 = smov 0  }
  0x2f LB: > { %9658 = sst [smem:[#allocation49_spill]] %s8142_s8  ;;  %s8156_s3 = smov [#allocation10]   ;;  %s8154_s30 = sphi %s8336_s30, %s9738_s30   ;;  %s8150_s9 = sphi %s8334_s9, %s9742_s9   ;;  %s8146_s5 = sphi %s8332_s5, %s9741_s5   ;;  %s8142_s8 = sphi %s8330_s8, %s9740_s8  }
  0x30   : > { %s712_s6 = sshll.u32 %s8156_s3, 4  ;;  %s8351_s10 = sadd.s32 4294967295, %s8154_s30   ;;  %s8356_s6 = int_to_ptr.vmem [resolvable:$true] %s712_s6 }
  0x31   : > { %p6384_p0 = scmp.ge.s32.totalorder %s8154_s30, 1  ;;  %p9601_p1 = scmp.eq.s32.totalorder %s8351_s10, 0 }
  0x32   : > { %p697_p2 = scmp.lt.s32.totalorder %s8154_s30, 3  ;;  %s8157_s11 = smov [#allocation11]  }
  0x33   : > { %s725_s29 = sshll.u32 %s8157_s11, 4  ;;  %s8158_s7 = smov [#allocation14]   ;;  %s8371_s29 = int_to_ptr.vmem [resolvable:$true] %s725_s29 }
  0x34   : > { %p8358_p3 = pnand %p6384_p0, %p697_p2  ;;  %s751_s12 = sshll.u32 %s8158_s7, 4  ;;  %s8373_s12 = int_to_ptr.vmem [resolvable:$true] %s751_s12 }
  0x35   : > { %s9662_s3 = sld [smem:[#allocation59_spill]] }
  0x36   : > { %s9659_s0 = scalar_select %p8358_p3, 1, 0 }
  0x37   : > { %p7195_p5 = pneg %p8358_p3 }
  0x38   : > { %9660 = sst [smem:[#allocation50_spill]] %s9659_s0 }
  0x39   : > { %p8367_p6 = pnand %p7195_p5, %p9601_p1 }
  0x3b   : > { %s9661_s2 = scalar_select %p8367_p6, 1, 0 }
  0x3c   : > { %s7448_s28 = scalar_lea.hbm %s9662_s3, 32  ;;  %p8383_p8 = pneg %p8367_p6 }
  0x3d   : > { %p7449_p7 = scmp.ne.s32.totalorder %s9662_s3, %s7448_s28  ;;  %p7455_p11 = scmp.lt.u32.totalorder %s7448_s28, %s9662_s3 }
  0x3e   : > { %s9663_s11 = scalar_select %p8383_p8, 1, 0 }
  0x3f   : > { %p7451_p9 = pnand %p8383_p8, %p7449_p7 }
  0x41   : > { %p7452_p10 = pneg %p7451_p9 }
  0x43   : > { %p7457_p12 = pnand %p7455_p11, %p7452_p10 }
  0x45   : > { %7460 = shalt.err (!%p7457_p12)
}
  0x46   : > { %s7461_s26 = scalar_lea.vmem %s8356_s6, 32  ;;  %p7469_p5 = scmp.lt.s32.totalorder %s8356_s6, %s8356_s6 }
  0x47   : > { %p7462_p13 = scmp.ne.s32.totalorder %s8356_s6, %s7461_s26  ;;  %p7470_p4 = scmp.lt.s32.totalorder %s7461_s26, %s7461_s26 }
  0x49   : > { %p7464_p0 = pnand %p7462_p13, %p8383_p8  ;;  %p7471_p7 = por %p7470_p4, %p7469_p5 }
  0x4b   : > { %p7465_p2 = pneg %p7464_p0 }
  0x4d   : > { %p7472_p9 = pnand %p7471_p7, %p7465_p2 }
  0x4f   : > { %7475 = shalt.err (!%p7472_p9)
}
  0x50   : > { %s9603_s27 = smov 16   ;;  %s9606_s22 = smov 1  }
  0x51   : > { %7198 = dma.hbm_to_vmem [thread:$0]  (!%p8367_p6), %s9662_s3, 32, %s8356_s6, [#allocation9], %s9603_s27, %s9603_s27, %s9606_s22  }
  0x52   : > { %s9664_s14 = sld [smem:[#allocation60_spill]] }
  0x58   : > { %s7476_s26 = scalar_lea.hbm %s9664_s14, 32 }
  0x59   : > { %p7477_p4 = scmp.ne.s32.totalorder %s9664_s14, %s7476_s26  ;;  %p7483_p12 = scmp.lt.u32.totalorder %s7476_s26, %s9664_s14 }
  0x5b   : > { %p7479_p10 = pnand %p7477_p4, %p8383_p8 }
  0x5d   : > { %p7480_p11 = pneg %p7479_p10 }
  0x5f   : > { %p7485_p13 = pnand %p7483_p12, %p7480_p11 }
  0x61   : > { %7488 = shalt.err (!%p7485_p13)
}
  0x62   : > { %s7489_s6 = scalar_lea.vmem %s8371_s29, 32  ;;  %p7497_p7 = scmp.lt.s32.totalorder %s8371_s29, %s8371_s29 }
  0x63   : > { %p7490_p0 = scmp.ne.s32.totalorder %s8371_s29, %s7489_s6  ;;  %p7498_p9 = scmp.lt.s32.totalorder %s7489_s6, %s7489_s6 }
  0x65   : > { %p7492_p2 = pnand %p7490_p0, %p8383_p8  ;;  %p7499_p4 = por %p7498_p9, %p7497_p7 }
  0x67   : > { %p7493_p5 = pneg %p7492_p2 }
  0x69   : > { %p7500_p10 = pnand %p7499_p4, %p7493_p5 }
  0x6b   : > { %7503 = shalt.err (!%p7500_p10)
}
  0x6c   : > { %7201 = dma.hbm_to_vmem [thread:$0]  (!%p8367_p6), %s9664_s14, 32, %s8371_s29, [#allocation12], %s9603_s27, %s9603_s27, %s9606_s22  }
  0x6d   : > { %s9665_s28 = sld [smem:[#allocation62_spill]] }
  0x73   : > { %s7504_s1 = scalar_lea.hbm %s9665_s28, 32 }
  0x74   : > { %p7505_p11 = scmp.ne.s32.totalorder %s9665_s28, %s7504_s1  ;;  %p7511_p0 = scmp.lt.u32.totalorder %s7504_s1, %s9665_s28 }
  0x76   : > { %p7507_p12 = pnand %p7505_p11, %p8383_p8 }
  0x78   : > { %p7508_p13 = pneg %p7507_p12 }
  0x7a   : > { %p7513_p2 = pnand %p7511_p0, %p7508_p13 }
  0x7c   : > { %7516 = shalt.err (!%p7513_p2)
}
  0x7d   : > { %s7517_s29 = scalar_lea.vmem %s8373_s12, 32  ;;  %p7525_p4 = scmp.lt.s32.totalorder %s8373_s12, %s8373_s12 }
  0x7e   : > { %p7518_p5 = scmp.ne.s32.totalorder %s8373_s12, %s7517_s29  ;;  %p7526_p10 = scmp.lt.s32.totalorder %s7517_s29, %s7517_s29 }
  0x80   : > { %p7520_p7 = pnand %p7518_p5, %p8383_p8  ;;  %p7527_p11 = por %p7526_p10, %p7525_p4 }
  0x82   : > { %p7521_p9 = pneg %p7520_p7 }
  0x84   : > { %p7528_p12 = pnand %p7527_p11, %p7521_p9 }
  0x86   : > { %7531 = shalt.err (!%p7528_p12)
}
  0x87   : > { %7207 = dma.hbm_to_vmem [thread:$0]  (!%p8367_p6), %s9665_s28, 32, %s8373_s12, [#allocation15], %s9603_s27, %s9603_s27, %s9606_s22  }
  0x88   : > { %s8161_s25 = smov [#allocation17]   ;;  %s8162_s1 = smov [#allocation20]  }
  0x89   : > { %s780_s0 = sshll.u32 %s8161_s25, 4  ;;  %s812_s4 = sshll.u32 %s8162_s1, 4  ;;  %s781_s0 = int_to_ptr.vmem [resolvable:$true] %s780_s0  ;;  %s813_s4 = int_to_ptr.vmem [resolvable:$true] %s812_s4 }
  0x8a   : > { %s9666_s6 = sld [smem:[#allocation65_spill]] }
  0x90   : > { %s7532_s29 = scalar_lea.hbm %s9666_s6, 32 }
  0x91   : > { %p7533_p13 = scmp.ne.s32.totalorder %s9666_s6, %s7532_s29  ;;  %p7539_p5 = scmp.lt.u32.totalorder %s7532_s29, %s9666_s6 }
  0x93   : > { %p7535_p0 = pnand %p7533_p13, %p8383_p8 }
  0x95   : > { %p7536_p2 = pneg %p7535_p0 }
  0x97   : > { %p7541_p7 = pnand %p7539_p5, %p7536_p2 }
  0x99   : > { %7544 = shalt.err (!%p7541_p7)
}
  0x9a   : > { %s7545_s12 = scalar_lea.vmem %s781_s0, 32  ;;  %p7553_p11 = scmp.lt.s32.totalorder %s781_s0, %s781_s0 }
  0x9b   : > { %p7546_p9 = scmp.ne.s32.totalorder %s781_s0, %s7545_s12  ;;  %p7554_p12 = scmp.lt.s32.totalorder %s7545_s12, %s7545_s12 }
  0x9d   : > { %p7548_p4 = pnand %p7546_p9, %p8383_p8  ;;  %p7555_p1 = por %p7554_p12, %p7553_p11 }
  0x9f   : > { %p7549_p10 = pneg %p7548_p4 }
  0xa1   : > { %p7556_p3 = pnand %p7555_p1, %p7549_p10 }
  0xa3   : > { %7559 = shalt.err (!%p7556_p3)
}
  0xa4   : > { %7213 = dma.hbm_to_vmem [thread:$0]  (!%p8367_p6), %s9666_s6, 32, %s781_s0, [#allocation18], %s9603_s27, %s9603_s27, %s9606_s22  }
  0xa5   : > { %s9667_s15 = sld [smem:[#allocation69_spill]] }
  0xab   : > { %s7560_s25 = scalar_lea.hbm %s9667_s15, 32 }
  0xac   : > { %p7561_p1 = scmp.ne.s32.totalorder %s9667_s15, %s7560_s25  ;;  %p7567_p0 = scmp.lt.u32.totalorder %s7560_s25, %s9667_s15 }
  0xae   : > { %p7563_p3 = pnand %p7561_p1, %p8383_p8 }
  0xb0   : > { %p7564_p13 = pneg %p7563_p3 }
  0xb2   : > { %p7569_p2 = pnand %p7567_p0, %p7564_p13 }
  0xb4   : > { %7572 = shalt.err (!%p7569_p2)
}
  0xb5   : > { %s7573_s20 = scalar_lea.vmem %s813_s4, 32  ;;  %p7581_p4 = scmp.lt.s32.totalorder %s813_s4, %s813_s4 }
  0xb6   : > { %p7574_p5 = scmp.ne.s32.totalorder %s813_s4, %s7573_s20  ;;  %p7582_p10 = scmp.lt.s32.totalorder %s7573_s20, %s7573_s20 }
  0xb8   : > { %p7576_p7 = pnand %p7574_p5, %p8383_p8  ;;  %p7583_p11 = por %p7582_p10, %p7581_p4 }
  0xba   : > { %p7577_p9 = pneg %p7576_p7 }
  0xbc   : > { %p7584_p12 = pnand %p7583_p11, %p7577_p9 }
  0xbe   : > { %7587 = shalt.err (!%p7584_p12)
}
  0xbf   : > { %7219 = dma.hbm_to_vmem [thread:$0]  (!%p8367_p6), %s9667_s15, 32, %s813_s4, [#allocation21], %s9603_s27, %s9603_s27, %s9606_s22  }
  0xc0   : > { %s8163_s14 = smov [#allocation23]   ;;  %s8164_s3 = smov [#allocation26]  }
  0xc1   : > { %s839_s18 = sshll.u32 %s8163_s14, 4  ;;  %s862_s23 = sshll.u32 %s8164_s3, 4  ;;  %s840_s18 = int_to_ptr.vmem [resolvable:$true] %s839_s18  ;;  %s863_s23 = int_to_ptr.vmem [resolvable:$true] %s862_s23 }
  0xc2   : > { %s9668_s17 = sld [smem:[#allocation71_spill]] }
  0xc8   : > { %s7588_s7 = scalar_lea.hbm %s9668_s17, 16 }
  0xc9   : > { %p7589_p1 = scmp.ne.s32.totalorder %s9668_s17, %s7588_s7  ;;  %p7595_p0 = scmp.lt.u32.totalorder %s7588_s7, %s9668_s17 }
  0xcb   : > { %p7591_p3 = pnand %p7589_p1, %p8383_p8 }
  0xcd   : > { %p7592_p13 = pneg %p7591_p3 }
  0xcf   : > { %p7597_p2 = pnand %p7595_p0, %p7592_p13 }
  0xd1   : > { %7600 = shalt.err (!%p7597_p2)
}
  0xd2   : > { %s7601_s4 = scalar_lea.vmem %s840_s18, 16  ;;  %s7608_s12 = scalar_lea.vmem %s840_s18, 32 }
  0xd3   : > { %p7602_p5 = scmp.ne.s32.totalorder %s840_s18, %s7601_s4  ;;  %p7609_p4 = scmp.lt.s32.totalorder %s840_s18, %s840_s18 }
  0xd4   : > { %p7610_p10 = scmp.lt.s32.totalorder %s7608_s12, %s7601_s4 }
  0xd5   : > { %p7604_p7 = pnand %p7602_p5, %p8383_p8 }
  0xd6   : > { %p7611_p11 = por %p7610_p10, %p7609_p4 }
  0xd7   : > { %p7605_p9 = pneg %p7604_p7 }
  0xd9   : > { %p7612_p12 = pnand %p7611_p11, %p7605_p9 }
  0xdb   : > { %7615 = shalt.err (!%p7612_p12)
}
  0xdc   : > { %7225 = dma.hbm_to_vmem [thread:$0]  (!%p8367_p6), %s9668_s17, 16, %s840_s18, [#allocation24]  }
  0xdd   : > { %s9669_s19 = sld [smem:[#allocation73_spill]] }
  0xe3   : > { %s7616_s7 = scalar_lea.hbm %s9669_s19, 32 }
  0xe4   : > { %p7617_p1 = scmp.ne.s32.totalorder %s9669_s19, %s7616_s7  ;;  %p7623_p0 = scmp.lt.u32.totalorder %s7616_s7, %s9669_s19 }
  0xe6   : > { %p7619_p3 = pnand %p7617_p1, %p8383_p8 }
  0xe8   : > { %p7620_p13 = pneg %p7619_p3 }
  0xea   : > { %p7625_p2 = pnand %p7623_p0, %p7620_p13 }
  0xec   : > { %7628 = shalt.err (!%p7625_p2)
}
  0xed   : > { %s7629_s4 = scalar_lea.vmem %s863_s23, 32  ;;  %p7637_p4 = scmp.lt.s32.totalorder %s863_s23, %s863_s23 }
  0xee   : > { %p7630_p5 = scmp.ne.s32.totalorder %s863_s23, %s7629_s4  ;;  %p7638_p10 = scmp.lt.s32.totalorder %s7629_s4, %s7629_s4 }
  0xf0   : > { %p7632_p7 = pnand %p7630_p5, %p8383_p8  ;;  %p7639_p11 = por %p7638_p10, %p7637_p4 }
  0xf2   : > { %p7633_p9 = pneg %p7632_p7 }
  0xf4   : > { %p7640_p12 = pnand %p7639_p11, %p7633_p9 }
  0xf6   : > { %7643 = shalt.err (!%p7640_p12)
}
  0xf7   : > { %7231 = dma.hbm_to_vmem [thread:$0]  (!%p8367_p6), %s9669_s19, 32, %s863_s23, [#allocation27], %s9603_s27, %s9603_s27, %s9606_s22  }
  0xf8   : > { %s8165_s14 = smov [#allocation29]   ;;  %s8166_s25 = smov [#allocation32]  }
  0xf9   : > { %s888_s3 = sshll.u32 %s8165_s14, 4  ;;  %s918_s1 = sshll.u32 %s8166_s25, 4  ;;  %s889_s3 = int_to_ptr.vmem [resolvable:$true] %s888_s3  ;;  %s919_s1 = int_to_ptr.vmem [resolvable:$true] %s918_s1 }
  0xfa   : > { %s9670_s21 = sld [smem:[#allocation75_spill]] }
 0x100   : > { %s7644_s29 = scalar_lea.hbm %s9670_s21, 32 }
 0x101   : > { %p7645_p1 = scmp.ne.s32.totalorder %s9670_s21, %s7644_s29  ;;  %p7651_p0 = scmp.lt.u32.totalorder %s7644_s29, %s9670_s21 }
 0x103   : > { %p7647_p3 = pnand %p7645_p1, %p8383_p8 }
 0x105   : > { %p7648_p13 = pneg %p7647_p3 }
 0x107   : > { %p7653_p2 = pnand %p7651_p0, %p7648_p13 }
 0x109   : > { %7656 = shalt.err (!%p7653_p2)
}
 0x10a   : > { %s7657_s23 = scalar_lea.vmem %s889_s3, 32  ;;  %p7665_p4 = scmp.lt.s32.totalorder %s889_s3, %s889_s3 }
 0x10b   : > { %p7658_p5 = scmp.ne.s32.totalorder %s889_s3, %s7657_s23  ;;  %p7666_p10 = scmp.lt.s32.totalorder %s7657_s23, %s7657_s23 }
 0x10d   : > { %p7660_p7 = pnand %p7658_p5, %p8383_p8  ;;  %p7667_p11 = por %p7666_p10, %p7665_p4 }
 0x10f   : > { %p7661_p9 = pneg %p7660_p7 }
 0x111   : > { %p7668_p12 = pnand %p7667_p11, %p7661_p9 }
 0x113   : > { %7671 = shalt.err (!%p7668_p12)
}
 0x114   : > { %7237 = dma.hbm_to_vmem [thread:$0]  (!%p8367_p6), %s9670_s21, 32, %s889_s3, [#allocation30], %s9603_s27, %s9603_s27, %s9606_s22  }
 0x115   : > { %s9671_s24 = sld [smem:[#allocation78_spill]] }
 0x11b   : > { %s7672_s26 = scalar_lea.hbm %s9671_s24, 16 }
 0x11c   : > { %p7673_p1 = scmp.ne.s32.totalorder %s9671_s24, %s7672_s26  ;;  %p7679_p0 = scmp.lt.u32.totalorder %s7672_s26, %s9671_s24 }
 0x11e   : > { %p7675_p3 = pnand %p7673_p1, %p8383_p8 }
 0x120   : > { %p7676_p13 = pneg %p7675_p3 }
 0x122   : > { %p7681_p2 = pnand %p7679_p0, %p7676_p13 }
 0x124   : > { %7684 = shalt.err (!%p7681_p2)
}
 0x125   : > { %s7685_s18 = scalar_lea.vmem %s919_s1, 16  ;;  %s7692_s3 = scalar_lea.vmem %s919_s1, 32 }
 0x126   : > { %p7686_p5 = scmp.ne.s32.totalorder %s919_s1, %s7685_s18  ;;  %p7693_p4 = scmp.lt.s32.totalorder %s919_s1, %s919_s1 }
 0x127   : > { %p7694_p10 = scmp.lt.s32.totalorder %s7692_s3, %s7685_s18 }
 0x128   : > { %p7688_p7 = pnand %p7686_p5, %p8383_p8 }
 0x129   : > { %p7695_p11 = por %p7694_p10, %p7693_p4 }
 0x12a   : > { %p7689_p9 = pneg %p7688_p7 }
 0x12c   : > { %p7696_p12 = pnand %p7695_p11, %p7689_p9 }
 0x12e   : > { %7699 = shalt.err (!%p7696_p12)
}
 0x12f   : > { %7243 = dma.hbm_to_vmem [thread:$0]  (!%p8367_p6), %s9671_s24, 16, %s919_s1, [#allocation33]  }
 0x130   : > { %s6383_s14 = sadd.s32 4294967294, %s8154_s30   ;;  %s8581_s25 = sadd.s32 1, %s8154_s30  }
 0x131   : > { %9672 = sst [smem:[#allocation51_spill]] %s8581_s25  ;;  %s65_s7 = sadd.s32 1, %s8150_s9 }
 0x132   : > { %s62_s26 = ssub.s32 %s8154_s30, %s8581_s25  ;;  %p72_p1 = scmp.ne.s32.totalorder %s8150_s9, %s8146_s5 }
 0x133   : > { %p63_p3 = scmp.eq.s32.totalorder %s62_s26, 0  ;;  %p73_p13 = scmp.eq.s32.totalorder %s8154_s30, 0 }
 0x134   : > { %p78_p0 = scmp.ne.s32.totalorder %s8146_s5, %s8142_s8  ;;  %p684_p2 = scmp.eq.s32.totalorder %s8351_s10, 1 }
 0x135   : > { %s8593_s29 = scalar_select %p63_p3, %s8150_s9, %s65_s7  }
 0x136   : > { %p74_p5 = por %p73_p13, %p72_p1  ;;  %p9674_p7 = scmp.eq.s32.totalorder %s8351_s10, 0 }
 0x137   : > { %9673 = sst [smem:[#allocation52_spill]] %s8593_s29  ;;  %p8601_p4 = por %p684_p2, %p72_p1 }
 0x138   : > { %p8597_p9 = por %p9674_p7, %p78_p0  ;;  %p690_p10 = scmp.eq.s32.totalorder %s6383_s14, 1 }
 0x139   : > { %s9676_s20 = scalar_select %p8601_p4, 1, 0 }
 0x13a   : > { %s9675_s1 = scalar_select %p8597_p9, 1, 0 }
 0x13b   : > { %p7281_p11 = scmp.lt.s32.totalorder %s8154_s30, 2  ;;  %s9605_s0 = sand.u32 1, %s8150_s9  }
 0x13c   : > { %p8607_p12 = por %p690_p10, %p78_p0  ;;  %s8613_s18 = sshll.u32 %s9605_s0, 3 }
 0x13d   : > { %s8616_s3 = sshll.u32 %s8154_s30, 7  ;;  %p8618_p3 = pnand %p7281_p11, %p74_p5 }
 0x13e   : > { %s9677_s4 = scalar_select %p8607_p12, 1, 0 }
 0x13f   : > { %s9679_s23 = scalar_select %p8618_p3, 1, 0 }
 0x140   : > { %9678 = sst [smem:[#allocation53_spill]] %s9677_s4  ;;  %s9610_s12 = sand.u32 1, %s8154_s30  }
 0x141   : > { %s9680_s26 = sld [smem:[#allocation55_spill]]  ;;  %s968_s0 = scalar_lea.vmem [#allocation5], %s8613_s18 }
 0x142   : > { %s975_s22 = sshll.u32 %s968_s0, 4  ;;  %s8634_s6 = scalar_lea.sflag [#allocation6], %s9610_s12  ;;  %s8630_s22 = int_to_ptr.vmem [resolvable:$true] %s975_s22 }
 0x143   : > { %p8640_p13 = pneg %p8618_p3 }
 0x145   : > { %s9681_s17 = scalar_select %p8640_p13, 1, 0 }
 0x147   : > { %s8627_s27 = scalar_lea.hbm %s9680_s26, %s8616_s3  ;;  %s7705_s0 = scalar_lea.hbm %s9680_s26, 256 }
 0x148   : > { %s7700_s15 = scalar_lea.hbm %s8627_s27, 128  ;;  %p7706_p5 = scmp.lt.u32.totalorder %s8627_s27, %s9680_s26 }
 0x149   : > { %p7701_p1 = scmp.ne.s32.totalorder %s8627_s27, %s7700_s15  ;;  %p7707_p7 = scmp.lt.u32.totalorder %s7705_s0, %s7700_s15 }
 0x14a   : > { %p7709_p11 = scmp.lt.u32.totalorder %s7700_s15, %s8627_s27 }
 0x14b   : > { %p7703_p0 = pnand %p8640_p13, %p7701_p1  ;;  %p7708_p10 = por %p7707_p7, %p7706_p5 }
 0x14d   : > { %p7704_p2 = pneg %p7703_p0  ;;  %p7710_p12 = por %p7709_p11, %p7708_p10 }
 0x14f   : > { %p7711_p4 = pnand %p7710_p12, %p7704_p2 }
 0x151   : > { %7714 = shalt.err (!%p7711_p4)
}
 0x152   : > { %s7715_s12 = scalar_lea.vmem %s8630_s22, 128  ;;  %s8167_s14 = smov [#allocation5]  }
 0x153   : > { %p7716_p1 = scmp.ne.s32.totalorder %s8630_s22, %s7715_s12  ;;  %s7720_s7 = sshll.u32 %s8167_s14, 4  ;;  %s7721_s7 = int_to_ptr.vmem [resolvable:$false] %s7720_s7 }
 0x154   : > { %s7722_s19 = scalar_lea.vmem %s7721_s7, 256  ;;  %p7723_p6 = scmp.lt.s32.totalorder %s8630_s22, %s7721_s7 }
 0x155   : > { %p7718_p0 = pnand %p7716_p1, %p8640_p13  ;;  %p7724_p8 = scmp.lt.s32.totalorder %s7722_s19, %s7715_s12 }
 0x157   : > { %p7719_p9 = pneg %p7718_p0  ;;  %p7725_p5 = por %p7724_p8, %p7723_p6 }
 0x159   : > { %p7726_p7 = pnand %p7725_p5, %p7719_p9 }
 0x15b   : > { %7729 = shalt.err (!%p7726_p7)
}
 0x15c   : > { %7253 = dma.hbm_to_vmem [thread:$0]  (!%p8618_p3), %s8627_s27, 128, %s8630_s22, %s8634_s6  }
 0x15d   : > { %s8168_s15 = smov [#allocation13]   ;;  %s8169_s0 = smov [#allocation16]  }
 0x15e   : > { %s738_s21 = sshll.u32 %s8168_s15, 4  ;;  %s764_s24 = sshll.u32 %s8169_s0, 4  ;;  %s739_s21 = int_to_ptr.vmem [resolvable:$true] %s738_s21  ;;  %s8664_s24 = int_to_ptr.vmem [resolvable:$true] %s764_s24 }
 0x15f   : > { %s9682_s12 = sld [smem:[#allocation61_spill]]  ;;  %p9683_p8 = scmp.ne.s32.totalorder %s9663_s11, 0 }
 0x165   : > { %s7730_s19 = scalar_lea.hbm %s9682_s12, 32 }
 0x166   : > { %p7731_p6 = scmp.ne.s32.totalorder %s9682_s12, %s7730_s19  ;;  %p7737_p12 = scmp.lt.u32.totalorder %s7730_s19, %s9682_s12 }
 0x168   : > { %p7733_p9 = pnand %p7731_p6, %p9683_p8 }
 0x16a   : > { %p7734_p4 = pneg %p7733_p9 }
 0x16c   : > { %p7739_p2 = pnand %p7737_p12, %p7734_p4 }
 0x16e   : > { %7742 = shalt.err (!%p7739_p2)
}
 0x16f   : > { %s7743_s22 = scalar_lea.vmem %s739_s21, 32  ;;  %p7751_p0 = scmp.lt.s32.totalorder %s739_s21, %s739_s21 }
 0x170   : > { %p7744_p10 = scmp.ne.s32.totalorder %s739_s21, %s7743_s22  ;;  %p7752_p5 = scmp.lt.s32.totalorder %s7743_s22, %s7743_s22 }
 0x172   : > { %p7746_p11 = pnand %p7744_p10, %p9683_p8  ;;  %p7753_p7 = por %p7752_p5, %p7751_p0 }
 0x174   : > { %p7747_p1 = pneg %p7746_p11 }
 0x176   : > { %p7754_p3 = pnand %p7753_p7, %p7747_p1 }
 0x178   : > { %7757 = shalt.err (!%p7754_p3)
}
 0x179   : > { %p9684_p6 = scmp.ne.s32.totalorder %s9661_s2, 0  ;;  %s9685_s28 = smov 1  }
 0x17a   : > { %s9686_s26 = smov 16   ;;  %s9687_s7 = sld [smem:[#allocation63_spill]] }
 0x17b   : > { %7204 = dma.hbm_to_vmem [thread:$0]  (!%p9684_p6), %s9682_s12, 32, %s739_s21, [#allocation12], %s9686_s26, %s9686_s26, %s9685_s28  }
 0x180   : > { %s7758_s19 = scalar_lea.hbm %s9687_s7, 32 }
 0x181   : > { %p7759_p9 = scmp.ne.s32.totalorder %s9687_s7, %s7758_s19  ;;  %p7765_p12 = scmp.lt.u32.totalorder %s7758_s19, %s9687_s7 }
 0x183   : > { %p7761_p3 = pnand %p7759_p9, %p9683_p8 }
 0x185   : > { %p7762_p4 = pneg %p7761_p3 }
 0x187   : > { %p7767_p2 = pnand %p7765_p12, %p7762_p4 }
 0x189   : > { %7770 = shalt.err (!%p7767_p2)
}
 0x18a   : > { %s7771_s21 = scalar_lea.vmem %s8664_s24, 32  ;;  %p7779_p0 = scmp.lt.s32.totalorder %s8664_s24, %s8664_s24 }
 0x18b   : > { %p7772_p10 = scmp.ne.s32.totalorder %s8664_s24, %s7771_s21  ;;  %p7780_p5 = scmp.lt.s32.totalorder %s7771_s21, %s7771_s21 }
 0x18d   : > { %p7774_p11 = pnand %p7772_p10, %p9683_p8  ;;  %p7781_p7 = por %p7780_p5, %p7779_p0 }
 0x18f   : > { %p7775_p1 = pneg %p7774_p11 }
 0x191   : > { %p7782_p9 = pnand %p7781_p7, %p7775_p1 }
 0x193   : > { %7785 = shalt.err (!%p7782_p9)
}
 0x194   : > { %7210 = dma.hbm_to_vmem [thread:$0]  (!%p9684_p6), %s9687_s7, 32, %s8664_s24, [#allocation15], %s9686_s26, %s9686_s26, %s9685_s28  }
 0x195   : > { %s8170_s29 = smov [#allocation19]   ;;  %s8171_s0 = smov [#allocation22]  }
 0x196   : > { %s796_s15 = sshll.u32 %s8170_s29, 4  ;;  %s825_s14 = sshll.u32 %s8171_s0, 4  ;;  %s797_s15 = int_to_ptr.vmem [resolvable:$true] %s796_s15  ;;  %s8713_s14 = int_to_ptr.vmem [resolvable:$true] %s825_s14 }
 0x197   : > { %s9688_s13 = sld [smem:[#allocation67_spill]] }
 0x19d   : > { %s7786_s22 = scalar_lea.hbm %s9688_s13, 32 }
 0x19e   : > { %p7787_p3 = scmp.ne.s32.totalorder %s9688_s13, %s7786_s22  ;;  %p7793_p2 = scmp.lt.u32.totalorder %s7786_s22, %s9688_s13 }
 0x1a0   : > { %p7789_p4 = pnand %p7787_p3, %p9683_p8 }
 0x1a2   : > { %p7790_p12 = pneg %p7789_p4 }
 0x1a4   : > { %p7795_p10 = pnand %p7793_p2, %p7790_p12 }
 0x1a6   : > { %7798 = shalt.err (!%p7795_p10)
}
 0x1a7   : > { %s7799_s4 = scalar_lea.vmem %s797_s15, 32  ;;  %p7807_p5 = scmp.lt.s32.totalorder %s797_s15, %s797_s15 }
 0x1a8   : > { %p7800_p11 = scmp.ne.s32.totalorder %s797_s15, %s7799_s4  ;;  %p7808_p7 = scmp.lt.s32.totalorder %s7799_s4, %s7799_s4 }
 0x1aa   : > { %p7802_p1 = pnand %p7800_p11, %p9683_p8  ;;  %p7809_p9 = por %p7808_p7, %p7807_p5 }
 0x1ac   : > { %p7803_p0 = pneg %p7802_p1 }
 0x1ae   : > { %p7810_p13 = pnand %p7809_p9, %p7803_p0 }
 0x1b0   : > { %7813 = shalt.err (!%p7810_p13)
}
 0x1b1   : > { %7216 = dma.hbm_to_vmem [thread:$0]  (!%p9684_p6), %s9688_s13, 32, %s797_s15, [#allocation18], %s9686_s26, %s9686_s26, %s9685_s28  }
 0x1b2   : > { %s9689_s16 = sld [smem:[#allocation70_spill]] }
 0x1b8   : > { %s7814_s27 = scalar_lea.hbm %s9689_s16, 512 }
 0x1b9   : > { %p7815_p3 = scmp.ne.s32.totalorder %s9689_s16, %s7814_s27  ;;  %p7821_p12 = scmp.lt.u32.totalorder %s7814_s27, %s9689_s16 }
 0x1bb   : > { %p7817_p13 = pnand %p7815_p3, %p9683_p8 }
 0x1bd   : > { %p7818_p4 = pneg %p7817_p13 }
 0x1bf   : > { %p7823_p2 = pnand %p7821_p12, %p7818_p4 }
 0x1c1   : > { %7826 = shalt.err (!%p7823_p2)
}
 0x1c2   : > { %s7827_s15 = scalar_lea.vmem %s8713_s14, 512  ;;  %p7835_p0 = scmp.lt.s32.totalorder %s8713_s14, %s8713_s14 }
 0x1c3   : > { %p7828_p10 = scmp.ne.s32.totalorder %s8713_s14, %s7827_s15  ;;  %p7836_p5 = scmp.lt.s32.totalorder %s7827_s15, %s7827_s15 }
 0x1c5   : > { %p7830_p11 = pnand %p7828_p10, %p9683_p8  ;;  %p7837_p7 = por %p7836_p5, %p7835_p0 }
 0x1c7   : > { %p7831_p1 = pneg %p7830_p11 }
 0x1c9   : > { %p7838_p9 = pnand %p7837_p7, %p7831_p1 }
 0x1cb   : > { %7841 = shalt.err (!%p7838_p9)
}
 0x1cc   : > { %s8172_s4 = smov 128   ;;  %s8173_s12 = smov 8  }
 0x1cd   : > { %7222 = dma.hbm_to_vmem [thread:$0]  (!%p9684_p6), %s9689_s16, 512, %s8713_s14, [#allocation21], %s8172_s4, %s8172_s4, %s8173_s12  }
 0x1ce   : > { %s8174_s19 = smov [#allocation25]   ;;  %s8175_s22 = smov [#allocation28]  }
 0x1cf   : > { %s849_s27 = sshll.u32 %s8174_s19, 4  ;;  %s875_s21 = sshll.u32 %s8175_s22, 4  ;;  %s850_s27 = int_to_ptr.vmem [resolvable:$true] %s849_s27  ;;  %s8762_s21 = int_to_ptr.vmem [resolvable:$true] %s875_s21 }
 0x1d0   : > { %s9690_s15 = sld [smem:[#allocation72_spill]] }
 0x1d6   : > { %s7842_s7 = scalar_lea.hbm %s9690_s15, 1024 }
 0x1d7   : > { %p7843_p3 = scmp.ne.s32.totalorder %s9690_s15, %s7842_s7  ;;  %p7849_p12 = scmp.lt.u32.totalorder %s7842_s7, %s9690_s15 }
 0x1d9   : > { %p7845_p13 = pnand %p7843_p3, %p9683_p8 }
 0x1db   : > { %p7846_p4 = pneg %p7845_p13 }
 0x1dd   : > { %p7851_p2 = pnand %p7849_p12, %p7846_p4 }
 0x1df   : > { %7854 = shalt.err (!%p7851_p2)
}
 0x1e0   : > { %s7855_s0 = scalar_lea.vmem %s850_s27, 1024  ;;  %p7863_p0 = scmp.lt.s32.totalorder %s850_s27, %s850_s27 }
 0x1e1   : > { %p7856_p10 = scmp.ne.s32.totalorder %s850_s27, %s7855_s0  ;;  %p7864_p5 = scmp.lt.s32.totalorder %s7855_s0, %s7855_s0 }
 0x1e3   : > { %p7858_p11 = pnand %p7856_p10, %p9683_p8  ;;  %p7865_p7 = por %p7864_p5, %p7863_p0 }
 0x1e5   : > { %p7859_p1 = pneg %p7858_p11 }
 0x1e7   : > { %p7866_p9 = pnand %p7865_p7, %p7859_p1 }
 0x1e9   : > { %7869 = shalt.err (!%p7866_p9)
}
 0x1ea   : > { %7228 = dma.hbm_to_vmem [thread:$0]  (!%p9684_p6), %s9690_s15, 1024, %s850_s27, [#allocation24], %s8172_s4, %s8172_s4, %s8173_s12  }
 0x1eb   : > { %s9691_s22 = sld [smem:[#allocation74_spill]] }
 0x1f1   : > { %s7870_s25 = scalar_lea.hbm %s9691_s22, 1024 }
 0x1f2   : > { %p7871_p3 = scmp.ne.s32.totalorder %s9691_s22, %s7870_s25  ;;  %p7877_p12 = scmp.lt.u32.totalorder %s7870_s25, %s9691_s22 }
 0x1f4   : > { %p7873_p13 = pnand %p7871_p3, %p9683_p8 }
 0x1f6   : > { %p7874_p4 = pneg %p7873_p13 }
 0x1f8   : > { %p7879_p2 = pnand %p7877_p12, %p7874_p4 }
 0x1fa   : > { %7882 = shalt.err (!%p7879_p2)
}
 0x1fb   : > { %s7883_s27 = scalar_lea.vmem %s8762_s21, 1024  ;;  %p7891_p0 = scmp.lt.s32.totalorder %s8762_s21, %s8762_s21 }
 0x1fc   : > { %p7884_p10 = scmp.ne.s32.totalorder %s8762_s21, %s7883_s27  ;;  %p7892_p5 = scmp.lt.s32.totalorder %s7883_s27, %s7883_s27 }
 0x1fe   : > { %p7886_p11 = pnand %p7884_p10, %p9683_p8  ;;  %p7893_p7 = por %p7892_p5, %p7891_p0 }
 0x200   : > { %p7887_p1 = pneg %p7886_p11 }
 0x202   : > { %p7894_p9 = pnand %p7893_p7, %p7887_p1 }
 0x204   : > { %7897 = shalt.err (!%p7894_p9)
}
 0x205   : > { %7234 = dma.hbm_to_vmem [thread:$0]  (!%p9684_p6), %s9691_s22, 1024, %s8762_s21, [#allocation27], %s8172_s4, %s8172_s4, %s8173_s12  }
 0x206   : > { %s8176_s7 = smov [#allocation31]   ;;  %s8177_s25 = smov [#allocation34]  }
 0x207   : > { %s904_s19 = sshll.u32 %s8176_s7, 4  ;;  %s929_s24 = sshll.u32 %s8177_s25, 4  ;;  %s905_s19 = int_to_ptr.vmem [resolvable:$true] %s904_s19  ;;  %s8811_s24 = int_to_ptr.vmem [resolvable:$true] %s929_s24 }
 0x208   : > { %s9692_s0 = sld [smem:[#allocation77_spill]] }
 0x20e   : > { %s7898_s27 = scalar_lea.hbm %s9692_s0, 32 }
 0x20f   : > { %p7899_p3 = scmp.ne.s32.totalorder %s9692_s0, %s7898_s27  ;;  %p7905_p12 = scmp.lt.u32.totalorder %s7898_s27, %s9692_s0 }
 0x211   : > { %p7901_p13 = pnand %p7899_p3, %p9683_p8 }
 0x213   : > { %p7902_p4 = pneg %p7901_p13 }
 0x215   : > { %p7907_p2 = pnand %p7905_p12, %p7902_p4 }
 0x217   : > { %7910 = shalt.err (!%p7907_p2)
}
 0x218   : > { %s7911_s12 = scalar_lea.vmem %s905_s19, 32  ;;  %p7919_p0 = scmp.lt.s32.totalorder %s905_s19, %s905_s19 }
 0x219   : > { %p7912_p10 = scmp.ne.s32.totalorder %s905_s19, %s7911_s12  ;;  %p7920_p5 = scmp.lt.s32.totalorder %s7911_s12, %s7911_s12 }
 0x21b   : > { %p7914_p11 = pnand %p7912_p10, %p9683_p8  ;;  %p7921_p7 = por %p7920_p5, %p7919_p0 }
 0x21d   : > { %p7915_p1 = pneg %p7914_p11 }
 0x21f   : > { %p7922_p9 = pnand %p7921_p7, %p7915_p1 }
 0x221   : > { %7925 = shalt.err (!%p7922_p9)
}
 0x222   : > { %7240 = dma.hbm_to_vmem [thread:$0]  (!%p9684_p6), %s9692_s0, 32, %s905_s19, [#allocation30], %s9686_s26, %s9686_s26, %s9685_s28  }
 0x223   : > { %s9693_s7 = sld [smem:[#allocation79_spill]] }
 0x229   : > { %s7926_s25 = scalar_lea.hbm %s9693_s7, 16 }
 0x22a   : > { %p7927_p3 = scmp.ne.s32.totalorder %s9693_s7, %s7926_s25  ;;  %p7933_p12 = scmp.lt.u32.totalorder %s7926_s25, %s9693_s7 }
 0x22c   : > { %p7929_p13 = pnand %p7927_p3, %p9683_p8 }
 0x22e   : > { %p7930_p4 = pneg %p7929_p13 }
 0x230   : > { %p7935_p2 = pnand %p7933_p12, %p7930_p4 }
 0x232   : > { %7938 = shalt.err (!%p7935_p2)
}
 0x233   : > { %s7939_s28 = scalar_lea.vmem %s8811_s24, 16  ;;  %s7946_s26 = scalar_lea.vmem %s8811_s24, 32 }
 0x234   : > { %p7940_p10 = scmp.ne.s32.totalorder %s8811_s24, %s7939_s28  ;;  %p7947_p0 = scmp.lt.s32.totalorder %s8811_s24, %s8811_s24 }
 0x235   : > { %p7948_p5 = scmp.lt.s32.totalorder %s7946_s26, %s7939_s28 }
 0x236   : > { %p7942_p11 = pnand %p7940_p10, %p9683_p8 }
 0x237   : > { %p7949_p7 = por %p7948_p5, %p7947_p0 }
 0x238   : > { %p7943_p1 = pneg %p7942_p11 }
 0x23a   : > { %p7950_p9 = pnand %p7949_p7, %p7943_p1 }
 0x23c   : > { %7953 = shalt.err (!%p7950_p9)
}
 0x23d   : > { %7246 = dma.hbm_to_vmem [thread:$0]  (!%p9684_p6), %s9693_s7, 16, %s8811_s24, [#allocation33]  }
 0x23e   : > { %s9694_s16 = sld [smem:[#allocation54_spill]]  ;;  %s950_s15 = scalar_lea.vmem [#allocation2], %s8613_s18 }
 0x23f   : > { %s957_s2 = sshll.u32 %s950_s15, 4  ;;  %s9695_s8 = sand.u32 1, %s8150_s9   ;;  %s958_s2 = int_to_ptr.vmem [resolvable:$true] %s957_s2 }
 0x240   : > { %s947_s25 = scalar_lea.sflag [#allocation3], %s9695_s8  ;;  %p9696_p3 = scmp.ne.s32.totalorder %s9681_s17, 0 }
 0x244   : > { %s8862_s21 = scalar_lea.hbm %s9694_s16, %s8616_s3  ;;  %s7959_s27 = scalar_lea.hbm %s9694_s16, 256 }
 0x245   : > { %s7954_s29 = scalar_lea.hbm %s8862_s21, 128  ;;  %p7960_p6 = scmp.lt.u32.totalorder %s8862_s21, %s9694_s16 }
 0x246   : > { %p7955_p8 = scmp.ne.s32.totalorder %s8862_s21, %s7954_s29  ;;  %p7961_p12 = scmp.lt.u32.totalorder %s7959_s27, %s7954_s29 }
 0x247   : > { %p7963_p10 = scmp.lt.u32.totalorder %s7954_s29, %s8862_s21 }
 0x248   : > { %p7957_p13 = pnand %p7955_p8, %p9696_p3  ;;  %p7962_p2 = por %p7961_p12, %p7960_p6 }
 0x24a   : > { %p7958_p4 = pneg %p7957_p13  ;;  %p7964_p11 = por %p7963_p10, %p7962_p2 }
 0x24c   : > { %p7965_p1 = pnand %p7964_p11, %p7958_p4 }
 0x24e   : > { %7968 = shalt.err (!%p7965_p1)
}
 0x24f   : > { %s7969_s26 = scalar_lea.vmem %s958_s2, 128  ;;  %s8178_s19 = smov [#allocation2]  }
 0x250   : > { %p7970_p0 = scmp.ne.s32.totalorder %s958_s2, %s7969_s26  ;;  %s7974_s4 = sshll.u32 %s8178_s19, 4  ;;  %s7975_s4 = int_to_ptr.vmem [resolvable:$false] %s7974_s4 }
 0x251   : > { %s7976_s11 = scalar_lea.vmem %s7975_s4, 256  ;;  %p7977_p9 = scmp.lt.s32.totalorder %s958_s2, %s7975_s4 }
 0x252   : > { %p7972_p5 = pnand %p7970_p0, %p9696_p3  ;;  %p7978_p8 = scmp.lt.s32.totalorder %s7976_s11, %s7969_s26 }
 0x254   : > { %p7973_p7 = pneg %p7972_p5  ;;  %p7979_p13 = por %p7978_p8, %p7977_p9 }
 0x256   : > { %p7980_p6 = pnand %p7979_p13, %p7973_p7 }
 0x258   : > { %7983 = shalt.err (!%p7980_p6)
}
 0x259   : > { %p9697_p12 = scmp.ne.s32.totalorder %s9679_s23, 0  ;;  %s9698_s8 = sld [smem:[#allocation56_spill]] }
 0x25a   : > { %s986_s14 = scalar_lea.vmem [#allocation7], %s8613_s18 }
 0x25b   : > { %7250 = dma.hbm_to_vmem [thread:$0]  (!%p9697_p12), %s8862_s21, 128, %s958_s2, %s947_s25  }
 0x25c   : > { %s993_s27 = sshll.u32 %s986_s14, 4  ;;  %s994_s27 = int_to_ptr.vmem [resolvable:$true] %s993_s27 }
 0x25f   : > { %s9699_s29 = smov %s9698_s8  ;;  %s8888_s24 = scalar_lea.hbm %s9698_s8, %s8616_s3 }
 0x260   : > { %s7984_s13 = scalar_lea.hbm %s8888_s24, 128  ;;  %s7989_s21 = scalar_lea.hbm %s9699_s29, 256 }
 0x261   : > { %p7985_p4 = scmp.ne.s32.totalorder %s8888_s24, %s7984_s13  ;;  %p7990_p11 = scmp.lt.u32.totalorder %s8888_s24, %s9699_s29 }
 0x262   : > { %p7991_p1 = scmp.lt.u32.totalorder %s7989_s21, %s7984_s13  ;;  %p7993_p5 = scmp.lt.u32.totalorder %s7984_s13, %s8888_s24 }
 0x263   : > { %p7987_p2 = pnand %p7985_p4, %p9696_p3 }
 0x264   : > { %p7992_p0 = por %p7991_p1, %p7990_p11 }
 0x265   : > { %p7988_p10 = pneg %p7987_p2 }
 0x266   : > { %p7994_p7 = por %p7993_p5, %p7992_p0 }
 0x268   : > { %p7995_p9 = pnand %p7994_p7, %p7988_p10 }
 0x26a   : > { %7998 = shalt.err (!%p7995_p9)
}
 0x26b   : > { %s7999_s19 = scalar_lea.vmem %s994_s27, 128  ;;  %s8179_s4 = smov [#allocation7]  }
 0x26c   : > { %p8000_p8 = scmp.ne.s32.totalorder %s994_s27, %s7999_s19  ;;  %s8004_s11 = sshll.u32 %s8179_s4, 4  ;;  %s8005_s11 = int_to_ptr.vmem [resolvable:$false] %s8004_s11 }
 0x26d   : > { %s8006_s12 = scalar_lea.vmem %s8005_s11, 256  ;;  %p8007_p4 = scmp.lt.s32.totalorder %s994_s27, %s8005_s11 }
 0x26e   : > { %p8002_p13 = pnand %p8000_p8, %p9696_p3  ;;  %p8008_p2 = scmp.lt.s32.totalorder %s8006_s12, %s7999_s19 }
 0x270   : > { %p8003_p6 = pneg %p8002_p13  ;;  %p8009_p12 = por %p8008_p2, %p8007_p4 }
 0x272   : > { %p8010_p1 = pnand %p8009_p12, %p8003_p6 }
 0x274   : > { %8013 = shalt.err (!%p8010_p1)
}
 0x275   : > { %p9700_p11 = scmp.ne.s32.totalorder %s9679_s23, 0  ;;  %s9701_s14 = sld [smem:[#allocation57_spill]] }
 0x276   : > { %s1004_s28 = scalar_lea.vmem [#allocation8], %s8613_s18  ;;  %s9702_s21 = sand.u32 1, %s8154_s30  }
 0x277   : > { %7256 = dma.hbm_to_vmem [thread:$0]  (!%p9700_p11), %s8888_s24, 128, %s994_s27, %s8634_s6  }
 0x278   : > { %s1011_s26 = sshll.u32 %s1004_s28, 4  ;;  %s1001_s2 = scalar_lea.sflag [#allocation9], %s9702_s21  ;;  %s1012_s26 = int_to_ptr.vmem [resolvable:$true] %s1011_s26 }
 0x27b   : > { %s8913_s13 = scalar_lea.hbm %s9701_s14, %s8616_s3  ;;  %s8019_s27 = scalar_lea.hbm %s9701_s14, 256 }
 0x27c   : > { %s8014_s25 = scalar_lea.hbm %s8913_s13, 128  ;;  %p8020_p5 = scmp.lt.u32.totalorder %s8913_s13, %s9701_s14 }
 0x27d   : > { %p8015_p12 = scmp.ne.s32.totalorder %s8913_s13, %s8014_s25  ;;  %p8021_p7 = scmp.lt.u32.totalorder %s8019_s27, %s8014_s25 }
 0x27e   : > { %p8023_p8 = scmp.lt.u32.totalorder %s8014_s25, %s8913_s13 }
 0x27f   : > { %p8017_p10 = pnand %p8015_p12, %p9696_p3  ;;  %p8022_p9 = por %p8021_p7, %p8020_p5 }
 0x281   : > { %p8018_p0 = pneg %p8017_p10  ;;  %p8024_p13 = por %p8023_p8, %p8022_p9 }
 0x283   : > { %p8025_p6 = pnand %p8024_p13, %p8018_p0 }
 0x285   : > { %8028 = shalt.err (!%p8025_p6)
}
 0x286   : > { %s8029_s18 = scalar_lea.vmem %s1012_s26, 128  ;;  %s8180_s4 = smov [#allocation8]  }
 0x287   : > { %p8030_p4 = scmp.ne.s32.totalorder %s1012_s26, %s8029_s18  ;;  %s8034_s11 = sshll.u32 %s8180_s4, 4  ;;  %s8035_s11 = int_to_ptr.vmem [resolvable:$false] %s8034_s11 }
 0x288   : > { %s8036_s12 = scalar_lea.vmem %s8035_s11, 256  ;;  %p8037_p12 = scmp.lt.s32.totalorder %s1012_s26, %s8035_s11 }
 0x289   : > { %p8032_p2 = pnand %p8030_p4, %p9696_p3  ;;  %p8038_p10 = scmp.lt.s32.totalorder %s8036_s12, %s8029_s18 }
 0x28b   : > { %p8033_p1 = pneg %p8032_p2  ;;  %p8039_p11 = por %p8038_p10, %p8037_p12 }
 0x28d   : > { %p8040_p5 = pnand %p8039_p11, %p8033_p1 }
 0x28f   : > { %8043 = shalt.err (!%p8040_p5)
}
 0x290   : > { %p9703_p7 = scmp.ne.s32.totalorder %s9679_s23, 0  ;;  %s9704_s15 = sld [smem:[#allocation50_spill]] }
 0x292   : > { %7259 = dma.hbm_to_vmem [thread:$0]  (!%p9703_p7), %s8913_s13, 128, %s1012_s26, %s1001_s2  }
 0x296   : > { %p9705_p0 = scmp.ne.s32.totalorder %s9704_s15, 0 }
 0x297   : > { %s8938_s17 = sand.u32 (!%p9705_p0), 1, %s8146_s5   ;;  %p9706_p3 = scmp.ne.s32.totalorder (!%p9705_p0), %s9675_s1, 0 }
 0x298   : > { %1020 = sbr.rel (%p9705_p0) target bundleno = 10327 (0x2857), region = 132  ;;  %s8941_s8 = sshll.u32 (!%p9705_p0), %s8938_s17, 3 }
 0x299   : > { %s1023_s28 = scalar_lea.sflag (!%p9705_p0), [#allocation3], %s8938_s17  ;;  %s1026_s21 = scalar_lea.vmem (!%p9705_p0), [#allocation2], %s8941_s8 }
 0x29f   : > { %8089 = dma.done.wait (%p9706_p3), %s1023_s28, 128  }
 0x2a0   : > { %8091 = vsyncadd (%p9706_p3), %s1023_s28, 4294967168  ;;  %s1031_s23 = sand.u32 1, %s8351_s10   ;;  %s1035_s26 = scalar_lea.vmem [#allocation5], %s8941_s8 }
 0x2a1   : > { %s1032_s13 = scalar_lea.sflag [#allocation6], %s1031_s23 }
 0x2a2   : > { %8093 = dma.done.wait (%p9706_p3), %s1032_s13, 256  }
 0x2a3   : > { %8095 = vsyncadd (%p9706_p3), %s1032_s13, 4294967040  ;;  %s1044_s2 = scalar_lea.vmem [#allocation7], %s8941_s8  ;;  %s1050_s25 = scalar_lea.sflag [#allocation9], %s1031_s23 }
 0x2a4   : > { %s1053_s6 = scalar_lea.vmem [#allocation8], %s8941_s8 }
 0x2a5   : > { %8097 = dma.done.wait (%p9706_p3), %s1050_s25, 128  }
 0x2a6   : > { %8099 = vsyncadd (%p9706_p3), %s1050_s25, 4294967168  ;;  %p9707_p11 = scmp.eq.s32.totalorder %s8351_s10, 0 }
 0x2a8   : > { %8101 = dma.done.wait (%p9707_p11), [#allocation9], 32   ;;  %p9708_p9 = pmov %p9707_p11 }
 0x2aa   : > { %8103 = vsyncadd (%p9708_p9), [#allocation9], 4294967264  ;;  %p9709_p8 = pmov %p9708_p9 }
 0x2ac   : > { %8105 = dma.done.wait (%p9709_p8), [#allocation12], 64   ;;  %p9710_p13 = pmov %p9709_p8 }
 0x2ad   : > { %p9711_p6 = pmov %p9709_p8 }
 0x2ae   : > { %8107 = vsyncadd (%p9710_p13), [#allocation12], 4294967232 }
 0x2af   : > { %8109 = dma.done.wait (%p9711_p6), [#allocation15], 64   ;;  %p9712_p4 = pmov %p9711_p6 }
 0x2b1   : > { %8111 = vsyncadd (%p9712_p4), [#allocation15], 4294967232  ;;  %p9713_p2 = pmov %p9712_p4 }
 0x2b3   : > { %8113 = dma.done.wait (%p9713_p2), [#allocation18], 64   ;;  %p9714_p1 = pmov %p9713_p2 }
 0x2b5   : > { %8115 = vsyncadd (%p9714_p1), [#allocation18], 4294967232  ;;  %p9715_p12 = pmov %p9714_p1 }
 0x2b6   : > { %p9716_p10 = pmov %p9714_p1 }
 0x2b7   : > { %8117 = dma.done.wait (%p9715_p12), [#allocation21], 544  }
 0x2b8   : > { %8119 = vsyncadd (%p9716_p10), [#allocation21], 4294966752  ;;  %p9717_p5 = pmov %p9714_p1 }
 0x2b9   : > { %p9718_p7 = pmov %p9714_p1 }
 0x2ba   : > { %8121 = dma.done.wait (%p9717_p5), [#allocation24], 1040  }
 0x2bb   : > { %8123 = vsyncadd (%p9718_p7), [#allocation24], 4294966256  ;;  %p9719_p0 = pmov %p9714_p1 }
 0x2bd   : > { %8125 = dma.done.wait (%p9719_p0), [#allocation27], 1056   ;;  %p9720_p3 = pmov %p9719_p0 }
 0x2be   : > { %p9721_p11 = pmov %p9719_p0 }
 0x2bf   : > { %8127 = vsyncadd (%p9720_p3), [#allocation27], 4294966240 }
 0x2c0   : > { %8129 = dma.done.wait (%p9721_p11), [#allocation30], 64   ;;  %p9722_p9 = pmov %p9719_p0 }
 0x2c1   : > { %p9723_p8 = pmov %p9719_p0 }
 0x2c2   : > { %8131 = vsyncadd (%p9722_p9), [#allocation30], 4294967232 }
 0x2c3   : > { %8133 = dma.done.wait (%p9723_p8), [#allocation33], 32   ;;  %p9724_p13 = pmov %p9719_p0 }
 0x2c4   : > { %vm1224_vm0 = vcmask 261120   ;;  %v1209_v0 = vld [vmem:[%s1026_s21] sm:$0xff]  ;;  %s9725_s27 = sld [smem:[#allocation64_spill]]  ;;  %v8181_v10 = vmov 0.0|0.0   ;;  %vm8182_vm1 = vmmov 0   ;;  %v8183_v13 = vmov 0.0  }
 0x2c5   : > { %8135 = vsyncadd (%p9724_p13), [#allocation33], 4294967264  ;;  %v1332_v1 = vsel %vm1224_vm0, %v1209_v0, 0.0  ;;  %7027 = vmatprep.subr.bf16.mxu1 %v8181_v10  ;;  %6710 = vmatprep.mubr.msk.f32.mxu1 %vm8182_vm1, %v8183_v13  ;;  %s9726_s21 = sld [smem:[#allocation58_spill]]  ;;  %v6437_v26 = vld [vmem:[#allocation10] ss:$0 sm:$0xff] }
 0x2c6   : > { %1333 = vadd.xlane.f32.xlu0 %v1332_v1  ;;  %7021 = vmatprep.subr.bf16.mxu0 %v8181_v10  ;;  %v6438_v29 = vld [vmem:[#allocation17] ss:$0 sm:$0xff]  ;;  %v1213_v33 = vld [vmem:[#allocation22] sm:$0xff]  ;;  %v1214_v34 = vld [vmem:[#allocation22 + $0x8] sm:$0xff]  ;;  %vm1611_vm4 = vcmask 64512   ;;  %s9728_s11 = sld [smem:[#allocation68_spill]] }
 0x2c7   : > { %6699 = vmatprep.mubr.msk.f32.mxu0 %vm8182_vm1, %v8183_v13  ;;  %v7022_v35 = vpack.c.bf16 %v1214_v34, %v1213_v33  ;;  %v1215_v36 = vld [vmem:[#allocation22 + $0x10] sm:$0xff]  ;;  %v1216_v37 = vld [vmem:[#allocation22 + $0x18] sm:$0xff]  ;;  %v1210_v58 = vld [vmem:[%s1035_s26] sm:$0xff]  ;;  %s9727_s26 = sld [smem:[#allocation66_spill]]  ;;  %s9729_s1 = sld [smem:[#allocation76_spill]]  ;;  %vm3559_vm9 = vcmask 523264  }
 0x2c8   : > { %v7025_v38 = vpack.c.bf16 %v1216_v37, %v1215_v36  ;;  %v1211_v39 = vld [vmem:[%s1044_s2] sm:$0xff]  ;;  %v9062_v59 = vmul.f32 -1e+30, %v1210_v58  ;;  %s9730_s15 = sld [smem:[#allocation80_spill]]  ;;  %s9731_s19 = sld [smem:[#allocation81_spill]] }
 0x2c9   : > { %7023 = vmatpush3.bf16.msra.mxu0 %v7022_v35  ;;  %s6546_s18 = sshll.u32 %s8351_s10, 7  ;;  %s1208_s4 = scalar_lea.vmem [#allocation35], %s8941_s8 }
 0x2ca   : > { %v1367_v7 = vld [vmem:[%s9725_s27] sm:$0xff]  ;;  %v1368_v8 = vld [vmem:[%s9725_s27 + $0x8] sm:$0xff]  ;;  %v1369_v9 = vld [vmem:[%s9725_s27 + $0x10] sm:$0xff]  ;;  %7024 = vmatprep.subr.bf16.mxu0 %v8181_v10  ;;  %s6086_s12 = sshll.u32 %s1208_s4, 4  ;;  %s9732_s13 = sld [smem:[#allocation82_spill]]  ;;  %s9506_s12 = int_to_ptr.vmem [resolvable:$true] %s6086_s12 }
 0x2cb   : > { %v7028_v11 = vpack.c.bf16 %v1368_v8, %v1367_v7  ;;  %v1370_v12 = vld [vmem:[%s9725_s27 + $0x18] sm:$0xff]  ;;  %v6436_v23 = vld [vmem:[%s9726_s21] ss:$0 sm:$0xff]  ;;  %s8044_s25 = scalar_lea.vmem %s9506_s12, 128  ;;  %p9733_p4 = scmp.ne.s32.totalorder %s9676_s20, 0 }
 0x2cc   : > { %v7031_v14 = vpack.c.bf16 %v1370_v12, %v1369_v9  ;;  %p8045_p6 = scmp.ne.s32.totalorder %s9506_s12, %s8044_s25  ;;  %s8184_s10 = smov [#allocation35]  }
 0x2cd   : > { %7029 = vmatpush3.bf16.msra.mxu1 %v7028_v11  ;;  %7026 = vmatpush3.bf16.msra.mxu0 %v7025_v38  ;;  %s8048_s8 = sshll.u32 %s8184_s10, 4  ;;  %s8049_s8 = int_to_ptr.vmem [resolvable:$false] %s8048_s8 }
 0x2ce   : > { %7030 = vmatprep.subr.bf16.mxu1 %v8181_v10  ;;  %6723 = vmatprep.subr.mxu0 %v8183_v13  ;;  %p8046_p2 = pnand %p8045_p6, %p9733_p4  ;;  %s8050_s24 = scalar_lea.vmem %s8049_s8, 256 }
 0x2cf   : > { %p8051_p12 = scmp.lt.s32.totalorder %s9506_s12, %s8049_s8  ;;  %p8052_p10 = scmp.lt.s32.totalorder %s8050_s24, %s8044_s25 }
 0x2d0   : > { %6700 = vmatmul.mubr.msk.f32.vlgmr.msra.gmra.mrb[0].mxu0 %vm1224_vm0, %v1211_v39  ;;  %s9504_s2 = scalar_lea.hbm %s9732_s13, %s6546_s18  ;;  %p8047_p1 = pneg %p8046_p2 }
 0x2d1   : > { %7032 = vmatpush3.bf16.msra.mxu1 %v7031_v14  ;;  %6725 = vmatprep.mubr.msk.f32.mxu0 %vm8182_vm1, %v8183_v13  ;;  %p8053_p5 = por %p8052_p10, %p8051_p12 }
 0x2d2   : > { %6713 = vmatprep.subr.mxu1 %v8183_v13 }
 0x2d3   : > { %p8054_p7 = pnand %p8053_p5, %p8047_p1 }
 0x353   : > { %v1334_v2 = vpop.xlane.xlu0 %1333 }
 0x354   : > { %v1336_v3 = vmul.f32 0.03125, %v1334_v2 }
 0x356   : > { %v1337_v4 = vsub.f32 %v1209_v0, %v1336_v3 }
 0x358   : > { %v1338_v5 = vmul.f32 %v1337_v4, %v1337_v4  ;;  %v1358_v24 = vmul.f32 %v6436_v23, %v1337_v4 }
 0x35a   : > { %v1339_v6 = vsel %vm1224_vm0, %v1338_v5, 0.0 }
 0x35b   : > { %1340 = vadd.xlane.f32.xlu0 %v1339_v6 }
 0x3a3   : > { %v9058_v56 = vpop.f32.mrb[0].mxu0 }
 0x3a4   : > { %v6701_v57 = vpop.f32.mrb[1].mxu0 }
 0x3e8   : > { %v1341_v15 = vpop.xlane.xlu0 %1340 }
 0x3e9   : > { %v1342_v16 = vmul.f32 0.032258064, %v1341_v15 }
 0x3eb   : > { %7356 = vrsqrt.f32 %v1342_v16  ;;  %vm1345_vm2 = vcmp.eq.f32.partialorder %v1342_v16, inf  ;;  %v1348_v19 = vand.u32 2147483648, %v1342_v16  ;;  %vm1347_vm3 = vcmp.eq.f32.partialorder %v1342_v16, 0.0 }
 0x3f5   : > { %v7357_v17 = vpop.eup %7356 }
 0x3f6   : > { %v1344_v18 = vmul.f32 %v7357_v17, %v1342_v16 }
 0x3f8   : > { %v1346_v20 = vsel %vm1345_vm2, %v1342_v16, %v1344_v18 }
 0x3f9   : > { %v1349_v21 = vsel %vm1347_vm3, %v1348_v19, %v1346_v20 }
 0x3fa   : > { %v1350_v22 = vadd.f32 1e-06, %v1349_v21 }
 0x3fc   : > { %7358 = vrcp.f32 %v1350_v22 }
 0x406   : > { %v7359_v25 = vpop.eup %7358 }
 0x407   : > { %v1359_v27 = vmul.f32 %v7359_v25, %v1358_v24 }
 0x409   : > { %v1366_v28 = vadd.f32 %v6437_v26, %v1359_v27 }
 0x40b   : > { %6711 = vmatmul.mubr.msk.f32.vlgmr.msra.gmra.mrb[0].mxu1 %vm1224_vm0, %v1366_v28 }
 0x40c   : > { %6715 = vmatprep.mubr.msk.f32.mxu1 %vm8182_vm1, %v8183_v13 }
 0x4de   : > { %v1447_v30 = vpop.f32.mrb[0].mxu1 }
 0x4df   : > { %v6712_v31 = vpop.f32.mrb[1].mxu1  ;;  %v1448_v32 = vadd.f32 %v6438_v29, %v1447_v30 }
 0x4e1   : > { %1451 = vxpose.xlu1.b32.start.end [1/1] (short) (narrow) %v1448_v32, 96 }
 0x561   : > { %v1467_v40 = vpop.trf.xlu1 }
 0x562   : > { %1483 = vxpose.xlu1.b32.start.end [1/1] (short) (narrow) %v1467_v40, 8 }
 0x565   : > { %v1468_v41 = vpop.trf.xlu1 }
 0x566   : > { %1515 = vxpose.xlu0.b32.start.end [1/1] (short) (narrow) %v1468_v41, 8 }
 0x569   : > { %v1469_v42 = vpop.trf.xlu1 }
 0x56a   : > { %1547 = vxpose.xlu1.b32.start.end [1/1] (short) (narrow) %v1469_v42, 8 }
 0x56d   : > { %v1470_v43 = vpop.trf.xlu1 }
 0x56e   : > { %1579 = vxpose.xlu0.b32.start.end [1/1] (short) (narrow) %v1470_v43, 8 }
 0x571   : > { %v1471_v44 = vpop.trf.xlu1 }
 0x572   : > { %6714 = vmatpush3.msra.mxu1 %v1471_v44 }
 0x573   : > { %6718 = vmatprep.subr.mxu1 %v8183_v13 }
 0x575   : > { %v1472_v45 = vpop.trf.xlu1 }
 0x579   : > { %v1473_v46 = vpop.trf.xlu1 }
 0x57a   : > { %6724 = vmatpush3.msra.mxu0 %v1473_v46 }
 0x57b   : > { %6733 = vmatprep.subr.mxu0 %v8183_v13 }
 0x57d   : > { %v1474_v47 = vpop.trf.xlu1 }
 0x581   : > { %v9036_v48 = vpop.trf.xlu1 }
 0x585   : > { %v9038_v49 = vpop.trf.xlu1 }
 0x589   : > { %v9040_v50 = vpop.trf.xlu1 }
 0x58d   : > { %v9042_v51 = vpop.trf.xlu1 }
 0x5e2   : > { %v1499_v52 = vpop.trf.xlu1 }
 0x5e3   : > { %6716 = vmatmul.mubr.msk.f32.vlgmr.msra.gmra.mrb[2].mxu1 %vm1611_vm4, %v1499_v52 }
 0x5e4   : > { %6719 = vmatpush3.msra.mxu1 %v1472_v45  ;;  %6720 = vmatprep.mubr.msk.f32.mxu1 %vm8182_vm1, %v8183_v13 }
 0x5e5   : > { %6728 = vmatprep.subr.mxu1 %v8183_v13 }
 0x5e6   : > { %v1531_v53 = vpop.trf.xlu0 }
 0x5e7   : > { %6721 = vmatmul.mubr.msk.f32.vlgmr.msra.gmra.mrb[4].mxu1 %vm1611_vm4, %v1531_v53  ;;  %v2295_v53 = vld [vmem:[%s9727_s26 + $0x10] sm:$0xff] }
 0x5e8   : > { %6729 = vmatpush3.msra.mxu1 %v1474_v47  ;;  %6730 = vmatprep.mubr.msk.f32.mxu1 %vm8182_vm1, %v8183_v13 }
 0x5e9   : > { %6738 = vmatprep.subr.mxu1 %v8183_v13 }
 0x5ea   : > { %v1563_v54 = vpop.trf.xlu1 }
 0x5eb   : > { %6726 = vmatmul.mubr.msk.f32.vlgmr.msra.gmra.mrb[2].mxu0 %vm1611_vm4, %v1563_v54 }
 0x5ec   : > { %6735 = vmatprep.mubr.msk.f32.mxu0 %vm8182_vm1, %v8183_v13 }
 0x5ee   : > { %v1595_v55 = vpop.trf.xlu0 }
 0x5ef   : > { %6731 = vmatmul.mubr.msk.f32.vlgmr.msra.gmra.mrb[6].mxu1 %vm1611_vm4, %v1595_v55 }
 0x5f0   : > { %6740 = vmatprep.mubr.msk.f32.mxu1 %vm8182_vm1, %v8183_v13 }
 0x6b6   : > { %v1681_v60 = vpop.f32.mrb[2].mxu1 }
 0x6b7   : > { %v1904_v61 = vmul.f32 0.35355338, %v1681_v60  ;;  %v6717_v62 = vpop.f32.mrb[3].mxu1 }
 0x6b9   : > { %v1909_v63 = vadd.f32 %v9062_v59, %v1904_v61 }
 0x6ba   : > { %v1754_v0 = vpop.f32.mrb[4].mxu1 }
 0x6bb   : > { %v1905_v1 = vmul.f32 0.35355338, %v1754_v0  ;;  %v6722_v2 = vpop.f32.mrb[5].mxu1  ;;  %v1913_v3 = vsel %vm1611_vm4, %v1909_v63, -inf }
 0x6bc   : > { %1914 = vmax.xlane.f32.xlu1 %v1913_v3  ;;  %v6452_v3 = vld [vmem:[#allocation19] ss:$0 sm:$0xff] }
 0x6bd   : > { %v1910_v4 = vadd.f32 %v9062_v59, %v1905_v1 }
 0x6be   : > { %v1827_v5 = vpop.f32.mrb[2].mxu0 }
 0x6bf   : > { %v1906_v6 = vmul.f32 0.35355338, %v1827_v5  ;;  %v6727_v7 = vpop.f32.mrb[3].mxu0  ;;  %v1916_v8 = vsel %vm1611_vm4, %v1910_v4, -inf }
 0x6c0   : > { %1917 = vmax.xlane.f32.xlu0 %v1916_v8 }
 0x6c1   : > { %v1911_v9 = vadd.f32 %v9062_v59, %v1906_v6 }
 0x6c2   : > { %v1900_v11 = vpop.f32.mrb[6].mxu1 }
 0x6c3   : > { %v1907_v12 = vmul.f32 0.35355338, %v1900_v11  ;;  %v6732_v14 = vpop.f32.mrb[7].mxu1  ;;  %v1919_v15 = vsel %vm1611_vm4, %v1911_v9, -inf }
 0x6c4   : > { %1920 = vmax.xlane.f32.xlu1 %v1919_v15  ;;  %v2413_v15 = vld [vmem:[%s9728_s11] sm:$0xff] }
 0x6c5   : > { %v1912_v16 = vadd.f32 %v9062_v59, %v1907_v12 }
 0x6c7   : > { %v1922_v17 = vsel %vm1611_vm4, %v1912_v16, -inf }
 0x6c8   : > { %1923 = vmax.xlane.f32.xlu1 %v1922_v17  ;;  %v2415_v17 = vld [vmem:[%s9728_s11 + $0x10] sm:$0xff] }
 0x749   : > { %v1915_v18 = vpop.xlane.xlu1 %1914 }
 0x74a   : > { %v1925_v19 = vsub.f32 %v1909_v63, %v1915_v18 }
 0x74c   : > { %v1929_v20 = vmul.f32 1.442695, %v1925_v19  ;;  %v2416_v19 = vld [vmem:[%s9728_s11 + $0x18] sm:$0xff] }
 0x74d   : > { %v1918_v21 = vpop.xlane.xlu0 %1917 }
 0x74e   : > { %7360 = vpow2.f32 %v1929_v20  ;;  %v1926_v22 = vsub.f32 %v1910_v4, %v1918_v21  ;;  %v7043_v20 = vpack.c.bf16 %v2416_v19, %v2415_v17 }
 0x750   : > { %v1931_v23 = vmul.f32 1.442695, %v1926_v22 }
 0x751   : > { %v1921_v24 = vpop.xlane.xlu1 %1920 }
 0x752   : > { %7362 = vpow2.f32 %v1931_v23  ;;  %v1927_v25 = vsub.f32 %v1911_v9, %v1921_v24 }
 0x754   : > { %v1933_v26 = vmul.f32 1.442695, %v1927_v25 }
 0x755   : > { %v1924_v27 = vpop.xlane.xlu1 %1923 }
 0x756   : > { %7364 = vpow2.f32 %v1933_v26  ;;  %v1928_v28 = vsub.f32 %v1912_v16, %v1924_v27  ;;  %v2414_v16 = vld [vmem:[%s9728_s11 + $0x8] sm:$0xff] }
 0x757   : > { %v7040_v18 = vpack.c.bf16 %v2414_v16, %v2413_v15 }
 0x758   : > { %v7361_v29 = vpop.eup %7360  ;;  %v1935_v30 = vmul.f32 1.442695, %v1928_v28 }
 0x759   : > { %v1937_v31 = vsel %vm1611_vm4, %v7361_v29, 0.0 }
 0x75a   : > { %7366 = vpow2.f32 %v1935_v30  ;;  %1938 = vadd.xlane.f32.xlu1 %v1937_v31 }
 0x75c   : > { %v7363_v32 = vpop.eup %7362 }
 0x75d   : > { %v1940_v33 = vsel %vm1611_vm4, %v7363_v32, 0.0 }
 0x75e   : > { %1941 = vadd.xlane.f32.xlu0 %v1940_v33 }
 0x760   : > { %v7365_v34 = vpop.eup %7364 }
 0x761   : > { %v1943_v35 = vsel %vm1611_vm4, %v7365_v34, 0.0 }
 0x762   : > { %1944 = vadd.xlane.f32.xlu1 %v1943_v35  ;;  %v6456_v35 = vld [vmem:[#allocation20] ss:$0 sm:$0xff] }
 0x764   : > { %v7367_v36 = vpop.eup %7366 }
 0x765   : > { %v1946_v37 = vsel %vm1611_vm4, %v7367_v36, 0.0 }
 0x766   : > { %1947 = vadd.xlane.f32.xlu0 %v1946_v37 }
 0x7e7   : > { %v1939_v38 = vpop.xlane.xlu1 %1938 }
 0x7e8   : > { %7368 = vrcp.f32 %v1939_v38 }
 0x7eb   : > { %v1942_v39 = vpop.xlane.xlu0 %1941 }
 0x7ec   : > { %7370 = vrcp.f32 %v1942_v39  ;;  %v6434_v39 = vld [vmem:[#allocation23] ss:$0 sm:$0xff] }
 0x7ef   : > { %v1945_v40 = vpop.xlane.xlu1 %1944 }
 0x7f0   : > { %7372 = vrcp.f32 %v1945_v40  ;;  %v1295_v40 = vadd.f32 %v6434_v39, %v9058_v56 }
 0x7f2   : > { %v7369_v41 = vpop.eup %7368 }
 0x7f3   : > { %v1953_v42 = vmul.f32 %v7369_v41, %v7361_v29  ;;  %v1948_v43 = vpop.xlane.xlu0 %1947  ;;  %v6454_v29 = vld [vmem:[#allocation11] ss:$0 sm:$0xff] }
 0x7f4   : > { %7374 = vrcp.f32 %v1948_v43 }
 0x7f5   : > { %6734 = vmatpush3.xpose.msk.msra.mxu0 %vm1611_vm4, %v1953_v42 }
 0x7f6   : > { %v7371_v44 = vpop.eup %7370  ;;  %6743 = vmatprep.subr.mxu0 %v8183_v13 }
 0x7f7   : > { %v1954_v45 = vmul.f32 %v7371_v44, %v7363_v32  ;;  %v6455_v32 = vld [vmem:[#allocation13] ss:$0 sm:$0xff] }
 0x7f8   : > { %6736 = vmatmul.mubr.msk.f32.vlgmr.msra.gmra.mrb[4].mxu0 %vm1611_vm4, %v9036_v48 }
 0x7f9   : > { %6739 = vmatpush3.xpose.msk.msra.mxu1 %vm1611_vm4, %v1954_v45  ;;  %6745 = vmatprep.mubr.msk.f32.mxu0 %vm8182_vm1, %v8183_v13 }
 0x7fa   : > { %v7373_v46 = vpop.eup %7372  ;;  %6748 = vmatprep.subr.mxu1 %v8183_v13 }
 0x7fb   : > { %v1955_v47 = vmul.f32 %v7373_v46, %v7365_v34 }
 0x7fc   : > { %6741 = vmatmul.mubr.msk.f32.vlgmr.msra.gmra.mrb[8].mxu1 %vm1611_vm4, %v9038_v49  ;;  %v2293_v49 = vld [vmem:[%s9727_s26] sm:$0xff] }
 0x7fd   : > { %6744 = vmatpush3.xpose.msk.msra.mxu0 %vm1611_vm4, %v1955_v47  ;;  %6750 = vmatprep.mubr.msk.f32.mxu1 %vm8182_vm1, %v8183_v13 }
 0x7fe   : > { %v7375_v52 = vpop.eup %7374  ;;  %7033 = vmatprep.subr.bf16.mxu0 %v8181_v10 }
 0x7ff   : > { %v1956_v48 = vmul.f32 %v7375_v52, %v7367_v36 }
 0x800   : > { %6746 = vmatmul.mubr.msk.f32.vlgmr.msra.gmra.mrb[6].mxu0 %vm1611_vm4, %v9040_v50  ;;  %v2294_v50 = vld [vmem:[%s9727_s26 + $0x8] sm:$0xff] }
 0x801   : > { %6749 = vmatpush3.xpose.msk.msra.mxu1 %vm1611_vm4, %v1956_v48  ;;  %6761 = vmatprep.mubr.msk.f32.mxu0 %vm8182_vm1, %v8183_v13  ;;  %v7034_v54 = vpack.c.bf16 %v2294_v50, %v2293_v49 }
 0x802   : > { %7039 = vmatprep.subr.bf16.mxu1 %v8181_v10 }
 0x803   : > { %7035 = vmatpush3.bf16.msra.mxu0 %v7034_v54 }
 0x804   : > { %6751 = vmatmul.mubr.msk.f32.vlgmr.msra.gmra.mrb[10].mxu1 %vm1611_vm4, %v9042_v51  ;;  %v2296_v51 = vld [vmem:[%s9727_s26 + $0x18] sm:$0xff]  ;;  %7036 = vmatprep.subr.bf16.mxu0 %v8181_v10 }
 0x805   : > { %6772 = vmatprep.mubr.msk.f32.mxu1 %vm8182_vm1, %v8183_v13  ;;  %v7037_v55 = vpack.c.bf16 %v2296_v51, %v2295_v53  ;;  %7041 = vmatpush3.bf16.msra.mxu1 %v7040_v18 }
 0x806   : > { %7042 = vmatprep.subr.bf16.mxu1 %v8181_v10 }
 0x807   : > { %7038 = vmatpush3.bf16.msra.mxu0 %v7037_v55 }
 0x808   : > { %6775 = vmatprep.subr.mxu0 %v8183_v13 }
 0x809   : > { %7044 = vmatpush3.bf16.msra.mxu1 %v7043_v20 }
 0x80a   : > { %6780 = vmatprep.subr.mxu1 %v8183_v13 }
 0x8cb   : > { %v2029_v57 = vpop.f32.mrb[4].mxu0 }
 0x8cc   : > { %2261 = vxpose.xlu1.b32.start [1/4] (short) (narrow) %v2029_v57, 8  ;;  %v6737_v58 = vpop.f32.mrb[5].mxu0 }
 0x8cf   : > { %v2105_v60 = vpop.f32.mrb[8].mxu1 }
 0x8d0   : > { %2262 = vxpose.xlu1.b32.cont [2/4] (short) (narrow) %v2105_v60, 8  ;;  %v6742_v61 = vpop.f32.mrb[9].mxu1 }
 0x8d3   : > { %v2181_v62 = vpop.f32.mrb[6].mxu0 }
 0x8d4   : > { %v6747_v63 = vpop.f32.mrb[7].mxu0  ;;  %2263 = vxpose.xlu1.b32.cont [3/4] (short) (narrow) %v2181_v62, 8 }
 0x8d7   : > { %v2257_v0 = vpop.f32.mrb[10].mxu1 }
 0x8d8   : > { %2264 = vxpose.xlu1.b32.end [4/4] (short) (narrow) %v2257_v0, 8  ;;  %v6752_v1 = vpop.f32.mrb[11].mxu1 }
 0x94c   : > { %v2277_v2 = vpop.trf.xlu1 }
 0x94d   : > { %6762 = vmatmul.mubr.msk.f32.vlgmr.msra.gmra.mrb[8].mxu0 %vm1224_vm0, %v2277_v2  ;;  %v1212_v2 = vld [vmem:[%s1053_s6] sm:$0xff]  ;;  %s6073_s6 = scalar_lea.sflag [#allocation4], %s8938_s17 }
 0x94e   : > { %6777 = vmatprep.mubr.msk.f32.mxu0 %vm8182_vm1, %v8183_v13 }
 0xa20   : > { %v2373_v4 = vpop.f32.mrb[8].mxu0 }
 0xa21   : > { %v9117_v5 = vadd.f32 %v6452_v3, %v2373_v4  ;;  %v6763_v6 = vpop.f32.mrb[9].mxu0  ;;  %v9183_v3 = vmul.f32 -1e+30, %v1212_v2 }
 0xa23   : > { %v2379_v7 = vsel %vm1224_vm0, %v9117_v5, 0.0 }
 0xa24   : > { %2380 = vadd.xlane.f32.xlu0 %v2379_v7 }
 0xab1   : > { %v2381_v8 = vpop.xlane.xlu0 %2380 }
 0xab2   : > { %v2382_v9 = vmul.f32 0.03125, %v2381_v8 }
 0xab4   : > { %v2383_v11 = vsub.f32 %v9117_v5, %v2382_v9 }
 0xab6   : > { %v2384_v12 = vmul.f32 %v2383_v11, %v2383_v11  ;;  %v2404_v30 = vmul.f32 %v6454_v29, %v2383_v11 }
 0xab8   : > { %v2385_v14 = vsel %vm1224_vm0, %v2384_v12, 0.0 }
 0xab9   : > { %2386 = vadd.xlane.f32.xlu0 %v2385_v14 }
 0xb46   : > { %v2387_v21 = vpop.xlane.xlu0 %2386 }
 0xb47   : > { %v2388_v22 = vmul.f32 0.032258064, %v2387_v21 }
 0xb49   : > { %7376 = vrsqrt.f32 %v2388_v22  ;;  %vm2391_vm5 = vcmp.eq.f32.partialorder %v2388_v22, inf  ;;  %v2394_v25 = vand.u32 2147483648, %v2388_v22  ;;  %vm2393_vm6 = vcmp.eq.f32.partialorder %v2388_v22, 0.0 }
 0xb53   : > { %v7377_v23 = vpop.eup %7376 }
 0xb54   : > { %v2390_v24 = vmul.f32 %v7377_v23, %v2388_v22 }
 0xb56   : > { %v2392_v26 = vsel %vm2391_vm5, %v2388_v22, %v2390_v24 }
 0xb57   : > { %v2395_v27 = vsel %vm2393_vm6, %v2394_v25, %v2392_v26 }
 0xb58   : > { %v2396_v28 = vadd.f32 1e-06, %v2395_v27 }
 0xb5a   : > { %7378 = vrcp.f32 %v2396_v28 }
 0xb64   : > { %v7379_v31 = vpop.eup %7378 }
 0xb65   : > { %v2405_v33 = vmul.f32 %v7379_v31, %v2404_v30 }
 0xb67   : > { %v2412_v34 = vadd.f32 %v6455_v32, %v2405_v33 }
 0xb69   : > { %6773 = vmatmul.mubr.msk.f32.vlgmr.msra.gmra.mrb[12].mxu1 %vm1224_vm0, %v2412_v34 }
 0xb6a   : > { %6782 = vmatprep.mubr.msk.f32.mxu1 %vm8182_vm1, %v8183_v13 }
 0xc3c   : > { %v2493_v36 = vpop.f32.mrb[12].mxu1 }
 0xc3d   : > { %v2494_v37 = vadd.f32 %v6456_v35, %v2493_v36  ;;  %v6774_v38 = vpop.f32.mrb[13].mxu1 }
 0xc3f   : > { %2497 = vxpose.xlu0.b32.start.end [1/1] (short) (narrow) %v2494_v37, 32 }
 0xc4c   : > { %1298 = vxpose.xlu0.b32.start.end [1/1] (short) %v1295_v40, 128 }
 0xcbf   : > { %v2513_v41 = vpop.trf.xlu0 }
 0xcc0   : > { %2529 = vxpose.xlu1.b32.start.end [1/1] (short) (narrow) %v2513_v41, 8 }
 0xcc3   : > { %v2514_v42 = vpop.trf.xlu0 }
 0xcc4   : > { %2561 = vxpose.xlu1.b32.start.end [1/1] (short) (narrow) %v2514_v42, 8 }
 0xcc7   : > { %v2515_v43 = vpop.trf.xlu0 }
 0xcc8   : > { %2593 = vxpose.xlu0.b32.start.end [1/1] (short) (narrow) %v2515_v43, 8 }
 0xccb   : > { %v2516_v44 = vpop.trf.xlu0 }
 0xccc   : > { %2625 = vxpose.xlu1.b32.start.end [1/1] (short) (narrow) %v2516_v44, 8 }
 0xccf   : > { %v1314_v45 = vpop.trf.xlu0 }
 0xcd0   : > { %6776 = vmatpush3.msra.mxu0 %v1314_v45 }
 0xcd1   : > { %6785 = vmatprep.subr.mxu0 %v8183_v13 }
 0xcd3   : > { %v1315_v46 = vpop.trf.xlu0 }
 0xcd4   : > { %6781 = vmatpush3.msra.mxu1 %v1315_v46 }
 0xcd5   : > { %6790 = vmatprep.subr.mxu1 %v8183_v13 }
 0xcd7   : > { %v1316_v47 = vpop.trf.xlu0 }
 0xcdb   : > { %v1317_v52 = vpop.trf.xlu0 }
 0xcdf   : > { %v9143_v56 = vpop.trf.xlu0 }
 0xce3   : > { %v9145_v48 = vpop.trf.xlu0 }
 0xce7   : > { %v9147_v49 = vpop.trf.xlu0 }
 0xceb   : > { %v9149_v50 = vpop.trf.xlu0 }
 0xcef   : > { %v9151_v53 = vpop.trf.xlu0 }
 0xcf3   : > { %v9153_v54 = vpop.trf.xlu0 }
 0xcf7   : > { %v9155_v51 = vpop.trf.xlu0 }
 0xcfb   : > { %v9157_v55 = vpop.trf.xlu0 }
 0xcff   : > { %v9159_v57 = vpop.trf.xlu0 }
 0xd03   : > { %v9161_v58 = vpop.trf.xlu0 }
 0xd07   : > { %v9163_v60 = vpop.trf.xlu0 }
 0xd0b   : > { %v9166_v62 = vpop.trf.xlu0 }
 0xd40   : > { %v2545_v61 = vpop.trf.xlu1 }
 0xd41   : > { %6778 = vmatmul.mubr.msk.f32.vlgmr.msra.gmra.mrb[10].mxu0 %vm1611_vm4, %v2545_v61 }
 0xd42   : > { %6786 = vmatpush3.msra.mxu0 %v1316_v47  ;;  %6787 = vmatprep.mubr.msk.f32.mxu0 %vm8182_vm1, %v8183_v13 }
 0xd43   : > { %6795 = vmatprep.subr.mxu0 %v8183_v13 }
 0xd44   : > { %v2577_v63 = vpop.trf.xlu1 }
 0xd45   : > { %6783 = vmatmul.mubr.msk.f32.vlgmr.msra.gmra.mrb[14].mxu1 %vm1611_vm4, %v2577_v63 }
 0xd46   : > { %6791 = vmatpush3.msra.mxu1 %v1317_v52  ;;  %6792 = vmatprep.mubr.msk.f32.mxu1 %vm8182_vm1, %v8183_v13 }
 0xd47   : > { %6800 = vmatprep.subr.mxu1 %v8183_v13 }
 0xd48   : > { %v2609_v0 = vpop.trf.xlu0 }
 0xd49   : > { %6788 = vmatmul.mubr.msk.f32.vlgmr.msra.gmra.mrb[12].mxu0 %vm1611_vm4, %v2609_v0 }
 0xd4a   : > { %6797 = vmatprep.mubr.msk.f32.mxu0 %vm8182_vm1, %v8183_v13 }
 0xd4c   : > { %v2641_v1 = vpop.trf.xlu1 }
 0xd4d   : > { %6793 = vmatmul.mubr.msk.f32.vlgmr.msra.gmra.mrb[16].mxu1 %vm1611_vm4, %v2641_v1 }
 0xd4e   : > { %6802 = vmatprep.mubr.msk.f32.mxu1 %vm8182_vm1, %v8183_v13 }
 0xe14   : > { %v2726_v4 = vpop.f32.mrb[10].mxu0 }
 0xe15   : > { %v2949_v6 = vmul.f32 0.35355338, %v2726_v4  ;;  %v6779_v7 = vpop.f32.mrb[11].mxu0 }
 0xe17   : > { %v2954_v8 = vadd.f32 %v9183_v3, %v2949_v6 }
 0xe18   : > { %v2799_v9 = vpop.f32.mrb[14].mxu1 }
 0xe19   : > { %v2950_v11 = vmul.f32 0.35355338, %v2799_v9  ;;  %v6784_v12 = vpop.f32.mrb[15].mxu1  ;;  %v2958_v14 = vsel %vm1611_vm4, %v2954_v8, -inf  ;;  %v3339_v9 = vld [vmem:[#allocation25 + $0x8] sm:$0xff] }
 0xe1a   : > { %2959 = vmax.xlane.f32.xlu1 %v2958_v14  ;;  %v3341_v14 = vld [vmem:[#allocation25 + $0x18] sm:$0xff] }
 0xe1b   : > { %v2955_v15 = vadd.f32 %v9183_v3, %v2950_v11  ;;  %v3340_v11 = vld [vmem:[#allocation25 + $0x10] sm:$0xff] }
 0xe1c   : > { %v2872_v16 = vpop.f32.mrb[12].mxu0 }
 0xe1d   : > { %v2951_v17 = vmul.f32 0.35355338, %v2872_v16  ;;  %v6789_v18 = vpop.f32.mrb[13].mxu0  ;;  %v2961_v19 = vsel %vm1611_vm4, %v2955_v15, -inf }
 0xe1e   : > { %2962 = vmax.xlane.f32.xlu1 %v2961_v19 }
 0xe1f   : > { %v2956_v20 = vadd.f32 %v9183_v3, %v2951_v17 }
 0xe20   : > { %v2945_v21 = vpop.f32.mrb[16].mxu1 }
 0xe21   : > { %v2952_v22 = vmul.f32 0.35355338, %v2945_v21  ;;  %v6794_v23 = vpop.f32.mrb[17].mxu1  ;;  %v2964_v24 = vsel %vm1611_vm4, %v2956_v20, -inf }
 0xe22   : > { %2965 = vmax.xlane.f32.xlu1 %v2964_v24  ;;  %v6470_v23 = vld [vmem:[#allocation26] ss:$0 sm:$0xff] }
 0xe23   : > { %v2957_v25 = vadd.f32 %v9183_v3, %v2952_v22 }
 0xe25   : > { %v2967_v26 = vsel %vm1611_vm4, %v2957_v25, -inf }
 0xe26   : > { %2968 = vmax.xlane.f32.xlu1 %v2967_v26 }
 0xea7   : > { %v2960_v27 = vpop.xlane.xlu1 %2959 }
 0xea8   : > { %v2970_v28 = vsub.f32 %v2954_v8, %v2960_v27 }
 0xeaa   : > { %v2974_v29 = vmul.f32 1.442695, %v2970_v28 }
 0xeab   : > { %v2963_v30 = vpop.xlane.xlu1 %2962 }
 0xeac   : > { %7380 = vpow2.f32 %v2974_v29  ;;  %v2971_v31 = vsub.f32 %v2955_v15, %v2963_v30 }
 0xeae   : > { %v2976_v32 = vmul.f32 1.442695, %v2971_v31 }
 0xeaf   : > { %v2966_v33 = vpop.xlane.xlu1 %2965 }
 0xeb0   : > { %7382 = vpow2.f32 %v2976_v32  ;;  %v2972_v34 = vsub.f32 %v2956_v20, %v2966_v33 }
 0xeb2   : > { %v2978_v35 = vmul.f32 1.442695, %v2972_v34  ;;  %v3459_v34 = vld [vmem:[#allocation28] sm:$0xff] }
 0xeb3   : > { %v2969_v36 = vpop.xlane.xlu1 %2968 }
 0xeb4   : > { %7384 = vpow2.f32 %v2978_v35  ;;  %v2973_v37 = vsub.f32 %v2957_v25, %v2969_v36  ;;  %v3460_v35 = vld [vmem:[#allocation28 + $0x8] sm:$0xff]  ;;  %v3461_v36 = vld [vmem:[#allocation28 + $0x10] sm:$0xff] }
 0xeb6   : > { %v7381_v38 = vpop.eup %7380  ;;  %v2980_v39 = vmul.f32 1.442695, %v2973_v37  ;;  %v7052_v37 = vpack.c.bf16 %v3460_v35, %v3459_v34  ;;  %v6484_v34 = vld [vmem:[%s9725_s27 + $0x38] sm:$0xff] }
 0xeb7   : > { %v2982_v40 = vsel %vm1611_vm4, %v7381_v38, 0.0 }
 0xeb8   : > { %7386 = vpow2.f32 %v2980_v39  ;;  %2983 = vadd.xlane.f32.xlu1 %v2982_v40  ;;  %v3545_v40 = vld [vmem:[%s9729_s1 + $0x8] sm:$0xff] }
 0xeba   : > { %v7383_v41 = vpop.eup %7382 }
 0xebb   : > { %v2985_v42 = vsel %vm1611_vm4, %v7383_v41, 0.0 }
 0xebc   : > { %2986 = vadd.xlane.f32.xlu0 %v2985_v42 }
 0xebe   : > { %v7385_v43 = vpop.eup %7384 }
 0xebf   : > { %v2988_v44 = vsel %vm1611_vm4, %v7385_v43, 0.0 }
 0xec0   : > { %2989 = vadd.xlane.f32.xlu1 %v2988_v44 }
 0xec2   : > { %v7387_v45 = vpop.eup %7386 }
 0xec3   : > { %v2991_v46 = vsel %vm1611_vm4, %v7387_v45, 0.0 }
 0xec4   : > { %2992 = vadd.xlane.f32.xlu1 %v2991_v46  ;;  %v3549_v46 = vld [vmem:[%s9729_s1 + $0x28] sm:$0xff] }
 0xf45   : > { %v2984_v47 = vpop.xlane.xlu1 %2983 }
 0xf46   : > { %7388 = vrcp.f32 %v2984_v47 }
 0xf49   : > { %v2987_v52 = vpop.xlane.xlu0 %2986 }
 0xf4a   : > { %7390 = vrcp.f32 %v2987_v52 }
 0xf4d   : > { %v2990_v61 = vpop.xlane.xlu1 %2989 }
 0xf4e   : > { %7392 = vrcp.f32 %v2990_v61 }
 0xf50   : > { %v7389_v63 = vpop.eup %7388 }
 0xf51   : > { %v2998_v0 = vmul.f32 %v7389_v63, %v7381_v38  ;;  %v2993_v1 = vpop.xlane.xlu1 %2992  ;;  %v3462_v38 = vld [vmem:[#allocation28 + $0x18] sm:$0xff] }
 0xf52   : > { %7394 = vrcp.f32 %v2993_v1  ;;  %v7055_v39 = vpack.c.bf16 %v3462_v38, %v3461_v36 }
 0xf53   : > { %6796 = vmatpush3.xpose.msk.msra.mxu0 %vm1611_vm4, %v2998_v0 }
 0xf54   : > { %v7391_v2 = vpop.eup %7390  ;;  %6805 = vmatprep.subr.mxu0 %v8183_v13 }
 0xf55   : > { %v2999_v4 = vmul.f32 %v7391_v2, %v7383_v41  ;;  %v3546_v41 = vld [vmem:[%s9729_s1 + $0x10] sm:$0xff] }
 0xf56   : > { %6798 = vmatmul.mubr.msk.f32.vlgmr.msra.gmra.mrb[14].mxu0 %vm1611_vm4, %v9143_v56 }
 0xf57   : > { %6801 = vmatpush3.xpose.msk.msra.mxu1 %vm1611_vm4, %v2999_v4  ;;  %6807 = vmatprep.mubr.msk.f32.mxu0 %vm8182_vm1, %v8183_v13 }
 0xf58   : > { %v7393_v6 = vpop.eup %7392  ;;  %6810 = vmatprep.subr.mxu1 %v8183_v13 }
 0xf59   : > { %v3000_v7 = vmul.f32 %v7393_v6, %v7385_v43  ;;  %v3547_v43 = vld [vmem:[%s9729_s1 + $0x18] sm:$0xff] }
 0xf5a   : > { %6803 = vmatmul.mubr.msk.f32.vlgmr.msra.gmra.mrb[18].mxu1 %vm1611_vm4, %v9145_v48  ;;  %v3338_v48 = vld [vmem:[#allocation25] sm:$0xff]  ;;  %v7061_v44 = vpack.c.bf16 %v3547_v43, %v3546_v41  ;;  %v6479_v43 = vld [vmem:[%s9726_s21 + $0x1] ss:$0 sm:$0xff] }
 0xf5b   : > { %6806 = vmatpush3.xpose.msk.msra.mxu0 %vm1611_vm4, %v3000_v7  ;;  %6812 = vmatprep.mubr.msk.f32.mxu1 %vm8182_vm1, %v8183_v13  ;;  %v7046_v12 = vpack.c.bf16 %v3339_v9, %v3338_v48  ;;  %v6472_v7 = vld [vmem:[#allocation14] ss:$0 sm:$0xff]  ;;  %v6473_v48 = vld [vmem:[#allocation16] ss:$0 sm:$0xff] }
 0xf5c   : > { %v7395_v8 = vpop.eup %7394  ;;  %7045 = vmatprep.subr.bf16.mxu0 %v8181_v10 }
 0xf5d   : > { %v3001_v56 = vmul.f32 %v7395_v8, %v7387_v45  ;;  %v3548_v45 = vld [vmem:[%s9729_s1 + $0x20] sm:$0xff] }
 0xf5e   : > { %6808 = vmatmul.mubr.msk.f32.vlgmr.msra.gmra.mrb[16].mxu0 %vm1611_vm4, %v9147_v49  ;;  %v7049_v49 = vpack.c.bf16 %v3341_v14, %v3340_v11  ;;  %v7064_v47 = vpack.c.bf16 %v3549_v46, %v3548_v45  ;;  %v3551_v14 = vld [vmem:[%s9729_s1 + $0x38] sm:$0xff]  ;;  %v6480_v46 = vld [vmem:[#allocation10 + $0x1] ss:$0 sm:$0xff] }
 0xf5f   : > { %6811 = vmatpush3.xpose.msk.msra.mxu1 %vm1611_vm4, %v3001_v56  ;;  %6823 = vmatprep.mubr.msk.f32.mxu0 %vm8182_vm1, %v8183_v13 }
 0xf60   : > { %7051 = vmatprep.subr.bf16.mxu1 %v8181_v10  ;;  %7047 = vmatpush3.bf16.msra.mxu0 %v7046_v12  ;;  %v3550_v12 = vld [vmem:[%s9729_s1 + $0x30] sm:$0xff] }
 0xf61   : > { %7048 = vmatprep.subr.bf16.mxu0 %v8181_v10 }
 0xf62   : > { %6813 = vmatmul.mubr.msk.f32.vlgmr.msra.gmra.mrb[20].mxu1 %vm1611_vm4, %v9149_v50 }
 0xf63   : > { %6834 = vmatprep.mubr.msk.f32.mxu1 %vm8182_vm1, %v8183_v13  ;;  %7053 = vmatpush3.bf16.msra.mxu1 %v7052_v37 }
 0xf64   : > { %7050 = vmatpush3.bf16.msra.mxu0 %v7049_v49  ;;  %7054 = vmatprep.subr.bf16.mxu1 %v8181_v10  ;;  %v7067_v49 = vpack.c.bf16 %v3551_v14, %v3550_v12 }
 0xf65   : > { %7057 = vmatprep.subr.bf16.mxu0 %v8181_v10 }
 0xf67   : > { %7056 = vmatpush3.bf16.msra.mxu1 %v7055_v39 }
 0xf68   : > { %7069 = vmatprep.subr.bf16.mxu1 %v8181_v10 }
0x1029   : > { %v3074_v15 = vpop.f32.mrb[14].mxu0 }
0x102a   : > { %3306 = vxpose.xlu1.b32.start [1/4] (short) (narrow) %v3074_v15, 8  ;;  %v6799_v16 = vpop.f32.mrb[15].mxu0  ;;  %v6474_v15 = vld [vmem:[#allocation29] ss:$0 sm:$0xff] }
0x102d   : > { %v3150_v17 = vpop.f32.mrb[18].mxu1 }
0x102e   : > { %3307 = vxpose.xlu1.b32.cont [2/4] (short) (narrow) %v3150_v17, 8  ;;  %v6804_v50 = vpop.f32.mrb[19].mxu1 }
0x1031   : > { %v3226_v18 = vpop.f32.mrb[16].mxu0 }
0x1032   : > { %v6809_v19 = vpop.f32.mrb[17].mxu0  ;;  %3308 = vxpose.xlu1.b32.cont [3/4] (short) (narrow) %v3226_v18, 8 }
0x1033   : > { %v6476_v19 = vld [vmem:[#allocation31] ss:$0 sm:$0xff] }
0x1035   : > { %v3302_v20 = vpop.f32.mrb[20].mxu1 }
0x1036   : > { %3309 = vxpose.xlu1.b32.end [4/4] (short) (narrow) %v3302_v20, 8  ;;  %v6814_v21 = vpop.f32.mrb[21].mxu1 }
0x10aa   : > { %v3322_v22 = vpop.trf.xlu1 }
0x10ab   : > { %6824 = vmatmul.mubr.msk.f32.vlgmr.msra.gmra.mrb[18].mxu0 %vm1224_vm0, %v3322_v22 }
0x10ac   : > { %6853 = vmatprep.mubr.msk.f32.mxu0 %vm8182_vm1, %v8183_v13 }
0x117e   : > { %v3418_v24 = vpop.f32.mrb[18].mxu0 }
0x117f   : > { %v9226_v25 = vadd.f32 %v6470_v23, %v3418_v24  ;;  %v6825_v26 = vpop.f32.mrb[19].mxu0 }
0x1181   : > { %v3422_v27 = vadd.f32 %v9226_v25, %v9117_v5  ;;  %v3544_v5 = vld [vmem:[%s9729_s1] sm:$0xff] }
0x1182   : > { %v7058_v42 = vpack.c.bf16 %v3545_v40, %v3544_v5 }
0x1183   : > { %v3425_v28 = vsel %vm1224_vm0, %v3422_v27, 0.0 }
0x1184   : > { %3426 = vadd.xlane.f32.xlu0 %v3425_v28  ;;  %7059 = vmatpush3.bf16.msra.mxu0 %v7058_v42 }
0x1185   : > { %7060 = vmatprep.subr.bf16.mxu0 %v8181_v10 }
0x1188   : > { %7062 = vmatpush3.bf16.msra.mxu0 %v7061_v44 }
0x1189   : > { %7063 = vmatprep.subr.bf16.mxu0 %v8181_v10 }
0x118c   : > { %7065 = vmatpush3.bf16.msra.mxu0 %v7064_v47 }
0x118d   : > { %7066 = vmatprep.subr.bf16.mxu0 %v8181_v10 }
0x1190   : > { %7068 = vmatpush3.bf16.msra.mxu0 %v7067_v49 }
0x1191   : > { %6877 = vmatprep.subr.mxu0 %v8183_v13 }
0x1211   : > { %v3427_v29 = vpop.xlane.xlu0 %3426 }
0x1212   : > { %v3428_v30 = vmul.f32 0.03125, %v3427_v29 }
0x1214   : > { %v3429_v31 = vsub.f32 %v3422_v27, %v3428_v30 }
0x1216   : > { %v3430_v32 = vmul.f32 %v3429_v31, %v3429_v31  ;;  %v3450_v8 = vmul.f32 %v6472_v7, %v3429_v31  ;;  %v6481_v31 = vld [vmem:[%s9725_s27 + $0x20] sm:$0xff] }
0x1218   : > { %v3431_v33 = vsel %vm1224_vm0, %v3430_v32, 0.0  ;;  %v6482_v32 = vld [vmem:[%s9725_s27 + $0x28] sm:$0xff] }
0x1219   : > { %3432 = vadd.xlane.f32.xlu0 %v3431_v33  ;;  %v7070_v33 = vpack.c.bf16 %v6482_v32, %v6481_v31 }
0x12a6   : > { %v3433_v52 = vpop.xlane.xlu0 %3432 }
0x12a7   : > { %v3434_v61 = vmul.f32 0.032258064, %v3433_v52 }
0x12a9   : > { %7396 = vrsqrt.f32 %v3434_v61  ;;  %vm3437_vm7 = vcmp.eq.f32.partialorder %v3434_v61, inf  ;;  %v3440_v1 = vand.u32 2147483648, %v3434_v61  ;;  %vm3439_vm8 = vcmp.eq.f32.partialorder %v3434_v61, 0.0 }
0x12b3   : > { %v7397_v63 = vpop.eup %7396 }
0x12b4   : > { %v3436_v0 = vmul.f32 %v7397_v63, %v3434_v61 }
0x12b6   : > { %v3438_v2 = vsel %vm3437_vm7, %v3434_v61, %v3436_v0  ;;  %v6485_v61 = vld [vmem:[#allocation17 + $0x1] ss:$0 sm:$0xff] }
0x12b7   : > { %v3441_v4 = vsel %vm3439_vm8, %v3440_v1, %v3438_v2 }
0x12b8   : > { %v3442_v6 = vadd.f32 1e-06, %v3441_v4 }
0x12ba   : > { %7398 = vrcp.f32 %v3442_v6 }
0x12c4   : > { %v7399_v56 = vpop.eup %7398 }
0x12c5   : > { %v3451_v9 = vmul.f32 %v7399_v56, %v3450_v8 }
0x12c7   : > { %v3458_v11 = vadd.f32 %v6473_v48, %v3451_v9 }
0x12c9   : > { %6835 = vmatmul.mubr.msk.f32.vlgmr.msra.gmra.mrb[22].mxu1 %vm1224_vm0, %v3458_v11 }
0x12ca   : > { %6864 = vmatprep.mubr.msk.f32.mxu1 %vm8182_vm1, %v8183_v13  ;;  %7071 = vmatpush3.bf16.msra.mxu1 %v7070_v33 }
0x12cb   : > { %7072 = vmatprep.subr.bf16.mxu1 %v8181_v10 }
0x139c   : > { %v3539_v16 = vpop.f32.mrb[22].mxu1 }
0x139d   : > { %v3540_v17 = vadd.f32 %v6474_v15, %v3539_v16  ;;  %v6836_v50 = vpop.f32.mrb[23].mxu1 }
0x139f   : > { %v3543_v18 = vmax.f32 %v3540_v17, 0.0 }
0x13a1   : > { %6854 = vmatmul.mubr.msk.f32.vlgmr.msra.gmra.mrb[20].mxu0 %vm3559_vm9, %v3543_v18 }
0x13a2   : > { %6879 = vmatprep.mubr.msk.f32.mxu0 %vm8182_vm1, %v8183_v13 }
0x1474   : > { %v3629_v20 = vpop.f32.mrb[20].mxu0 }
0x1475   : > { %v3630_v21 = vadd.f32 %v6476_v19, %v3629_v20  ;;  %v6855_v22 = vpop.f32.mrb[21].mxu0 }
0x1477   : > { %v3633_v23 = vadd.f32 %v3630_v21, %v9226_v25  ;;  %v6483_v25 = vld [vmem:[%s9725_s27 + $0x30] sm:$0xff] }
0x1478   : > { %v7073_v35 = vpack.c.bf16 %v6484_v34, %v6483_v25 }
0x1479   : > { %v3638_v24 = vsel %vm1224_vm0, %v3633_v23, 0.0 }
0x147a   : > { %3639 = vadd.xlane.f32.xlu0 %v3638_v24  ;;  %7074 = vmatpush3.bf16.msra.mxu1 %v7073_v35 }
0x147b   : > { %6867 = vmatprep.subr.mxu1 %v8183_v13 }
0x1507   : > { %v3640_v26 = vpop.xlane.xlu0 %3639 }
0x1508   : > { %v3641_v27 = vmul.f32 0.03125, %v3640_v26 }
0x150a   : > { %v3642_v28 = vsub.f32 %v3633_v23, %v3641_v27 }
0x150c   : > { %v3643_v29 = vmul.f32 %v3642_v28, %v3642_v28  ;;  %v3663_v44 = vmul.f32 %v6479_v43, %v3642_v28 }
0x150e   : > { %v3644_v30 = vsel %vm1224_vm0, %v3643_v29, 0.0 }
0x150f   : > { %3645 = vadd.xlane.f32.xlu0 %v3644_v30 }
0x159c   : > { %v3646_v36 = vpop.xlane.xlu0 %3645 }
0x159d   : > { %v3647_v37 = vmul.f32 0.032258064, %v3646_v36 }
0x159f   : > { %7400 = vrsqrt.f32 %v3647_v37  ;;  %vm3650_vm10 = vcmp.eq.f32.partialorder %v3647_v37, inf  ;;  %v3653_v5 = vand.u32 2147483648, %v3647_v37  ;;  %vm3652_vm11 = vcmp.eq.f32.partialorder %v3647_v37, 0.0 }
0x15a9   : > { %v7401_v38 = vpop.eup %7400 }
0x15aa   : > { %v3649_v39 = vmul.f32 %v7401_v38, %v3647_v37 }
0x15ac   : > { %v3651_v40 = vsel %vm3650_vm10, %v3647_v37, %v3649_v39 }
0x15ad   : > { %v3654_v41 = vsel %vm3652_vm11, %v3653_v5, %v3651_v40 }
0x15ae   : > { %v3655_v42 = vadd.f32 1e-06, %v3654_v41 }
0x15b0   : > { %7402 = vrcp.f32 %v3655_v42 }
0x15ba   : > { %v7403_v45 = vpop.eup %7402 }
0x15bb   : > { %v3664_v47 = vmul.f32 %v7403_v45, %v3663_v44 }
0x15bd   : > { %v3671_v52 = vadd.f32 %v6480_v46, %v3664_v47 }
0x15bf   : > { %6865 = vmatmul.mubr.msk.f32.vlgmr.msra.gmra.mrb[24].mxu1 %vm1224_vm0, %v3671_v52 }
0x15c0   : > { %6869 = vmatprep.mubr.msk.f32.mxu1 %vm8182_vm1, %v8183_v13 }
0x1692   : > { %v3754_v63 = vpop.f32.mrb[24].mxu1 }
0x1693   : > { %v3755_v0 = vadd.f32 %v6485_v61, %v3754_v63  ;;  %v6866_v1 = vpop.f32.mrb[25].mxu1 }
0x1695   : > { %3758 = vxpose.xlu0.b32.start.end [1/1] (short) (narrow) %v3755_v0, 96 }
0x1715   : > { %v3774_v2 = vpop.trf.xlu0 }
0x1716   : > { %3790 = vxpose.xlu1.b32.start.end [1/1] (short) (narrow) %v3774_v2, 8 }
0x1719   : > { %v3775_v4 = vpop.trf.xlu0 }
0x171a   : > { %3822 = vxpose.xlu1.b32.start.end [1/1] (short) (narrow) %v3775_v4, 8 }
0x171d   : > { %v3776_v6 = vpop.trf.xlu0 }
0x171e   : > { %3854 = vxpose.xlu1.b32.start.end [1/1] (short) (narrow) %v3776_v6, 8 }
0x1721   : > { %v3777_v7 = vpop.trf.xlu0 }
0x1722   : > { %3886 = vxpose.xlu1.b32.start.end [1/1] (short) (narrow) %v3777_v7, 8 }
0x1725   : > { %v3778_v8 = vpop.trf.xlu0 }
0x1726   : > { %6868 = vmatpush3.msra.mxu1 %v3778_v8 }
0x1727   : > { %6872 = vmatprep.subr.mxu1 %v8183_v13 }
0x1729   : > { %v3779_v56 = vpop.trf.xlu0 }
0x172d   : > { %v3780_v48 = vpop.trf.xlu0 }
0x172e   : > { %6878 = vmatpush3.msra.mxu0 %v3780_v48 }
0x172f   : > { %6887 = vmatprep.subr.mxu0 %v8183_v13 }
0x1731   : > { %v3781_v11 = vpop.trf.xlu0 }
0x1735   : > { %v3782_v34 = vpop.trf.xlu0 }
0x1739   : > { %v3783_v35 = vpop.trf.xlu0 }
0x173d   : > { %v3784_v36 = vpop.trf.xlu0 }
0x1741   : > { %v3785_v37 = vpop.trf.xlu0 }
0x1796   : > { %v3806_v9 = vpop.trf.xlu1 }
0x1797   : > { %6870 = vmatmul.mubr.msk.f32.vlgmr.msra.gmra.mrb[26].mxu1 %vm1611_vm4, %v3806_v9 }
0x1798   : > { %6873 = vmatpush3.msra.mxu1 %v3779_v56  ;;  %6874 = vmatprep.mubr.msk.f32.mxu1 %vm8182_vm1, %v8183_v13 }
0x1799   : > { %6882 = vmatprep.subr.mxu1 %v8183_v13 }
0x179a   : > { %v3838_v12 = vpop.trf.xlu1 }
0x179b   : > { %6875 = vmatmul.mubr.msk.f32.vlgmr.msra.gmra.mrb[28].mxu1 %vm1611_vm4, %v3838_v12 }
0x179c   : > { %6883 = vmatpush3.msra.mxu1 %v3781_v11  ;;  %6884 = vmatprep.mubr.msk.f32.mxu1 %vm8182_vm1, %v8183_v13 }
0x179d   : > { %6892 = vmatprep.subr.mxu1 %v8183_v13 }
0x179e   : > { %v3870_v14 = vpop.trf.xlu1 }
0x179f   : > { %6880 = vmatmul.mubr.msk.f32.vlgmr.msra.gmra.mrb[22].mxu0 %vm1611_vm4, %v3870_v14 }
0x17a0   : > { %6889 = vmatprep.mubr.msk.f32.mxu0 %vm8182_vm1, %v8183_v13 }
0x17a2   : > { %v3902_v49 = vpop.trf.xlu1 }
0x17a3   : > { %6885 = vmatmul.mubr.msk.f32.vlgmr.msra.gmra.mrb[30].mxu1 %vm1611_vm4, %v3902_v49 }
0x17a4   : > { %6894 = vmatprep.mubr.msk.f32.mxu1 %vm8182_vm1, %v8183_v13 }
0x186a   : > { %v3987_v15 = vpop.f32.mrb[26].mxu1 }
0x186b   : > { %v4210_v16 = vmul.f32 0.35355338, %v3987_v15  ;;  %v6871_v17 = vpop.f32.mrb[27].mxu1 }
0x186d   : > { %v4214_v50 = vadd.f32 %v4210_v16, %v9062_v59 }
0x186e   : > { %v4060_v18 = vpop.f32.mrb[28].mxu1 }
0x186f   : > { %v4211_v19 = vmul.f32 0.35355338, %v4060_v18  ;;  %v6876_v20 = vpop.f32.mrb[29].mxu1  ;;  %v4218_v21 = vsel %vm1611_vm4, %v4214_v50, -inf  ;;  %v6500_v18 = vld [vmem:[%s9727_s26 + $0x28] sm:$0xff] }
0x1870   : > { %4219 = vmax.xlane.f32.xlu1 %v4218_v21  ;;  %v6502_v21 = vld [vmem:[%s9727_s26 + $0x38] sm:$0xff] }
0x1871   : > { %v4215_v22 = vadd.f32 %v4211_v19, %v9062_v59  ;;  %v6501_v19 = vld [vmem:[%s9727_s26 + $0x30] sm:$0xff] }
0x1872   : > { %v4133_v23 = vpop.f32.mrb[22].mxu0 }
0x1873   : > { %v4212_v24 = vmul.f32 0.35355338, %v4133_v23  ;;  %v6881_v26 = vpop.f32.mrb[23].mxu0  ;;  %v4221_v27 = vsel %vm1611_vm4, %v4215_v22, -inf }
0x1874   : > { %4222 = vmax.xlane.f32.xlu0 %v4221_v27 }
0x1875   : > { %v4216_v28 = vadd.f32 %v4212_v24, %v9062_v59 }
0x1876   : > { %v4206_v29 = vpop.f32.mrb[30].mxu1 }
0x1877   : > { %v4213_v30 = vmul.f32 0.35355338, %v4206_v29  ;;  %v6886_v31 = vpop.f32.mrb[31].mxu1  ;;  %v4224_v32 = vsel %vm1611_vm4, %v4216_v28, -inf }
0x1878   : > { %4225 = vmax.xlane.f32.xlu1 %v4224_v32 }
0x1879   : > { %v4217_v25 = vadd.f32 %v4213_v30, %v9062_v59 }
0x187b   : > { %v4227_v33 = vsel %vm1611_vm4, %v4217_v25, -inf }
0x187c   : > { %4228 = vmax.xlane.f32.xlu1 %v4227_v33 }
0x18fd   : > { %v4220_v38 = vpop.xlane.xlu1 %4219 }
0x18fe   : > { %v4230_v39 = vsub.f32 %v4214_v50, %v4220_v38  ;;  %v6499_v50 = vld [vmem:[%s9727_s26 + $0x20] sm:$0xff] }
0x18ff   : > { %v7076_v20 = vpack.c.bf16 %v6500_v18, %v6499_v50 }
0x1900   : > { %v4234_v5 = vmul.f32 1.442695, %v4230_v39 }
0x1901   : > { %v4223_v40 = vpop.xlane.xlu0 %4222 }
0x1902   : > { %7404 = vpow2.f32 %v4234_v5  ;;  %v4231_v41 = vsub.f32 %v4215_v22, %v4223_v40  ;;  %v7079_v22 = vpack.c.bf16 %v6502_v21, %v6501_v19  ;;  %v6507_v40 = vld [vmem:[%s9728_s11 + $0x20] sm:$0xff] }
0x1904   : > { %v4236_v42 = vmul.f32 1.442695, %v4231_v41  ;;  %v6508_v41 = vld [vmem:[%s9728_s11 + $0x28] sm:$0xff] }
0x1905   : > { %v4226_v43 = vpop.xlane.xlu1 %4225 }
0x1906   : > { %7406 = vpow2.f32 %v4236_v42  ;;  %v4232_v44 = vsub.f32 %v4216_v28, %v4226_v43  ;;  %v6509_v42 = vld [vmem:[%s9728_s11 + $0x30] sm:$0xff]  ;;  %v7082_v43 = vpack.c.bf16 %v6508_v41, %v6507_v40 }
0x1908   : > { %v4238_v45 = vmul.f32 1.442695, %v4232_v44  ;;  %v6510_v44 = vld [vmem:[%s9728_s11 + $0x38] sm:$0xff] }
0x1909   : > { %v4229_v46 = vpop.xlane.xlu1 %4228 }
0x190a   : > { %7408 = vpow2.f32 %v4238_v45  ;;  %v4233_v59 = vsub.f32 %v4217_v25, %v4229_v46  ;;  %v6503_v25 = vld [vmem:[#allocation19 + $0x1] ss:$0 sm:$0xff]  ;;  %v7085_v45 = vpack.c.bf16 %v6510_v44, %v6509_v42 }
0x190c   : > { %v7405_v47 = vpop.eup %7404  ;;  %v4240_v52 = vmul.f32 1.442695, %v4233_v59 }
0x190d   : > { %v4242_v61 = vsel %vm1611_vm4, %v7405_v47, 0.0 }
0x190e   : > { %7410 = vpow2.f32 %v4240_v52  ;;  %4243 = vadd.xlane.f32.xlu1 %v4242_v61 }
0x1910   : > { %v7407_v63 = vpop.eup %7406 }
0x1911   : > { %v4245_v0 = vsel %vm1611_vm4, %v7407_v63, 0.0 }
0x1912   : > { %4246 = vadd.xlane.f32.xlu1 %v4245_v0 }
0x1914   : > { %v7409_v1 = vpop.eup %7408 }
0x1915   : > { %v4248_v2 = vsel %vm1611_vm4, %v7409_v1, 0.0 }
0x1916   : > { %4249 = vadd.xlane.f32.xlu1 %v4248_v2  ;;  %v6505_v2 = vld [vmem:[#allocation11 + $0x1] ss:$0 sm:$0xff] }
0x1918   : > { %v7411_v4 = vpop.eup %7410 }
0x1919   : > { %v4251_v6 = vsel %vm1611_vm4, %v7411_v4, 0.0 }
0x191a   : > { %4252 = vadd.xlane.f32.xlu1 %v4251_v6 }
0x199b   : > { %v4244_v7 = vpop.xlane.xlu1 %4243 }
0x199c   : > { %7412 = vrcp.f32 %v4244_v7  ;;  %v6506_v7 = vld [vmem:[#allocation13 + $0x1] ss:$0 sm:$0xff] }
0x199f   : > { %v4247_v8 = vpop.xlane.xlu1 %4246 }
0x19a0   : > { %7414 = vrcp.f32 %v4247_v8 }
0x19a3   : > { %v4250_v56 = vpop.xlane.xlu1 %4249 }
0x19a4   : > { %7416 = vrcp.f32 %v4250_v56 }
0x19a6   : > { %v7413_v48 = vpop.eup %7412 }
0x19a7   : > { %v4258_v9 = vmul.f32 %v7413_v48, %v7405_v47  ;;  %v4253_v11 = vpop.xlane.xlu1 %4252  ;;  %v6511_v48 = vld [vmem:[#allocation20 + $0x1] ss:$0 sm:$0xff] }
0x19a8   : > { %7418 = vrcp.f32 %v4253_v11 }
0x19a9   : > { %6888 = vmatpush3.xpose.msk.msra.mxu0 %vm1611_vm4, %v4258_v9 }
0x19aa   : > { %v7415_v12 = vpop.eup %7414  ;;  %6897 = vmatprep.subr.mxu0 %v8183_v13 }
0x19ab   : > { %v4259_v14 = vmul.f32 %v7415_v12, %v7407_v63 }
0x19ac   : > { %6890 = vmatmul.mubr.msk.f32.vlgmr.msra.gmra.mrb[24].mxu0 %vm1611_vm4, %v3782_v34 }
0x19ad   : > { %6893 = vmatpush3.xpose.msk.msra.mxu1 %vm1611_vm4, %v4259_v14  ;;  %6899 = vmatprep.mubr.msk.f32.mxu0 %vm8182_vm1, %v8183_v13 }
0x19ae   : > { %v7417_v49 = vpop.eup %7416  ;;  %6902 = vmatprep.subr.mxu1 %v8183_v13 }
0x19af   : > { %v4260_v15 = vmul.f32 %v7417_v49, %v7409_v1 }
0x19b0   : > { %6895 = vmatmul.mubr.msk.f32.vlgmr.msra.gmra.mrb[32].mxu1 %vm1611_vm4, %v3783_v35 }
0x19b1   : > { %6898 = vmatpush3.xpose.msk.msra.mxu0 %vm1611_vm4, %v4260_v15  ;;  %6904 = vmatprep.mubr.msk.f32.mxu1 %vm8182_vm1, %v8183_v13 }
0x19b2   : > { %v7419_v16 = vpop.eup %7418  ;;  %7075 = vmatprep.subr.bf16.mxu0 %v8181_v10 }
0x19b3   : > { %v4261_v17 = vmul.f32 %v7419_v16, %v7411_v4 }
0x19b4   : > { %6900 = vmatmul.mubr.msk.f32.vlgmr.msra.gmra.mrb[26].mxu0 %vm1611_vm4, %v3784_v36 }
0x19b5   : > { %6903 = vmatpush3.xpose.msk.msra.mxu1 %vm1611_vm4, %v4261_v17  ;;  %6915 = vmatprep.mubr.msk.f32.mxu0 %vm8182_vm1, %v8183_v13 }
0x19b6   : > { %7081 = vmatprep.subr.bf16.mxu1 %v8181_v10  ;;  %7077 = vmatpush3.bf16.msra.mxu0 %v7076_v20 }
0x19b7   : > { %7078 = vmatprep.subr.bf16.mxu0 %v8181_v10 }
0x19b8   : > { %6905 = vmatmul.mubr.msk.f32.vlgmr.msra.gmra.mrb[34].mxu1 %vm1611_vm4, %v3785_v37 }
0x19b9   : > { %6926 = vmatprep.mubr.msk.f32.mxu1 %vm8182_vm1, %v8183_v13  ;;  %7083 = vmatpush3.bf16.msra.mxu1 %v7082_v43 }
0x19ba   : > { %7080 = vmatpush3.bf16.msra.mxu0 %v7079_v22  ;;  %7084 = vmatprep.subr.bf16.mxu1 %v8181_v10 }
0x19bb   : > { %6929 = vmatprep.subr.mxu0 %v8183_v13 }
0x19bd   : > { %7086 = vmatpush3.bf16.msra.mxu1 %v7085_v45 }
0x19be   : > { %6934 = vmatprep.subr.mxu1 %v8183_v13 }
0x1a7f   : > { %v4334_v23 = vpop.f32.mrb[24].mxu0 }
0x1a80   : > { %4566 = vxpose.xlu1.b32.start [1/4] (short) (narrow) %v4334_v23, 8  ;;  %v6891_v24 = vpop.f32.mrb[25].mxu0 }
0x1a83   : > { %v4410_v26 = vpop.f32.mrb[32].mxu1 }
0x1a84   : > { %4567 = vxpose.xlu1.b32.cont [2/4] (short) (narrow) %v4410_v26, 8  ;;  %v6896_v27 = vpop.f32.mrb[33].mxu1 }
0x1a87   : > { %v4486_v28 = vpop.f32.mrb[26].mxu0 }
0x1a88   : > { %v6901_v29 = vpop.f32.mrb[27].mxu0  ;;  %4568 = vxpose.xlu1.b32.cont [3/4] (short) (narrow) %v4486_v28, 8 }
0x1a8b   : > { %v4562_v30 = vpop.f32.mrb[34].mxu1 }
0x1a8c   : > { %4569 = vxpose.xlu1.b32.end [4/4] (short) (narrow) %v4562_v30, 8  ;;  %v6906_v31 = vpop.f32.mrb[35].mxu1 }
0x1b00   : > { %v4582_v32 = vpop.trf.xlu1 }
0x1b01   : > { %6916 = vmatmul.mubr.msk.f32.vlgmr.msra.gmra.mrb[28].mxu0 %vm1224_vm0, %v4582_v32 }
0x1b02   : > { %6930 = vmatpush3.msra.mxu0 %v9151_v53  ;;  %6931 = vmatprep.mubr.msk.f32.mxu0 %vm8182_vm1, %v8183_v13 }
0x1b03   : > { %6939 = vmatprep.subr.mxu0 %v8183_v13 }
0x1bd4   : > { %v4680_v33 = vpop.f32.mrb[28].mxu0 }
0x1bd5   : > { %v9358_v34 = vadd.f32 %v6503_v25, %v4680_v33  ;;  %v6917_v35 = vpop.f32.mrb[29].mxu0 }
0x1bd7   : > { %v4688_v36 = vsel %vm1224_vm0, %v9358_v34, 0.0 }
0x1bd8   : > { %4689 = vadd.xlane.f32.xlu0 %v4688_v36 }
0x1c65   : > { %v4690_v37 = vpop.xlane.xlu0 %4689 }
0x1c66   : > { %v4691_v38 = vmul.f32 0.03125, %v4690_v37 }
0x1c68   : > { %v4692_v39 = vsub.f32 %v9358_v34, %v4691_v38 }
0x1c6a   : > { %v4693_v5 = vmul.f32 %v4692_v39, %v4692_v39  ;;  %v4713_v4 = vmul.f32 %v6505_v2, %v4692_v39 }
0x1c6c   : > { %v4694_v53 = vsel %vm1224_vm0, %v4693_v5, 0.0 }
0x1c6d   : > { %4695 = vadd.xlane.f32.xlu0 %v4694_v53 }
0x1cfa   : > { %v4696_v46 = vpop.xlane.xlu0 %4695 }
0x1cfb   : > { %v4697_v59 = vmul.f32 0.032258064, %v4696_v46 }
0x1cfd   : > { %7420 = vrsqrt.f32 %v4697_v59  ;;  %vm4700_vm12 = vcmp.eq.f32.partialorder %v4697_v59, inf  ;;  %v4703_v61 = vand.u32 2147483648, %v4697_v59  ;;  %vm4702_vm13 = vcmp.eq.f32.partialorder %v4697_v59, 0.0 }
0x1d07   : > { %v7421_v47 = vpop.eup %7420 }
0x1d08   : > { %v4699_v52 = vmul.f32 %v7421_v47, %v4697_v59 }
0x1d0a   : > { %v4701_v63 = vsel %vm4700_vm12, %v4697_v59, %v4699_v52 }
0x1d0b   : > { %v4704_v0 = vsel %vm4702_vm13, %v4703_v61, %v4701_v63 }
0x1d0c   : > { %v4705_v1 = vadd.f32 1e-06, %v4704_v0 }
0x1d0e   : > { %7422 = vrcp.f32 %v4705_v1 }
0x1d18   : > { %v7423_v6 = vpop.eup %7422 }
0x1d19   : > { %v4714_v8 = vmul.f32 %v7423_v6, %v4713_v4 }
0x1d1b   : > { %v4721_v56 = vadd.f32 %v6506_v7, %v4714_v8 }
0x1d1d   : > { %6927 = vmatmul.mubr.msk.f32.vlgmr.msra.gmra.mrb[36].mxu1 %vm1224_vm0, %v4721_v56 }
0x1d1e   : > { %6935 = vmatpush3.msra.mxu1 %v9153_v54  ;;  %6936 = vmatprep.mubr.msk.f32.mxu1 %vm8182_vm1, %v8183_v13 }
0x1d1f   : > { %6944 = vmatprep.subr.mxu1 %v8183_v13 }
0x1df0   : > { %v4804_v9 = vpop.f32.mrb[36].mxu1 }
0x1df1   : > { %v4805_v11 = vadd.f32 %v6511_v48, %v4804_v9  ;;  %v6928_v12 = vpop.f32.mrb[37].mxu1 }
0x1df3   : > { %4808 = vxpose.xlu0.b32.start.end [1/1] (short) (narrow) %v4805_v11, 32 }
0x1e73   : > { %v4824_v14 = vpop.trf.xlu0 }
0x1e74   : > { %4840 = vxpose.xlu1.b32.start.end [1/1] (short) (narrow) %v4824_v14, 8 }
0x1e77   : > { %v4825_v49 = vpop.trf.xlu0 }
0x1e78   : > { %4872 = vxpose.xlu1.b32.start.end [1/1] (short) (narrow) %v4825_v49, 8 }
0x1e7b   : > { %v4826_v15 = vpop.trf.xlu0 }
0x1e7c   : > { %4904 = vxpose.xlu1.b32.start.end [1/1] (short) (narrow) %v4826_v15, 8  ;;  %v5650_v15 = vld [vmem:[#allocation25 + $0x28] sm:$0xff] }
0x1e7f   : > { %v4827_v16 = vpop.trf.xlu0 }
0x1e80   : > { %4936 = vxpose.xlu1.b32.start.end [1/1] (short) (narrow) %v4827_v16, 8  ;;  %v5651_v16 = vld [vmem:[#allocation25 + $0x30] sm:$0xff] }
0x1ef4   : > { %v4856_v17 = vpop.trf.xlu1 }
0x1ef5   : > { %6932 = vmatmul.mubr.msk.f32.vlgmr.msra.gmra.mrb[30].mxu0 %vm1611_vm4, %v4856_v17 }
0x1ef6   : > { %6940 = vmatpush3.msra.mxu0 %v9155_v51  ;;  %6941 = vmatprep.mubr.msk.f32.mxu0 %vm8182_vm1, %v8183_v13 }
0x1ef7   : > { %6949 = vmatprep.subr.mxu0 %v8183_v13 }
0x1ef8   : > { %v4888_v54 = vpop.trf.xlu1 }
0x1ef9   : > { %6937 = vmatmul.mubr.msk.f32.vlgmr.msra.gmra.mrb[38].mxu1 %vm1611_vm4, %v4888_v54  ;;  %v5652_v54 = vld [vmem:[#allocation25 + $0x38] sm:$0xff] }
0x1efa   : > { %6945 = vmatpush3.msra.mxu1 %v9157_v55  ;;  %6946 = vmatprep.mubr.msk.f32.mxu1 %vm8182_vm1, %v8183_v13 }
0x1efb   : > { %6954 = vmatprep.subr.mxu1 %v8183_v13 }
0x1efc   : > { %v4920_v50 = vpop.trf.xlu1 }
0x1efd   : > { %6942 = vmatmul.mubr.msk.f32.vlgmr.msra.gmra.mrb[32].mxu0 %vm1611_vm4, %v4920_v50 }
0x1efe   : > { %6951 = vmatprep.mubr.msk.f32.mxu0 %vm8182_vm1, %v8183_v13 }
0x1f00   : > { %v4952_v51 = vpop.trf.xlu1 }
0x1f01   : > { %6947 = vmatmul.mubr.msk.f32.vlgmr.msra.gmra.mrb[40].mxu1 %vm1611_vm4, %v4952_v51 }
0x1f02   : > { %6956 = vmatprep.mubr.msk.f32.mxu1 %vm8182_vm1, %v8183_v13 }
0x1fc8   : > { %v5037_v18 = vpop.f32.mrb[30].mxu0 }
0x1fc9   : > { %v5260_v19 = vmul.f32 0.35355338, %v5037_v18  ;;  %v6933_v55 = vpop.f32.mrb[31].mxu0 }
0x1fcb   : > { %v5264_v20 = vadd.f32 %v5260_v19, %v9183_v3 }
0x1fcc   : > { %v5110_v21 = vpop.f32.mrb[38].mxu1 }
0x1fcd   : > { %v5261_v22 = vmul.f32 0.35355338, %v5110_v21  ;;  %v6938_v23 = vpop.f32.mrb[39].mxu1  ;;  %v5268_v24 = vsel %vm1611_vm4, %v5264_v20, -inf }
0x1fce   : > { %5269 = vmax.xlane.f32.xlu1 %v5268_v24  ;;  %v6525_v23 = vld [vmem:[#allocation26 + $0x1] ss:$0 sm:$0xff] }
0x1fcf   : > { %v5265_v26 = vadd.f32 %v5261_v22, %v9183_v3 }
0x1fd0   : > { %v5183_v27 = vpop.f32.mrb[32].mxu0 }
0x1fd1   : > { %v5262_v28 = vmul.f32 0.35355338, %v5183_v27  ;;  %v6943_v29 = vpop.f32.mrb[33].mxu0  ;;  %v5271_v30 = vsel %vm1611_vm4, %v5265_v26, -inf }
0x1fd2   : > { %5272 = vmax.xlane.f32.xlu0 %v5271_v30 }
0x1fd3   : > { %v5266_v31 = vadd.f32 %v5262_v28, %v9183_v3 }
0x1fd4   : > { %v5256_v32 = vpop.f32.mrb[40].mxu1 }
0x1fd5   : > { %v5263_v25 = vmul.f32 0.35355338, %v5256_v32  ;;  %v6948_v33 = vpop.f32.mrb[41].mxu1  ;;  %v5274_v35 = vsel %vm1611_vm4, %v5266_v31, -inf }
0x1fd6   : > { %5275 = vmax.xlane.f32.xlu1 %v5274_v35  ;;  %v5774_v35 = vld [vmem:[#allocation28 + $0x20] sm:$0xff] }
0x1fd7   : > { %v5267_v36 = vadd.f32 %v5263_v25, %v9183_v3 }
0x1fd9   : > { %v5277_v37 = vsel %vm1611_vm4, %v5267_v36, -inf }
0x1fda   : > { %5278 = vmax.xlane.f32.xlu1 %v5277_v37  ;;  %v5776_v37 = vld [vmem:[#allocation28 + $0x30] sm:$0xff] }
0x205b   : > { %v5270_v38 = vpop.xlane.xlu1 %5269 }
0x205c   : > { %v5280_v39 = vsub.f32 %v5264_v20, %v5270_v38 }
0x205e   : > { %v5284_v5 = vmul.f32 1.442695, %v5280_v39  ;;  %v5777_v39 = vld [vmem:[#allocation28 + $0x38] sm:$0xff] }
0x205f   : > { %v5273_v53 = vpop.xlane.xlu0 %5272 }
0x2060   : > { %7424 = vpow2.f32 %v5284_v5  ;;  %v5281_v40 = vsub.f32 %v5265_v26, %v5273_v53  ;;  %v7097_v5 = vpack.c.bf16 %v5777_v39, %v5776_v37  ;;  %v6532_v53 = vld [vmem:[%s9729_s1 + $0x48] sm:$0xff]  ;;  %v6543_v39 = vld [vmem:[%s9731_s19] ss:$0 sm:$0xff] }
0x2062   : > { %v5286_v41 = vmul.f32 1.442695, %v5281_v40  ;;  %v6533_v40 = vld [vmem:[%s9729_s1 + $0x50] sm:$0xff] }
0x2063   : > { %v5276_v42 = vpop.xlane.xlu1 %5275 }
0x2064   : > { %7426 = vpow2.f32 %v5286_v41  ;;  %v5282_v43 = vsub.f32 %v5266_v31, %v5276_v42  ;;  %v6534_v42 = vld [vmem:[%s9729_s1 + $0x58] sm:$0xff] }
0x2066   : > { %v5288_v44 = vmul.f32 1.442695, %v5282_v43  ;;  %v7103_v43 = vpack.c.bf16 %v6534_v42, %v6533_v40 }
0x2067   : > { %v5279_v45 = vpop.xlane.xlu1 %5278 }
0x2068   : > { %7428 = vpow2.f32 %v5288_v44  ;;  %v5283_v46 = vsub.f32 %v5267_v36, %v5279_v45  ;;  %v5775_v36 = vld [vmem:[#allocation28 + $0x28] sm:$0xff]  ;;  %v6536_v45 = vld [vmem:[%s9729_s1 + $0x68] sm:$0xff] }
0x2069   : > { %v7094_v38 = vpack.c.bf16 %v5775_v36, %v5774_v35  ;;  %v6535_v44 = vld [vmem:[%s9729_s1 + $0x60] sm:$0xff] }
0x206a   : > { %v7425_v59 = vpop.eup %7424  ;;  %v5290_v47 = vmul.f32 1.442695, %v5283_v46  ;;  %v7106_v46 = vpack.c.bf16 %v6536_v45, %v6535_v44 }
0x206b   : > { %v5292_v3 = vsel %vm1611_vm4, %v7425_v59, 0.0 }
0x206c   : > { %7430 = vpow2.f32 %v5290_v47  ;;  %5293 = vadd.xlane.f32.xlu1 %v5292_v3 }
0x206e   : > { %v7427_v52 = vpop.eup %7426 }
0x206f   : > { %v5295_v61 = vsel %vm1611_vm4, %v7427_v52, 0.0 }
0x2070   : > { %5296 = vadd.xlane.f32.xlu1 %v5295_v61 }
0x2072   : > { %v7429_v63 = vpop.eup %7428 }
0x2073   : > { %v5298_v0 = vsel %vm1611_vm4, %v7429_v63, 0.0 }
0x2074   : > { %5299 = vadd.xlane.f32.xlu1 %v5298_v0 }
0x2076   : > { %v7431_v1 = vpop.eup %7430 }
0x2077   : > { %v5301_v2 = vsel %vm1611_vm4, %v7431_v1, 0.0 }
0x2078   : > { %5302 = vadd.xlane.f32.xlu1 %v5301_v2  ;;  %v6527_v2 = vld [vmem:[#allocation14 + $0x1] ss:$0 sm:$0xff] }
0x20f9   : > { %v5294_v4 = vpop.xlane.xlu1 %5293 }
0x20fa   : > { %7432 = vrcp.f32 %v5294_v4 }
0x20fd   : > { %v5297_v6 = vpop.xlane.xlu1 %5296 }
0x20fe   : > { %7434 = vrcp.f32 %v5297_v6 }
0x2101   : > { %v5300_v7 = vpop.xlane.xlu1 %5299 }
0x2102   : > { %7436 = vrcp.f32 %v5300_v7  ;;  %v6528_v7 = vld [vmem:[#allocation16 + $0x1] ss:$0 sm:$0xff] }
0x2104   : > { %v7433_v8 = vpop.eup %7432 }
0x2105   : > { %v5308_v56 = vmul.f32 %v7433_v8, %v7425_v59  ;;  %v5303_v48 = vpop.xlane.xlu1 %5302 }
0x2106   : > { %7438 = vrcp.f32 %v5303_v48  ;;  %v6537_v48 = vld [vmem:[%s9729_s1 + $0x70] sm:$0xff] }
0x2107   : > { %6950 = vmatpush3.xpose.msk.msra.mxu0 %vm1611_vm4, %v5308_v56 }
0x2108   : > { %v7435_v9 = vpop.eup %7434  ;;  %6959 = vmatprep.subr.mxu0 %v8183_v13 }
0x2109   : > { %v5309_v11 = vmul.f32 %v7435_v9, %v7427_v52  ;;  %v6538_v9 = vld [vmem:[%s9729_s1 + $0x78] sm:$0xff] }
0x210a   : > { %6952 = vmatmul.mubr.msk.f32.vlgmr.msra.gmra.mrb[34].mxu0 %vm1611_vm4, %v9159_v57 }
0x210b   : > { %6955 = vmatpush3.xpose.msk.msra.mxu1 %vm1611_vm4, %v5309_v11  ;;  %6961 = vmatprep.mubr.msk.f32.mxu0 %vm8182_vm1, %v8183_v13  ;;  %v7109_v11 = vpack.c.bf16 %v6538_v9, %v6537_v48 }
0x210c   : > { %v7437_v12 = vpop.eup %7436  ;;  %6964 = vmatprep.subr.mxu1 %v8183_v13 }
0x210d   : > { %v5310_v14 = vmul.f32 %v7437_v12, %v7429_v63  ;;  %v6529_v12 = vld [vmem:[#allocation29 + $0x1] ss:$0 sm:$0xff] }
0x210e   : > { %6957 = vmatmul.mubr.msk.f32.vlgmr.msra.gmra.mrb[42].mxu1 %vm1611_vm4, %v9161_v58  ;;  %v5649_v58 = vld [vmem:[#allocation25 + $0x20] sm:$0xff] }
0x210f   : > { %6960 = vmatpush3.xpose.msk.msra.mxu0 %vm1611_vm4, %v5310_v14  ;;  %6966 = vmatprep.mubr.msk.f32.mxu1 %vm8182_vm1, %v8183_v13  ;;  %v7088_v17 = vpack.c.bf16 %v5650_v15, %v5649_v58  ;;  %v6539_v15 = vld [vmem:[#allocation31 + $0x1] ss:$0 sm:$0xff] }
0x2110   : > { %v7439_v49 = vpop.eup %7438  ;;  %7087 = vmatprep.subr.bf16.mxu0 %v8181_v10 }
0x2111   : > { %v5311_v57 = vmul.f32 %v7439_v49, %v7431_v1 }
0x2112   : > { %6962 = vmatmul.mubr.msk.f32.vlgmr.msra.gmra.mrb[36].mxu0 %vm1611_vm4, %v9163_v60  ;;  %v7091_v60 = vpack.c.bf16 %v5652_v54, %v5651_v16 }
0x2113   : > { %6965 = vmatpush3.xpose.msk.msra.mxu1 %vm1611_vm4, %v5311_v57  ;;  %6977 = vmatprep.mubr.msk.f32.mxu0 %vm8182_vm1, %v8183_v13 }
0x2114   : > { %7093 = vmatprep.subr.bf16.mxu1 %v8181_v10  ;;  %7089 = vmatpush3.bf16.msra.mxu0 %v7088_v17 }
0x2115   : > { %7090 = vmatprep.subr.bf16.mxu0 %v8181_v10 }
0x2116   : > { %6967 = vmatmul.mubr.msk.f32.vlgmr.msra.gmra.mrb[44].mxu1 %vm1611_vm4, %v9166_v62 }
0x2117   : > { %6988 = vmatprep.mubr.msk.f32.mxu1 %vm8182_vm1, %v8183_v13  ;;  %7095 = vmatpush3.bf16.msra.mxu1 %v7094_v38 }
0x2118   : > { %7092 = vmatpush3.bf16.msra.mxu0 %v7091_v60  ;;  %7096 = vmatprep.subr.bf16.mxu1 %v8181_v10 }
0x2119   : > { %7099 = vmatprep.subr.bf16.mxu0 %v8181_v10 }
0x211b   : > { %7098 = vmatpush3.bf16.msra.mxu1 %v7097_v5 }
0x211c   : > { %7111 = vmatprep.subr.bf16.mxu1 %v8181_v10 }
0x21dd   : > { %v5384_v50 = vpop.f32.mrb[34].mxu0 }
0x21de   : > { %5616 = vxpose.xlu1.b32.start [1/4] (short) (narrow) %v5384_v50, 8  ;;  %v6953_v51 = vpop.f32.mrb[35].mxu0 }
0x21e1   : > { %v5460_v18 = vpop.f32.mrb[42].mxu1 }
0x21e2   : > { %5617 = vxpose.xlu1.b32.cont [2/4] (short) (narrow) %v5460_v18, 8  ;;  %v6958_v62 = vpop.f32.mrb[43].mxu1 }
0x21e5   : > { %v5536_v19 = vpop.f32.mrb[36].mxu0 }
0x21e6   : > { %v6963_v55 = vpop.f32.mrb[37].mxu0  ;;  %5618 = vxpose.xlu1.b32.cont [3/4] (short) (narrow) %v5536_v19, 8 }
0x21e7   : > { %v5987_v55 = vld [vmem:[%s9730_s15] sm:$0xff] }
0x21e9   : > { %v5612_v20 = vpop.f32.mrb[44].mxu1 }
0x21ea   : > { %5619 = vxpose.xlu1.b32.end [4/4] (short) (narrow) %v5612_v20, 8  ;;  %v6968_v21 = vpop.f32.mrb[45].mxu1  ;;  %v5988_v20 = vld [vmem:[%s9730_s15 + $0x8] sm:$0xff] }
0x21eb   : > { %v5989_v21 = vld [vmem:[%s9730_s15 + $0x10] sm:$0xff] }
0x225e   : > { %v5632_v22 = vpop.trf.xlu1 }
0x225f   : > { %6978 = vmatmul.mubr.msk.f32.vlgmr.msra.gmra.mrb[38].mxu0 %vm1224_vm0, %v5632_v22  ;;  %v7112_v22 = vpack.c.bf16 %v5988_v20, %v5987_v55 }
0x2260   : > { %7007 = vmatprep.mubr.msk.f32.mxu0 %vm8182_vm1, %v8183_v13 }
0x2332   : > { %v5730_v24 = vpop.f32.mrb[38].mxu0 }
0x2333   : > { %v9440_v26 = vadd.f32 %v6525_v23, %v5730_v24  ;;  %v6979_v27 = vpop.f32.mrb[39].mxu0  ;;  %v5990_v23 = vld [vmem:[%s9730_s15 + $0x18] sm:$0xff] }
0x2334   : > { %v7115_v24 = vpack.c.bf16 %v5990_v23, %v5989_v21 }
0x2335   : > { %v5734_v28 = vadd.f32 %v9440_v26, %v9358_v34  ;;  %v6531_v34 = vld [vmem:[%s9729_s1 + $0x40] sm:$0xff] }
0x2336   : > { %v7100_v41 = vpack.c.bf16 %v6532_v53, %v6531_v34 }
0x2337   : > { %v5739_v29 = vsel %vm1224_vm0, %v5734_v28, 0.0 }
0x2338   : > { %5740 = vadd.xlane.f32.xlu0 %v5739_v29  ;;  %7101 = vmatpush3.bf16.msra.mxu0 %v7100_v41 }
0x2339   : > { %7102 = vmatprep.subr.bf16.mxu0 %v8181_v10 }
0x233c   : > { %7104 = vmatpush3.bf16.msra.mxu0 %v7103_v43 }
0x233d   : > { %7105 = vmatprep.subr.bf16.mxu0 %v8181_v10 }
0x2340   : > { %7107 = vmatpush3.bf16.msra.mxu0 %v7106_v46 }
0x2341   : > { %7108 = vmatprep.subr.bf16.mxu0 %v8181_v10 }
0x2344   : > { %7110 = vmatpush3.bf16.msra.mxu0 %v7109_v11 }
0x23c5   : > { %v5741_v30 = vpop.xlane.xlu0 %5740 }
0x23c6   : > { %v5742_v31 = vmul.f32 0.03125, %v5741_v30 }
0x23c8   : > { %v5743_v32 = vsub.f32 %v5734_v28, %v5742_v31 }
0x23ca   : > { %v5744_v25 = vmul.f32 %v5743_v32, %v5743_v32  ;;  %v5764_v4 = vmul.f32 %v6527_v2, %v5743_v32 }
0x23cc   : > { %v5745_v33 = vsel %vm1224_vm0, %v5744_v25, 0.0 }
0x23cd   : > { %5746 = vadd.xlane.f32.xlu0 %v5745_v33  ;;  %v6541_v33 = vld [vmem:[#allocation32] ss:$0 sm:$0xff] }
0x245a   : > { %v5747_v59 = vpop.xlane.xlu0 %5746 }
0x245b   : > { %v5748_v47 = vmul.f32 0.032258064, %v5747_v59 }
0x245d   : > { %7440 = vrsqrt.f32 %v5748_v47  ;;  %vm5751_vm14 = vcmp.eq.f32.partialorder %v5748_v47, inf  ;;  %v5754_v61 = vand.u32 2147483648, %v5748_v47  ;;  %vm5753_vm15 = vcmp.eq.f32.partialorder %v5748_v47, 0.0 }
0x2467   : > { %v7441_v3 = vpop.eup %7440 }
0x2468   : > { %v5750_v52 = vmul.f32 %v7441_v3, %v5748_v47 }
0x246a   : > { %v5752_v63 = vsel %vm5751_vm14, %v5748_v47, %v5750_v52 }
0x246b   : > { %v5755_v0 = vsel %vm5753_vm15, %v5754_v61, %v5752_v63 }
0x246c   : > { %v5756_v1 = vadd.f32 1e-06, %v5755_v0 }
0x246e   : > { %7442 = vrcp.f32 %v5756_v1 }
0x2478   : > { %v7443_v6 = vpop.eup %7442 }
0x2479   : > { %v5765_v8 = vmul.f32 %v7443_v6, %v5764_v4 }
0x247b   : > { %v5772_v56 = vadd.f32 %v6528_v7, %v5765_v8 }
0x247d   : > { %6989 = vmatmul.mubr.msk.f32.vlgmr.msra.gmra.mrb[46].mxu1 %vm1224_vm0, %v5772_v56 }
0x247e   : > { %7018 = vmatprep.mubr.msk.f32.mxu1 %vm8182_vm1, %v8183_v13  ;;  %7113 = vmatpush3.bf16.msra.mxu1 %v7112_v22 }
0x247f   : > { %7114 = vmatprep.subr.bf16.mxu1 %v8181_v10  ;;  %v6542_v10 = vld [vmem:[#allocation34] ss:$0 sm:$0xff] }
0x2482   : > { %7116 = vmatpush3.bf16.msra.mxu1 %v7115_v24 }
0x2550   : > { %v5855_v14 = vpop.f32.mrb[46].mxu1 }
0x2551   : > { %v5856_v49 = vadd.f32 %v6529_v12, %v5855_v14  ;;  %v6990_v57 = vpop.f32.mrb[47].mxu1 }
0x2553   : > { %v5859_v58 = vmax.f32 %v5856_v49, 0.0 }
0x2555   : > { %7008 = vmatmul.mubr.msk.f32.vlgmr.msra.gmra.mrb[40].mxu0 %vm3559_vm9, %v5859_v58 }
0x2628   : > { %v5946_v16 = vpop.f32.mrb[40].mxu0 }
0x2629   : > { %v5947_v13 = vadd.f32 %v6539_v15, %v5946_v16  ;;  %v7009_v17 = vpop.f32.mrb[41].mxu0 }
0x262b   : > { %v5950_v54 = vadd.f32 %v5947_v13, %v9440_v26 }
0x262d   : > { %v5953_v60 = vsel %vm1224_vm0, %v5950_v54, 0.0 }
0x262e   : > { %5954 = vadd.xlane.f32.xlu0 %v5953_v60 }
0x26bb   : > { %v5955_v50 = vpop.xlane.xlu0 %5954 }
0x26bc   : > { %v5956_v51 = vmul.f32 0.03125, %v5955_v50 }
0x26be   : > { %v5957_v18 = vsub.f32 %v5950_v54, %v5956_v51 }
0x26c0   : > { %v5958_v62 = vmul.f32 %v5957_v18, %v5957_v18  ;;  %v5978_v35 = vmul.f32 %v6541_v33, %v5957_v18 }
0x26c2   : > { %v5959_v19 = vsel %vm1224_vm0, %v5958_v62, 0.0 }
0x26c3   : > { %5960 = vadd.xlane.f32.xlu0 %v5959_v19 }
0x2750   : > { %v5961_v26 = vpop.xlane.xlu0 %5960 }
0x2751   : > { %v5962_v27 = vmul.f32 0.032258064, %v5961_v26 }
0x2753   : > { %7444 = vrsqrt.f32 %v5962_v27  ;;  %vm5965_vm1 = vcmp.eq.f32.partialorder %v5962_v27, inf  ;;  %v5968_v30 = vand.u32 2147483648, %v5962_v27  ;;  %vm5967_vm2 = vcmp.eq.f32.partialorder %v5962_v27, 0.0 }
0x275d   : > { %v7445_v28 = vpop.eup %7444 }
0x275e   : > { %v5964_v29 = vmul.f32 %v7445_v28, %v5962_v27 }
0x2760   : > { %v5966_v31 = vsel %vm5965_vm1, %v5962_v27, %v5964_v29 }
0x2761   : > { %v5969_v32 = vsel %vm5967_vm2, %v5968_v30, %v5966_v31 }
0x2762   : > { %v5970_v25 = vadd.f32 1e-06, %v5969_v32 }
0x2764   : > { %7446 = vrcp.f32 %v5970_v25 }
0x276e   : > { %v7447_v36 = vpop.eup %7446 }
0x276f   : > { %v5979_v37 = vmul.f32 %v7447_v36, %v5978_v35 }
0x2771   : > { %v5986_v38 = vadd.f32 %v6542_v10, %v5979_v37 }
0x2773   : > { %7019 = vmatmul.mubr.msk.f32.vlgmr.msra.gmra.mrb[48].mxu1 %vm1224_vm0, %v5986_v38 }
0x2846   : > { %v6067_v5 = vpop.f32.mrb[48].mxu1 }
0x2847   : > { %v6068_v34 = vadd.f32 %v6543_v39, %v6067_v5  ;;  %v7020_v53 = vpop.f32.mrb[49].mxu1 }
0x2849   : > { %6071 = vst [vmem:[%s1208_s4] sm:$0xff] %v6068_v34 }
0x284a   : > { %8057 = shalt.err (!%p8054_p7)
}
0x284b   : > { %s8058_s17 = scalar_lea.hbm %s9504_s2, 128  ;;  %s8062_s18 = scalar_lea.hbm %s9732_s13, 256 }
0x284c   : > { %p8059_p0 = scmp.ne.s32.totalorder %s9504_s2, %s8058_s17  ;;  %p8063_p9 = scmp.lt.u32.totalorder %s9504_s2, %s9732_s13 }
0x284d   : > { %p8064_p8 = scmp.lt.u32.totalorder %s8062_s18, %s8058_s17  ;;  %p8066_p6 = scmp.lt.u32.totalorder %s8058_s17, %s9504_s2 }
0x284e   : > { %p8060_p3 = pnand %p8059_p0, %p9733_p4 }
0x284f   : > { %p8065_p13 = por %p8064_p8, %p8063_p9 }
0x2850   : > { %p8061_p11 = pneg %p8060_p3 }
0x2851   : > { %p8067_p2 = por %p8066_p6, %p8065_p13 }
0x2853   : > { %p8068_p1 = pnand %p8067_p2, %p8061_p11 }
0x2855   : > { %8071 = shalt.err (!%p8068_p1)
}
0x2856   : > { %7193 = dma.vmem_to_hbm [thread:$0]  (%p9733_p4), %s9506_s12, 128, %s9504_s2, %s6073_s6  }
0x2857 PF: > { %s9734_s23 = sld [smem:[#allocation49_spill]]  ;;  %s9735_s25 = sld [smem:[#allocation53_spill]] }
0x2858   : > { %p9737_p10 = scmp.ge.s32.totalorder %s8154_s30, 2 }
0x285d   : > { %s6098_s10 = sand.u32 1, %s9734_s23   ;;  %p9736_p12 = scmp.ne.s32.totalorder %s9735_s25, 0 }
0x285e   : > { %s6099_s8 = scalar_lea.sflag [#allocation4], %s6098_s10 }
0x285f   : > { %p7261_p5 = pnand %p9737_p10, %p9736_p12 }
0x2861   : > { %8137 = dma.done.wait (!%p7261_p5), %s6099_s8, 128  }
0x2862   : > { %8139 = vsyncadd (!%p7261_p5), %s6099_s8, 4294967168  ;;  %s9738_s30 = sld [smem:[#allocation51_spill]]  ;;  %s9739_s24 = sld [smem:[#allocation52_spill]] }
0x2863   : > { %s9740_s8 = smov %s8146_s5  ;;  %s9741_s5 = smov %s8150_s9 }
0x2868   : > { %p55_p7 = scmp.ge.s32.totalorder %s9738_s30, 4   ;;  %s9742_s9 = smov %s9739_s24 }
0x286a   :  { %57 = sbr.rel (!%p55_p7) target bundleno = 47 (0x2f), region = 300 }
0x2871   :  { %6104 = vsyncpa [#allocation3], 1 }
0x2872   :  { %6106 = vsyncpa [#allocation3 + $0x1], 1 }
0x2873   :  { %6107 = vsyncpa [#allocation6], 1 }
0x2874   :  { %6109 = vsyncpa [#allocation6 + $0x1], 1 }
0x2875   :  { %6110 = vsyncpa [#allocation9], 1 }
0x2876   :  { %6112 = vsyncpa [#allocation9 + $0x1], 1 }
0x2877   :  { %6113 = vsyncpa [#allocation12], 1 }
0x2878   :  { %6114 = vsyncpa [#allocation15], 1 }
0x2879   :  { %6115 = vsyncpa [#allocation18], 1 }
0x287a   :  { %6116 = vsyncpa [#allocation21], 1 }
0x287b   :  { %6117 = vsyncpa [#allocation24], 1 }
0x287c   :  { %6118 = vsyncpa [#allocation27], 1 }
0x287d   :  { %6119 = vsyncpa [#allocation30], 1 }
0x287e   :  { %6120 = vsyncpa [#allocation33], 1 }
0x287f   :  { %6121 = vsyncpa [#allocation4], 1 }
0x2880   :  { %6123 = vsyncpa [#allocation4 + $0x1], 1 }

</bundles_post_ra>
